<compile_context>
chip_gen: v6e
topology: v6e:2x2x1
jax: 0.10.0
libtpu: 0.0.40
codegen_flags: <defaults>
</compile_context>

<pallas_src>
import functools
import math

import jax
import jax.numpy as jnp
from jax import lax
from jax.experimental import pallas as pl
from jax.experimental.pallas import tpu as pltpu


def _round_up(x, m):
    return ((x + m - 1) // m) * m


def _pick_compute_dtype():
    # All elementwise values are small non-negative integers (0/1 masks,
    # neighbor sums <= 8), so bf16 math is bit-exact.  v6e/v7x have native bf16
    # VALUs (2x elementwise throughput, half the VMEM bytes); v5e does not, so
    # keep f32 there.
    try:
        kind = jax.devices()[0].device_kind.lower()
    except Exception:
        kind = ""
    if "v5 lite" in kind or "v5e" in kind or "v5lite" in kind:
        return jnp.float32
    return jnp.bfloat16


def _ccq_kernel(pred_ref, true_ref, out_ref, p_buf, g_buf, *, slack, n_bodies):
    """Per-image CCQ counts.

    Inputs are pre-binarized 0/1 masks surrounded by a zero ring of thickness
    >= slack+1 (added by the wrapper): thinning never adds pixels and dilation
    spills at most `slack` into the ring, so every circular roll wraps only
    zero rows/columns and no boundary masks are needed.
    """
    p_buf[...] = pred_ref[0]
    g_buf[...] = true_ref[0]

    def subpass(a, first_pass):
        # Zhang-Suen neighborhood labeling:
        #   P9 P2 P3
        #   P8 P1 P4
        #   P7 P6 P5
        up = jnp.roll(a, 1, axis=0)     # a[r-1, c]
        dn = jnp.roll(a, -1, axis=0)    # a[r+1, c]
        p2, p6 = up, dn
        p4 = jnp.roll(a, -1, axis=1)    # a[r,   c+1]
        p8 = jnp.roll(a, 1, axis=1)     # a[r,   c-1]
        p3 = jnp.roll(up, -1, axis=1)   # a[r-1, c+1]
        p9 = jnp.roll(up, 1, axis=1)    # a[r-1, c-1]
        p5 = jnp.roll(dn, -1, axis=1)   # a[r+1, c+1]
        p7 = jnp.roll(dn, 1, axis=1)    # a[r+1, c-1]

        # B(P1): number of set neighbors.
        nsum = p2 + p3 + p4 + p5 + p6 + p7 + p8 + p9
        # A(P1) = B(P1) - sum of cyclically-adjacent neighbor products.
        # All values are exact small integers in bf16/f32, so == is safe.
        pair = (p2 * p3 + p3 * p4 + p4 * p5 + p5 * p6
                + p6 * p7 + p7 * p8 + p8 * p9 + p9 * p2)
        trans = nsum - pair

        if first_pass:
            c1 = p2 * p4 * p6
            c2 = p4 * p6 * p8
        else:
            c1 = p2 * p4 * p8
            c2 = p2 * p6 * p8

        remove = ((a > 0.5)
                  & (nsum >= 2.0) & (nsum <= 6.0)
                  & (trans == 1.0)
                  & (c1 == 0.0) & (c2 == 0.0))
        return jnp.where(remove, jnp.zeros_like(a), a), remove

    def full_iter(p, g):
        p, r1 = subpass(p, True)
        p, r2 = subpass(p, False)
        g, r3 = subpass(g, True)
        g, r4 = subpass(g, False)
        return p, g, r1 | r2 | r3 | r4

    # Zhang-Suen thinning with data-dependent early exit.  Two full iterations
    # per while-loop body so the serializing reduce -> scalar -> branch
    # checkpoint runs half as often (an extra converged iteration is a no-op).
    def cond(state):
        it, changed = state
        return jnp.logical_and(it < n_bodies, changed > 0)

    def body(state):
        it, _ = state
        p, g, ra = full_iter(p_buf[...], g_buf[...])
        p, g, rb = full_iter(p, g)
        p_buf[...] = p
        g_buf[...] = g
        removed = jnp.sum((ra | rb).astype(jnp.float32))
        return it + 1, (removed > 0.5).astype(jnp.int32)

    lax.while_loop(cond, body, (jnp.int32(0), jnp.int32(1)))
    p_skel = p_buf[...]
    g_skel = g_buf[...]

    # distance_transform_edt(~skel) <= slack  <=>  disk(radius=slack) dilation
    # of the skeleton covers the pixel.  Fused separable form: grow the
    # horizontal dilation incrementally and max-accumulate the +/-dr sublane
    # shifts as soon as the needed half-width is reached (~3 live planes
    # instead of slack+2).
    def dilate_disk(a):
        widths = [int(math.isqrt(slack * slack - dr * dr))
                  for dr in range(slack + 1)]
        by_width = {}
        for dr in range(slack + 1):
            by_width.setdefault(widths[dr], []).append(dr)
        cur = a
        out = None
        for w in range(slack + 1):
            if w > 0:
                cur = jnp.maximum(cur, jnp.maximum(jnp.roll(cur, 1, axis=1),
                                                   jnp.roll(cur, -1, axis=1)))
            for dr in by_width.get(w, ()):
                if dr == 0:
                    contrib = cur
                else:
                    contrib = jnp.maximum(jnp.roll(cur, dr, axis=0),
                                          jnp.roll(cur, -dr, axis=0))
                out = contrib if out is None else jnp.maximum(out, contrib)
        return out

    # Final reductions in f32 (pixel counts can exceed bf16 integer range).
    sum_p = jnp.sum(p_skel.astype(jnp.float32))
    sum_g = jnp.sum(g_skel.astype(jnp.float32))

    gt_near = dilate_disk(g_skel)                  # dist_gt   <= slack
    tp = jnp.sum((gt_near * p_skel).astype(jnp.float32))
    # gt_near is dead before the second dilation starts (lower peak liveness).
    pred_near = dilate_disk(p_skel)                # dist_pred <= slack
    cov_g = jnp.sum((pred_near * g_skel).astype(jnp.float32))

    fp = sum_p - tp          # (1 - gt_near)   * p_skel summed
    fn = sum_g - cov_g       # (1 - pred_near) * g_skel summed

    # Lane-dense (8, 128) output block: [tp, fp, fn, 0, ...] on sublane 0.
    sub = lax.broadcasted_iota(jnp.int32, (8, 128), 0)
    lane = lax.broadcasted_iota(jnp.int32, (8, 128), 1)
    vals = jnp.where(lane == 0, tp,
           jnp.where(lane == 1, fp,
           jnp.where(lane == 2, fn, 0.0)))
    out_ref[0] = jnp.where(sub == 0, vals, 0.0)


def thresholded_ccq_metric(y_pred, y_true, *, threshold=0.5, slack=3,
                           eps=1e-12, greater_is_road=True):
    """JAX/Pallas equivalent of ThresholdedCCQMetric.forward (data_dim=2)."""
    # _ensure_channel: (B, H, W) -> (B, 1, H, W)
    if y_pred.ndim == 3:
        y_pred = y_pred[:, None]
    if y_true.ndim == 3:
        y_true = y_true[:, None]
    if y_pred.shape != y_true.shape:
        raise ValueError(f"Shape mismatch: pred {y_pred.shape} vs true {y_true.shape}")
    if y_pred.shape[1] != 1:
        raise ValueError("CCQ expects binary masks (C = 1)")

    # TODO(synk): non-integer slack would need widths = floor(sqrt(slack^2-dr^2))
    # with the float slack; the PyTorch module itself truncates via int(slack).
    slack = int(slack)
    cdtype = _pick_compute_dtype()

    # Binarize in plain JAX; ship compact 0/1 masks in the compute dtype.
    if greater_is_road:
        pred = (y_pred[:, 0] > threshold).astype(cdtype)
        true = (y_true[:, 0] > threshold).astype(cdtype)
    else:
        pred = (y_pred[:, 0] <= threshold).astype(cdtype)
        true = (y_true[:, 0] <= threshold).astype(cdtype)

    B, H, W = pred.shape

    # Zero-pad each image by slack+1 on every side (background == identity for
    # this metric) and round H up to a sublane multiple (16 for bf16, 8 for
    # f32), W up to a lane multiple of 128.  Gives lane-dense vregs and lets
    # the kernel drop all boundary masks.
    itemsize = jnp.dtype(cdtype).itemsize
    ring = slack + 1
    sub_mult = 8 * (4 // itemsize)
    Hp = _round_up(H + 2 * ring, sub_mult)
    Wp = _round_up(W + 2 * ring, 128)
    pad_h = (ring, Hp - H - ring)
    pad_w = (ring, Wp - W - ring)
    pred = jnp.pad(pred, ((0, 0), pad_h, pad_w))
    true = jnp.pad(true, ((0, 0), pad_h, pad_w))

    # Zhang-Suen iteration count is bounded by half the max foreground
    # thickness (<= min(H, W)/2); the while_loop exits on convergence, two
    # iterations per loop body.
    max_iters = min(H, W) // 2 + 4
    n_bodies = (max_iters + 1) // 2

    kernel = functools.partial(_ccq_kernel, slack=slack, n_bodies=int(n_bodies))

    # VMEM budget: double-buffered inputs + 2 persistent scratch planes +
    # ~16 live elementwise temporaries per subpass, capped at 3/4 of the
    # physical per-core VMEM (128 MiB v5e/v6e, 64 MiB v7x).
    plane = Hp * Wp * itemsize
    est = (2 * 2 + 2 + 16) * plane + (1 << 20)
    try:
        vmem_cap = int(pltpu.get_tpu_info().vmem_capacity_bytes)
    except Exception:
        vmem_cap = 64 * 1024 * 1024
    vmem_limit = int(min(max(est, 32 * 1024 * 1024), vmem_cap * 3 // 4))

    counts = pl.pallas_call(
        kernel,
        out_shape=jax.ShapeDtypeStruct((B, 8, 128), jnp.float32),
        grid_spec=pltpu.PrefetchScalarGridSpec(
            num_scalar_prefetch=0,
            grid=(B,),
            in_specs=[
                pl.BlockSpec((1, Hp, Wp), lambda b: (b, 0, 0)),
                pl.BlockSpec((1, Hp, Wp), lambda b: (b, 0, 0)),
            ],
            out_specs=pl.BlockSpec((1, 8, 128), lambda b: (b, 0, 0)),
            scratch_shapes=[
                pltpu.VMEM((Hp, Wp), cdtype),   # pred skeleton working buffer
                pltpu.VMEM((Hp, Wp), cdtype),   # gt   skeleton working buffer
            ],
        ),
        compiler_params=pltpu.CompilerParams(
            # Images are independent; lets v7x shard the batch over its 2 TCs.
            dimension_semantics=("parallel",),
            vmem_limit_bytes=vmem_limit,
        ),
    )(pred, true)

    tp = counts[:, 0, 0]
    fp = counts[:, 0, 1]
    fn = counts[:, 0, 2]

    degenerate = (tp + fp + fn) == 0.0
    correctness = jnp.where(degenerate, 1.0, tp / (tp + fp + eps))
    completeness = jnp.where(degenerate, 1.0, tp / (tp + fn + eps))
    quality = jnp.where(degenerate, 1.0, tp / (tp + fp + fn + eps))

    return {
        "correctness": jnp.mean(correctness),
        "completeness": jnp.mean(completeness),
        "quality": jnp.mean(quality),
    }


if __name__ == "__main__":
    key = jax.random.PRNGKey(0)
    k1, k2 = jax.random.split(key)
    B, C, H, W = 2, 1, 16, 16
    # Probability-like prediction and a binary-ish ground truth, NCHW like PyTorch.
    y_pred = jax.random.uniform(k1, (B, C, H, W), dtype=jnp.float32)
    y_true = (jax.random.uniform(k2, (B, C, H, W), dtype=jnp.float32) > 0.5
              ).astype(jnp.float32)

    out = thresholded_ccq_metric(y_pred, y_true)
    jax.block_until_ready(out)
    print("KERNEL_OK")
</pallas_src>

<mosaic_0001>
module attributes {stable_mosaic.version = 11 : i64} {
  func.func @_ccq_kernel(%arg0: i32, %arg1: memref<1x32x128xbf16, #tpu.memory_space<vmem>>, %arg2: memref<1x32x128xbf16, #tpu.memory_space<vmem>>, %arg3: memref<1x8x128xf32, #tpu.memory_space<vmem>>, %arg4: memref<32x128xbf16, #tpu.memory_space<vmem>>, %arg5: memref<32x128xbf16, #tpu.memory_space<vmem>>) attributes {dimension_semantics = [#tpu.dimension_semantics<parallel>], iteration_bounds = array<i64: 2>, scalar_prefetch = 0 : i64, scratch_operands = 2 : i64, tpu.core_type = #tpu.core_type<tc>, window_params = [{transform_indices = @transform_0, window_bounds = array<i64: 1, 32, 128>}, {transform_indices = @transform_1, window_bounds = array<i64: 1, 32, 128>}, {transform_indices = @transform_2, window_bounds = array<i64: 1, 8, 128>}]} {
    %c0 = arith.constant 0 : index
    %c0_0 = arith.constant 0 : index
    %c0_1 = arith.constant 0 : index
    %0 = vector.load %arg1[%c0, %c0_0, %c0_1] : memref<1x32x128xbf16, #tpu.memory_space<vmem>>, vector<1x32x128xbf16>
    %1 = vector.shape_cast %0 : vector<1x32x128xbf16> to vector<32x128xbf16>
    %c0_2 = arith.constant 0 : index
    %c0_3 = arith.constant 0 : index
    %2 = vector.load %arg4[%c0_2, %c0_3] : memref<32x128xbf16, #tpu.memory_space<vmem>>, vector<32x128xbf16>
    tpu.vector_store %arg4[%c0_2, %c0_3], %1 {strides = array<i32>} : memref<32x128xbf16, #tpu.memory_space<vmem>>, vector<32x128xbf16>,
    %c0_4 = arith.constant 0 : index
    %c0_5 = arith.constant 0 : index
    %c0_6 = arith.constant 0 : index
    %3 = vector.load %arg2[%c0_4, %c0_5, %c0_6] : memref<1x32x128xbf16, #tpu.memory_space<vmem>>, vector<1x32x128xbf16>
    %4 = vector.shape_cast %3 : vector<1x32x128xbf16> to vector<32x128xbf16>
    %c0_7 = arith.constant 0 : index
    %c0_8 = arith.constant 0 : index
    %5 = vector.load %arg5[%c0_7, %c0_8] : memref<32x128xbf16, #tpu.memory_space<vmem>>, vector<32x128xbf16>
    tpu.vector_store %arg5[%c0_7, %c0_8], %4 {strides = array<i32>} : memref<32x128xbf16, #tpu.memory_space<vmem>>, vector<32x128xbf16>,
    %c0_i32 = arith.constant 0 : i32
    %c1_i32 = arith.constant 1 : i32
    %6:2 = scf.while (%arg6 = %c0_i32, %arg7 = %c1_i32) : (i32, i32) -> (i32, i32) {
      %c6_i32 = arith.constant 6 : i32
      %151 = arith.cmpi slt, %arg6, %c6_i32 : i32
      %c0_i32_24 = arith.constant 0 : i32
      %152 = arith.cmpi sgt, %arg7, %c0_i32_24 : i32
      %153 = arith.andi %151, %152 : i1
      scf.condition(%153) %arg6, %arg7 : i32, i32
    } do {
    ^bb0(%arg6: i32, %arg7: i32):
      %c0_24 = arith.constant 0 : index
      %c0_25 = arith.constant 0 : index
      %151 = vector.load %arg4[%c0_24, %c0_25] : memref<32x128xbf16, #tpu.memory_space<vmem>>, vector<32x128xbf16>
      %c0_26 = arith.constant 0 : index
      %c0_27 = arith.constant 0 : index
      %152 = vector.load %arg5[%c0_26, %c0_27] : memref<32x128xbf16, #tpu.memory_space<vmem>>, vector<32x128xbf16>
      %153 = vector.extract_strided_slice %151 {offsets = [31, 0], sizes = [1, 128], strides = [1, 1]} : vector<32x128xbf16> to vector<1x128xbf16>
      %154 = vector.extract_strided_slice %151 {offsets = [0, 0], sizes = [31, 128], strides = [1, 1]} : vector<32x128xbf16> to vector<31x128xbf16>
      %155 = tpu.concatenate %153, %154 in 0 : vector<1x128xbf16>, vector<31x128xbf16> -> vector<32x128xbf16>
      %156 = vector.extract_strided_slice %151 {offsets = [1, 0], sizes = [31, 128], strides = [1, 1]} : vector<32x128xbf16> to vector<31x128xbf16>
      %157 = vector.extract_strided_slice %151 {offsets = [0, 0], sizes = [1, 128], strides = [1, 1]} : vector<32x128xbf16> to vector<1x128xbf16>
      %158 = tpu.concatenate %156, %157 in 0 : vector<31x128xbf16>, vector<1x128xbf16> -> vector<32x128xbf16>
      %159 = vector.extract_strided_slice %151 {offsets = [0, 1], sizes = [32, 127], strides = [1, 1]} : vector<32x128xbf16> to vector<32x127xbf16>
      %160 = vector.extract_strided_slice %151 {offsets = [0, 0], sizes = [32, 1], strides = [1, 1]} : vector<32x128xbf16> to vector<32x1xbf16>
      %161 = tpu.concatenate %159, %160 in 1 : vector<32x127xbf16>, vector<32x1xbf16> -> vector<32x128xbf16>
      %162 = vector.extract_strided_slice %151 {offsets = [0, 127], sizes = [32, 1], strides = [1, 1]} : vector<32x128xbf16> to vector<32x1xbf16>
      %163 = vector.extract_strided_slice %151 {offsets = [0, 0], sizes = [32, 127], strides = [1, 1]} : vector<32x128xbf16> to vector<32x127xbf16>
      %164 = tpu.concatenate %162, %163 in 1 : vector<32x1xbf16>, vector<32x127xbf16> -> vector<32x128xbf16>
      %165 = vector.extract_strided_slice %155 {offsets = [0, 1], sizes = [32, 127], strides = [1, 1]} : vector<32x128xbf16> to vector<32x127xbf16>
      %166 = vector.extract_strided_slice %155 {offsets = [0, 0], sizes = [32, 1], strides = [1, 1]} : vector<32x128xbf16> to vector<32x1xbf16>
      %167 = tpu.concatenate %165, %166 in 1 : vector<32x127xbf16>, vector<32x1xbf16> -> vector<32x128xbf16>
      %168 = vector.extract_strided_slice %155 {offsets = [0, 127], sizes = [32, 1], strides = [1, 1]} : vector<32x128xbf16> to vector<32x1xbf16>
      %169 = vector.extract_strided_slice %155 {offsets = [0, 0], sizes = [32, 127], strides = [1, 1]} : vector<32x128xbf16> to vector<32x127xbf16>
      %170 = tpu.concatenate %168, %169 in 1 : vector<32x1xbf16>, vector<32x127xbf16> -> vector<32x128xbf16>
      %171 = vector.extract_strided_slice %158 {offsets = [0, 1], sizes = [32, 127], strides = [1, 1]} : vector<32x128xbf16> to vector<32x127xbf16>
      %172 = vector.extract_strided_slice %158 {offsets = [0, 0], sizes = [32, 1], strides = [1, 1]} : vector<32x128xbf16> to vector<32x1xbf16>
      %173 = tpu.concatenate %171, %172 in 1 : vector<32x127xbf16>, vector<32x1xbf16> -> vector<32x128xbf16>
      %174 = vector.extract_strided_slice %158 {offsets = [0, 127], sizes = [32, 1], strides = [1, 1]} : vector<32x128xbf16> to vector<32x1xbf16>
      %175 = vector.extract_strided_slice %158 {offsets = [0, 0], sizes = [32, 127], strides = [1, 1]} : vector<32x128xbf16> to vector<32x127xbf16>
      %176 = tpu.concatenate %174, %175 in 1 : vector<32x1xbf16>, vector<32x127xbf16> -> vector<32x128xbf16>
      %177 = arith.addf %155, %167 : vector<32x128xbf16>
      %178 = arith.addf %177, %161 : vector<32x128xbf16>
      %179 = arith.addf %178, %173 : vector<32x128xbf16>
      %180 = arith.addf %179, %158 : vector<32x128xbf16>
      %181 = arith.addf %180, %176 : vector<32x128xbf16>
      %182 = arith.addf %181, %164 : vector<32x128xbf16>
      %183 = arith.addf %182, %170 : vector<32x128xbf16>
      %184 = arith.mulf %155, %167 : vector<32x128xbf16>
      %185 = arith.mulf %167, %161 : vector<32x128xbf16>
      %186 = arith.addf %184, %185 : vector<32x128xbf16>
      %187 = arith.mulf %161, %173 : vector<32x128xbf16>
      %188 = arith.addf %186, %187 : vector<32x128xbf16>
      %189 = arith.mulf %173, %158 : vector<32x128xbf16>
      %190 = arith.addf %188, %189 : vector<32x128xbf16>
      %191 = arith.mulf %158, %176 : vector<32x128xbf16>
      %192 = arith.addf %190, %191 : vector<32x128xbf16>
      %193 = arith.mulf %176, %164 : vector<32x128xbf16>
      %194 = arith.addf %192, %193 : vector<32x128xbf16>
      %195 = arith.mulf %164, %170 : vector<32x128xbf16>
      %196 = arith.addf %194, %195 : vector<32x128xbf16>
      %197 = arith.mulf %170, %155 : vector<32x128xbf16>
      %198 = arith.addf %196, %197 : vector<32x128xbf16>
      %199 = arith.subf %183, %198 : vector<32x128xbf16>
      %200 = arith.mulf %155, %161 : vector<32x128xbf16>
      %201 = arith.mulf %200, %158 : vector<32x128xbf16>
      %202 = arith.mulf %161, %158 : vector<32x128xbf16>
      %203 = arith.mulf %202, %164 : vector<32x128xbf16>
      %cst_28 = arith.constant 5.000000e-01 : bf16
      %204 = vector.broadcast %cst_28 : bf16 to vector<32x128xbf16>
      %205 = arith.cmpf ogt, %151, %204 : vector<32x128xbf16>
      %cst_29 = arith.constant 2.000000e+00 : bf16
      %206 = vector.broadcast %cst_29 : bf16 to vector<32x128xbf16>
      %207 = arith.cmpf oge, %183, %206 : vector<32x128xbf16>
      %208 = arith.andi %205, %207 : vector<32x128xi1>
      %cst_30 = arith.constant 6.000000e+00 : bf16
      %209 = vector.broadcast %cst_30 : bf16 to vector<32x128xbf16>
      %210 = arith.cmpf ole, %183, %209 : vector<32x128xbf16>
      %211 = arith.andi %208, %210 : vector<32x128xi1>
      %cst_31 = arith.constant 1.000000e+00 : bf16
      %212 = vector.broadcast %cst_31 : bf16 to vector<32x128xbf16>
      %213 = arith.cmpf oeq, %199, %212 : vector<32x128xbf16>
      %214 = arith.andi %211, %213 : vector<32x128xi1>
      %cst_32 = arith.constant 0.000000e+00 : bf16
      %215 = vector.broadcast %cst_32 : bf16 to vector<32x128xbf16>
      %216 = arith.cmpf oeq, %201, %215 : vector<32x128xbf16>
      %217 = arith.andi %214, %216 : vector<32x128xi1>
      %cst_33 = arith.constant 0.000000e+00 : bf16
      %218 = vector.broadcast %cst_33 : bf16 to vector<32x128xbf16>
      %219 = arith.cmpf oeq, %203, %218 : vector<32x128xbf16>
      %220 = arith.andi %217, %219 : vector<32x128xi1>
      %cst_34 = arith.constant 0.000000e+00 : bf16
      %221 = vector.broadcast %cst_34 : bf16 to vector<32x128xbf16>
      %222 = arith.select %220, %221, %151 : vector<32x128xi1>, vector<32x128xbf16>
      %223 = vector.extract_strided_slice %222 {offsets = [31, 0], sizes = [1, 128], strides = [1, 1]} : vector<32x128xbf16> to vector<1x128xbf16>
      %224 = vector.extract_strided_slice %222 {offsets = [0, 0], sizes = [31, 128], strides = [1, 1]} : vector<32x128xbf16> to vector<31x128xbf16>
      %225 = tpu.concatenate %223, %224 in 0 : vector<1x128xbf16>, vector<31x128xbf16> -> vector<32x128xbf16>
      %226 = vector.extract_strided_slice %222 {offsets = [1, 0], sizes = [31, 128], strides = [1, 1]} : vector<32x128xbf16> to vector<31x128xbf16>
      %227 = vector.extract_strided_slice %222 {offsets = [0, 0], sizes = [1, 128], strides = [1, 1]} : vector<32x128xbf16> to vector<1x128xbf16>
      %228 = tpu.concatenate %226, %227 in 0 : vector<31x128xbf16>, vector<1x128xbf16> -> vector<32x128xbf16>
      %229 = vector.extract_strided_slice %222 {offsets = [0, 1], sizes = [32, 127], strides = [1, 1]} : vector<32x128xbf16> to vector<32x127xbf16>
      %230 = vector.extract_strided_slice %222 {offsets = [0, 0], sizes = [32, 1], strides = [1, 1]} : vector<32x128xbf16> to vector<32x1xbf16>
      %231 = tpu.concatenate %229, %230 in 1 : vector<32x127xbf16>, vector<32x1xbf16> -> vector<32x128xbf16>
      %232 = vector.extract_strided_slice %222 {offsets = [0, 127], sizes = [32, 1], strides = [1, 1]} : vector<32x128xbf16> to vector<32x1xbf16>
      %233 = vector.extract_strided_slice %222 {offsets = [0, 0], sizes = [32, 127], strides = [1, 1]} : vector<32x128xbf16> to vector<32x127xbf16>
      %234 = tpu.concatenate %232, %233 in 1 : vector<32x1xbf16>, vector<32x127xbf16> -> vector<32x128xbf16>
      %235 = vector.extract_strided_slice %225 {offsets = [0, 1], sizes = [32, 127], strides = [1, 1]} : vector<32x128xbf16> to vector<32x127xbf16>
      %236 = vector.extract_strided_slice %225 {offsets = [0, 0], sizes = [32, 1], strides = [1, 1]} : vector<32x128xbf16> to vector<32x1xbf16>
      %237 = tpu.concatenate %235, %236 in 1 : vector<32x127xbf16>, vector<32x1xbf16> -> vector<32x128xbf16>
      %238 = vector.extract_strided_slice %225 {offsets = [0, 127], sizes = [32, 1], strides = [1, 1]} : vector<32x128xbf16> to vector<32x1xbf16>
      %239 = vector.extract_strided_slice %225 {offsets = [0, 0], sizes = [32, 127], strides = [1, 1]} : vector<32x128xbf16> to vector<32x127xbf16>
      %240 = tpu.concatenate %238, %239 in 1 : vector<32x1xbf16>, vector<32x127xbf16> -> vector<32x128xbf16>
      %241 = vector.extract_strided_slice %228 {offsets = [0, 1], sizes = [32, 127], strides = [1, 1]} : vector<32x128xbf16> to vector<32x127xbf16>
      %242 = vector.extract_strided_slice %228 {offsets = [0, 0], sizes = [32, 1], strides = [1, 1]} : vector<32x128xbf16> to vector<32x1xbf16>
      %243 = tpu.concatenate %241, %242 in 1 : vector<32x127xbf16>, vector<32x1xbf16> -> vector<32x128xbf16>
      %244 = vector.extract_strided_slice %228 {offsets = [0, 127], sizes = [32, 1], strides = [1, 1]} : vector<32x128xbf16> to vector<32x1xbf16>
      %245 = vector.extract_strided_slice %228 {offsets = [0, 0], sizes = [32, 127], strides = [1, 1]} : vector<32x128xbf16> to vector<32x127xbf16>
      %246 = tpu.concatenate %244, %245 in 1 : vector<32x1xbf16>, vector<32x127xbf16> -> vector<32x128xbf16>
      %247 = arith.addf %225, %237 : vector<32x128xbf16>
      %248 = arith.addf %247, %231 : vector<32x128xbf16>
      %249 = arith.addf %248, %243 : vector<32x128xbf16>
      %250 = arith.addf %249, %228 : vector<32x128xbf16>
      %251 = arith.addf %250, %246 : vector<32x128xbf16>
      %252 = arith.addf %251, %234 : vector<32x128xbf16>
      %253 = arith.addf %252, %240 : vector<32x128xbf16>
      %254 = arith.mulf %225, %237 : vector<32x128xbf16>
      %255 = arith.mulf %237, %231 : vector<32x128xbf16>
      %256 = arith.addf %254, %255 : vector<32x128xbf16>
      %257 = arith.mulf %231, %243 : vector<32x128xbf16>
      %258 = arith.addf %256, %257 : vector<32x128xbf16>
      %259 = arith.mulf %243, %228 : vector<32x128xbf16>
      %260 = arith.addf %258, %259 : vector<32x128xbf16>
      %261 = arith.mulf %228, %246 : vector<32x128xbf16>
      %262 = arith.addf %260, %261 : vector<32x128xbf16>
      %263 = arith.mulf %246, %234 : vector<32x128xbf16>
      %264 = arith.addf %262, %263 : vector<32x128xbf16>
      %265 = arith.mulf %234, %240 : vector<32x128xbf16>
      %266 = arith.addf %264, %265 : vector<32x128xbf16>
      %267 = arith.mulf %240, %225 : vector<32x128xbf16>
      %268 = arith.addf %266, %267 : vector<32x128xbf16>
      %269 = arith.subf %253, %268 : vector<32x128xbf16>
      %270 = arith.mulf %225, %231 : vector<32x128xbf16>
      %271 = arith.mulf %270, %234 : vector<32x128xbf16>
      %272 = arith.mulf %225, %228 : vector<32x128xbf16>
      %273 = arith.mulf %272, %234 : vector<32x128xbf16>
      %cst_35 = arith.constant 5.000000e-01 : bf16
      %274 = vector.broadcast %cst_35 : bf16 to vector<32x128xbf16>
      %275 = arith.cmpf ogt, %222, %274 : vector<32x128xbf16>
      %cst_36 = arith.constant 2.000000e+00 : bf16
      %276 = vector.broadcast %cst_36 : bf16 to vector<32x128xbf16>
      %277 = arith.cmpf oge, %253, %276 : vector<32x128xbf16>
      %278 = arith.andi %275, %277 : vector<32x128xi1>
      %cst_37 = arith.constant 6.000000e+00 : bf16
      %279 = vector.broadcast %cst_37 : bf16 to vector<32x128xbf16>
      %280 = arith.cmpf ole, %253, %279 : vector<32x128xbf16>
      %281 = arith.andi %278, %280 : vector<32x128xi1>
      %cst_38 = arith.constant 1.000000e+00 : bf16
      %282 = vector.broadcast %cst_38 : bf16 to vector<32x128xbf16>
      %283 = arith.cmpf oeq, %269, %282 : vector<32x128xbf16>
      %284 = arith.andi %281, %283 : vector<32x128xi1>
      %cst_39 = arith.constant 0.000000e+00 : bf16
      %285 = vector.broadcast %cst_39 : bf16 to vector<32x128xbf16>
      %286 = arith.cmpf oeq, %271, %285 : vector<32x128xbf16>
      %287 = arith.andi %284, %286 : vector<32x128xi1>
      %cst_40 = arith.constant 0.000000e+00 : bf16
      %288 = vector.broadcast %cst_40 : bf16 to vector<32x128xbf16>
      %289 = arith.cmpf oeq, %273, %288 : vector<32x128xbf16>
      %290 = arith.andi %287, %289 : vector<32x128xi1>
      %cst_41 = arith.constant 0.000000e+00 : bf16
      %291 = vector.broadcast %cst_41 : bf16 to vector<32x128xbf16>
      %292 = arith.select %290, %291, %222 : vector<32x128xi1>, vector<32x128xbf16>
      %293 = vector.extract_strided_slice %152 {offsets = [31, 0], sizes = [1, 128], strides = [1, 1]} : vector<32x128xbf16> to vector<1x128xbf16>
      %294 = vector.extract_strided_slice %152 {offsets = [0, 0], sizes = [31, 128], strides = [1, 1]} : vector<32x128xbf16> to vector<31x128xbf16>
      %295 = tpu.concatenate %293, %294 in 0 : vector<1x128xbf16>, vector<31x128xbf16> -> vector<32x128xbf16>
      %296 = vector.extract_strided_slice %152 {offsets = [1, 0], sizes = [31, 128], strides = [1, 1]} : vector<32x128xbf16> to vector<31x128xbf16>
      %297 = vector.extract_strided_slice %152 {offsets = [0, 0], sizes = [1, 128], strides = [1, 1]} : vector<32x128xbf16> to vector<1x128xbf16>
      %298 = tpu.concatenate %296, %297 in 0 : vector<31x128xbf16>, vector<1x128xbf16> -> vector<32x128xbf16>
      %299 = vector.extract_strided_slice %152 {offsets = [0, 1], sizes = [32, 127], strides = [1, 1]} : vector<32x128xbf16> to vector<32x127xbf16>
      %300 = vector.extract_strided_slice %152 {offsets = [0, 0], sizes = [32, 1], strides = [1, 1]} : vector<32x128xbf16> to vector<32x1xbf16>
      %301 = tpu.concatenate %299, %300 in 1 : vector<32x127xbf16>, vector<32x1xbf16> -> vector<32x128xbf16>
      %302 = vector.extract_strided_slice %152 {offsets = [0, 127], sizes = [32, 1], strides = [1, 1]} : vector<32x128xbf16> to vector<32x1xbf16>
      %303 = vector.extract_strided_slice %152 {offsets = [0, 0], sizes = [32, 127], strides = [1, 1]} : vector<32x128xbf16> to vector<32x127xbf16>
      %304 = tpu.concatenate %302, %303 in 1 : vector<32x1xbf16>, vector<32x127xbf16> -> vector<32x128xbf16>
      %305 = vector.extract_strided_slice %295 {offsets = [0, 1], sizes = [32, 127], strides = [1, 1]} : vector<32x128xbf16> to vector<32x127xbf16>
      %306 = vector.extract_strided_slice %295 {offsets = [0, 0], sizes = [32, 1], strides = [1, 1]} : vector<32x128xbf16> to vector<32x1xbf16>
      %307 = tpu.concatenate %305, %306 in 1 : vector<32x127xbf16>, vector<32x1xbf16> -> vector<32x128xbf16>
      %308 = vector.extract_strided_slice %295 {offsets = [0, 127], sizes = [32, 1], strides = [1, 1]} : vector<32x128xbf16> to vector<32x1xbf16>
      %309 = vector.extract_strided_slice %295 {offsets = [0, 0], sizes = [32, 127], strides = [1, 1]} : vector<32x128xbf16> to vector<32x127xbf16>
      %310 = tpu.concatenate %308, %309 in 1 : vector<32x1xbf16>, vector<32x127xbf16> -> vector<32x128xbf16>
      %311 = vector.extract_strided_slice %298 {offsets = [0, 1], sizes = [32, 127], strides = [1, 1]} : vector<32x128xbf16> to vector<32x127xbf16>
      %312 = vector.extract_strided_slice %298 {offsets = [0, 0], sizes = [32, 1], strides = [1, 1]} : vector<32x128xbf16> to vector<32x1xbf16>
      %313 = tpu.concatenate %311, %312 in 1 : vector<32x127xbf16>, vector<32x1xbf16> -> vector<32x128xbf16>
      %314 = vector.extract_strided_slice %298 {offsets = [0, 127], sizes = [32, 1], strides = [1, 1]} : vector<32x128xbf16> to vector<32x1xbf16>
      %315 = vector.extract_strided_slice %298 {offsets = [0, 0], sizes = [32, 127], strides = [1, 1]} : vector<32x128xbf16> to vector<32x127xbf16>
      %316 = tpu.concatenate %314, %315 in 1 : vector<32x1xbf16>, vector<32x127xbf16> -> vector<32x128xbf16>
      %317 = arith.addf %295, %307 : vector<32x128xbf16>
      %318 = arith.addf %317, %301 : vector<32x128xbf16>
      %319 = arith.addf %318, %313 : vector<32x128xbf16>
      %320 = arith.addf %319, %298 : vector<32x128xbf16>
      %321 = arith.addf %320, %316 : vector<32x128xbf16>
      %322 = arith.addf %321, %304 : vector<32x128xbf16>
      %323 = arith.addf %322, %310 : vector<32x128xbf16>
      %324 = arith.mulf %295, %307 : vector<32x128xbf16>
      %325 = arith.mulf %307, %301 : vector<32x128xbf16>
      %326 = arith.addf %324, %325 : vector<32x128xbf16>
      %327 = arith.mulf %301, %313 : vector<32x128xbf16>
      %328 = arith.addf %326, %327 : vector<32x128xbf16>
      %329 = arith.mulf %313, %298 : vector<32x128xbf16>
      %330 = arith.addf %328, %329 : vector<32x128xbf16>
      %331 = arith.mulf %298, %316 : vector<32x128xbf16>
      %332 = arith.addf %330, %331 : vector<32x128xbf16>
      %333 = arith.mulf %316, %304 : vector<32x128xbf16>
      %334 = arith.addf %332, %333 : vector<32x128xbf16>
      %335 = arith.mulf %304, %310 : vector<32x128xbf16>
      %336 = arith.addf %334, %335 : vector<32x128xbf16>
      %337 = arith.mulf %310, %295 : vector<32x128xbf16>
      %338 = arith.addf %336, %337 : vector<32x128xbf16>
      %339 = arith.subf %323, %338 : vector<32x128xbf16>
      %340 = arith.mulf %295, %301 : vector<32x128xbf16>
      %341 = arith.mulf %340, %298 : vector<32x128xbf16>
      %342 = arith.mulf %301, %298 : vector<32x128xbf16>
      %343 = arith.mulf %342, %304 : vector<32x128xbf16>
      %cst_42 = arith.constant 5.000000e-01 : bf16
      %344 = vector.broadcast %cst_42 : bf16 to vector<32x128xbf16>
      %345 = arith.cmpf ogt, %152, %344 : vector<32x128xbf16>
      %cst_43 = arith.constant 2.000000e+00 : bf16
      %346 = vector.broadcast %cst_43 : bf16 to vector<32x128xbf16>
      %347 = arith.cmpf oge, %323, %346 : vector<32x128xbf16>
      %348 = arith.andi %345, %347 : vector<32x128xi1>
      %cst_44 = arith.constant 6.000000e+00 : bf16
      %349 = vector.broadcast %cst_44 : bf16 to vector<32x128xbf16>
      %350 = arith.cmpf ole, %323, %349 : vector<32x128xbf16>
      %351 = arith.andi %348, %350 : vector<32x128xi1>
      %cst_45 = arith.constant 1.000000e+00 : bf16
      %352 = vector.broadcast %cst_45 : bf16 to vector<32x128xbf16>
      %353 = arith.cmpf oeq, %339, %352 : vector<32x128xbf16>
      %354 = arith.andi %351, %353 : vector<32x128xi1>
      %cst_46 = arith.constant 0.000000e+00 : bf16
      %355 = vector.broadcast %cst_46 : bf16 to vector<32x128xbf16>
      %356 = arith.cmpf oeq, %341, %355 : vector<32x128xbf16>
      %357 = arith.andi %354, %356 : vector<32x128xi1>
      %cst_47 = arith.constant 0.000000e+00 : bf16
      %358 = vector.broadcast %cst_47 : bf16 to vector<32x128xbf16>
      %359 = arith.cmpf oeq, %343, %358 : vector<32x128xbf16>
      %360 = arith.andi %357, %359 : vector<32x128xi1>
      %cst_48 = arith.constant 0.000000e+00 : bf16
      %361 = vector.broadcast %cst_48 : bf16 to vector<32x128xbf16>
      %362 = arith.select %360, %361, %152 : vector<32x128xi1>, vector<32x128xbf16>
      %363 = vector.extract_strided_slice %362 {offsets = [31, 0], sizes = [1, 128], strides = [1, 1]} : vector<32x128xbf16> to vector<1x128xbf16>
      %364 = vector.extract_strided_slice %362 {offsets = [0, 0], sizes = [31, 128], strides = [1, 1]} : vector<32x128xbf16> to vector<31x128xbf16>
      %365 = tpu.concatenate %363, %364 in 0 : vector<1x128xbf16>, vector<31x128xbf16> -> vector<32x128xbf16>
      %366 = vector.extract_strided_slice %362 {offsets = [1, 0], sizes = [31, 128], strides = [1, 1]} : vector<32x128xbf16> to vector<31x128xbf16>
      %367 = vector.extract_strided_slice %362 {offsets = [0, 0], sizes = [1, 128], strides = [1, 1]} : vector<32x128xbf16> to vector<1x128xbf16>
      %368 = tpu.concatenate %366, %367 in 0 : vector<31x128xbf16>, vector<1x128xbf16> -> vector<32x128xbf16>
      %369 = vector.extract_strided_slice %362 {offsets = [0, 1], sizes = [32, 127], strides = [1, 1]} : vector<32x128xbf16> to vector<32x127xbf16>
      %370 = vector.extract_strided_slice %362 {offsets = [0, 0], sizes = [32, 1], strides = [1, 1]} : vector<32x128xbf16> to vector<32x1xbf16>
      %371 = tpu.concatenate %369, %370 in 1 : vector<32x127xbf16>, vector<32x1xbf16> -> vector<32x128xbf16>
      %372 = vector.extract_strided_slice %362 {offsets = [0, 127], sizes = [32, 1], strides = [1, 1]} : vector<32x128xbf16> to vector<32x1xbf16>
      %373 = vector.extract_strided_slice %362 {offsets = [0, 0], sizes = [32, 127], strides = [1, 1]} : vector<32x128xbf16> to vector<32x127xbf16>
      %374 = tpu.concatenate %372, %373 in 1 : vector<32x1xbf16>, vector<32x127xbf16> -> vector<32x128xbf16>
      %375 = vector.extract_strided_slice %365 {offsets = [0, 1], sizes = [32, 127], strides = [1, 1]} : vector<32x128xbf16> to vector<32x127xbf16>
      %376 = vector.extract_strided_slice %365 {offsets = [0, 0], sizes = [32, 1], strides = [1, 1]} : vector<32x128xbf16> to vector<32x1xbf16>
      %377 = tpu.concatenate %375, %376 in 1 : vector<32x127xbf16>, vector<32x1xbf16> -> vector<32x128xbf16>
      %378 = vector.extract_strided_slice %365 {offsets = [0, 127], sizes = [32, 1], strides = [1, 1]} : vector<32x128xbf16> to vector<32x1xbf16>
      %379 = vector.extract_strided_slice %365 {offsets = [0, 0], sizes = [32, 127], strides = [1, 1]} : vector<32x128xbf16> to vector<32x127xbf16>
      %380 = tpu.concatenate %378, %379 in 1 : vector<32x1xbf16>, vector<32x127xbf16> -> vector<32x128xbf16>
      %381 = vector.extract_strided_slice %368 {offsets = [0, 1], sizes = [32, 127], strides = [1, 1]} : vector<32x128xbf16> to vector<32x127xbf16>
      %382 = vector.extract_strided_slice %368 {offsets = [0, 0], sizes = [32, 1], strides = [1, 1]} : vector<32x128xbf16> to vector<32x1xbf16>
      %383 = tpu.concatenate %381, %382 in 1 : vector<32x127xbf16>, vector<32x1xbf16> -> vector<32x128xbf16>
      %384 = vector.extract_strided_slice %368 {offsets = [0, 127], sizes = [32, 1], strides = [1, 1]} : vector<32x128xbf16> to vector<32x1xbf16>
      %385 = vector.extract_strided_slice %368 {offsets = [0, 0], sizes = [32, 127], strides = [1, 1]} : vector<32x128xbf16> to vector<32x127xbf16>
      %386 = tpu.concatenate %384, %385 in 1 : vector<32x1xbf16>, vector<32x127xbf16> -> vector<32x128xbf16>
      %387 = arith.addf %365, %377 : vector<32x128xbf16>
      %388 = arith.addf %387, %371 : vector<32x128xbf16>
      %389 = arith.addf %388, %383 : vector<32x128xbf16>
      %390 = arith.addf %389, %368 : vector<32x128xbf16>
      %391 = arith.addf %390, %386 : vector<32x128xbf16>
      %392 = arith.addf %391, %374 : vector<32x128xbf16>
      %393 = arith.addf %392, %380 : vector<32x128xbf16>
      %394 = arith.mulf %365, %377 : vector<32x128xbf16>
      %395 = arith.mulf %377, %371 : vector<32x128xbf16>
      %396 = arith.addf %394, %395 : vector<32x128xbf16>
      %397 = arith.mulf %371, %383 : vector<32x128xbf16>
      %398 = arith.addf %396, %397 : vector<32x128xbf16>
      %399 = arith.mulf %383, %368 : vector<32x128xbf16>
      %400 = arith.addf %398, %399 : vector<32x128xbf16>
      %401 = arith.mulf %368, %386 : vector<32x128xbf16>
      %402 = arith.addf %400, %401 : vector<32x128xbf16>
      %403 = arith.mulf %386, %374 : vector<32x128xbf16>
      %404 = arith.addf %402, %403 : vector<32x128xbf16>
      %405 = arith.mulf %374, %380 : vector<32x128xbf16>
      %406 = arith.addf %404, %405 : vector<32x128xbf16>
      %407 = arith.mulf %380, %365 : vector<32x128xbf16>
      %408 = arith.addf %406, %407 : vector<32x128xbf16>
      %409 = arith.subf %393, %408 : vector<32x128xbf16>
      %410 = arith.mulf %365, %371 : vector<32x128xbf16>
      %411 = arith.mulf %410, %374 : vector<32x128xbf16>
      %412 = arith.mulf %365, %368 : vector<32x128xbf16>
      %413 = arith.mulf %412, %374 : vector<32x128xbf16>
      %cst_49 = arith.constant 5.000000e-01 : bf16
      %414 = vector.broadcast %cst_49 : bf16 to vector<32x128xbf16>
      %415 = arith.cmpf ogt, %362, %414 : vector<32x128xbf16>
      %cst_50 = arith.constant 2.000000e+00 : bf16
      %416 = vector.broadcast %cst_50 : bf16 to vector<32x128xbf16>
      %417 = arith.cmpf oge, %393, %416 : vector<32x128xbf16>
      %418 = arith.andi %415, %417 : vector<32x128xi1>
      %cst_51 = arith.constant 6.000000e+00 : bf16
      %419 = vector.broadcast %cst_51 : bf16 to vector<32x128xbf16>
      %420 = arith.cmpf ole, %393, %419 : vector<32x128xbf16>
      %421 = arith.andi %418, %420 : vector<32x128xi1>
      %cst_52 = arith.constant 1.000000e+00 : bf16
      %422 = vector.broadcast %cst_52 : bf16 to vector<32x128xbf16>
      %423 = arith.cmpf oeq, %409, %422 : vector<32x128xbf16>
      %424 = arith.andi %421, %423 : vector<32x128xi1>
      %cst_53 = arith.constant 0.000000e+00 : bf16
      %425 = vector.broadcast %cst_53 : bf16 to vector<32x128xbf16>
      %426 = arith.cmpf oeq, %411, %425 : vector<32x128xbf16>
      %427 = arith.andi %424, %426 : vector<32x128xi1>
      %cst_54 = arith.constant 0.000000e+00 : bf16
      %428 = vector.broadcast %cst_54 : bf16 to vector<32x128xbf16>
      %429 = arith.cmpf oeq, %413, %428 : vector<32x128xbf16>
      %430 = arith.andi %427, %429 : vector<32x128xi1>
      %cst_55 = arith.constant 0.000000e+00 : bf16
      %431 = vector.broadcast %cst_55 : bf16 to vector<32x128xbf16>
      %432 = arith.select %430, %431, %362 : vector<32x128xi1>, vector<32x128xbf16>
      %433 = arith.ori %220, %290 : vector<32x128xi1>
      %434 = arith.ori %433, %360 : vector<32x128xi1>
      %435 = arith.ori %434, %430 : vector<32x128xi1>
      %436 = vector.extract_strided_slice %292 {offsets = [31, 0], sizes = [1, 128], strides = [1, 1]} : vector<32x128xbf16> to vector<1x128xbf16>
      %437 = vector.extract_strided_slice %292 {offsets = [0, 0], sizes = [31, 128], strides = [1, 1]} : vector<32x128xbf16> to vector<31x128xbf16>
      %438 = tpu.concatenate %436, %437 in 0 : vector<1x128xbf16>, vector<31x128xbf16> -> vector<32x128xbf16>
      %439 = vector.extract_strided_slice %292 {offsets = [1, 0], sizes = [31, 128], strides = [1, 1]} : vector<32x128xbf16> to vector<31x128xbf16>
      %440 = vector.extract_strided_slice %292 {offsets = [0, 0], sizes = [1, 128], strides = [1, 1]} : vector<32x128xbf16> to vector<1x128xbf16>
      %441 = tpu.concatenate %439, %440 in 0 : vector<31x128xbf16>, vector<1x128xbf16> -> vector<32x128xbf16>
      %442 = vector.extract_strided_slice %292 {offsets = [0, 1], sizes = [32, 127], strides = [1, 1]} : vector<32x128xbf16> to vector<32x127xbf16>
      %443 = vector.extract_strided_slice %292 {offsets = [0, 0], sizes = [32, 1], strides = [1, 1]} : vector<32x128xbf16> to vector<32x1xbf16>
      %444 = tpu.concatenate %442, %443 in 1 : vector<32x127xbf16>, vector<32x1xbf16> -> vector<32x128xbf16>
      %445 = vector.extract_strided_slice %292 {offsets = [0, 127], sizes = [32, 1], strides = [1, 1]} : vector<32x128xbf16> to vector<32x1xbf16>
      %446 = vector.extract_strided_slice %292 {offsets = [0, 0], sizes = [32, 127], strides = [1, 1]} : vector<32x128xbf16> to vector<32x127xbf16>
      %447 = tpu.concatenate %445, %446 in 1 : vector<32x1xbf16>, vector<32x127xbf16> -> vector<32x128xbf16>
      %448 = vector.extract_strided_slice %438 {offsets = [0, 1], sizes = [32, 127], strides = [1, 1]} : vector<32x128xbf16> to vector<32x127xbf16>
      %449 = vector.extract_strided_slice %438 {offsets = [0, 0], sizes = [32, 1], strides = [1, 1]} : vector<32x128xbf16> to vector<32x1xbf16>
      %450 = tpu.concatenate %448, %449 in 1 : vector<32x127xbf16>, vector<32x1xbf16> -> vector<32x128xbf16>
      %451 = vector.extract_strided_slice %438 {offsets = [0, 127], sizes = [32, 1], strides = [1, 1]} : vector<32x128xbf16> to vector<32x1xbf16>
      %452 = vector.extract_strided_slice %438 {offsets = [0, 0], sizes = [32, 127], strides = [1, 1]} : vector<32x128xbf16> to vector<32x127xbf16>
      %453 = tpu.concatenate %451, %452 in 1 : vector<32x1xbf16>, vector<32x127xbf16> -> vector<32x128xbf16>
      %454 = vector.extract_strided_slice %441 {offsets = [0, 1], sizes = [32, 127], strides = [1, 1]} : vector<32x128xbf16> to vector<32x127xbf16>
      %455 = vector.extract_strided_slice %441 {offsets = [0, 0], sizes = [32, 1], strides = [1, 1]} : vector<32x128xbf16> to vector<32x1xbf16>
      %456 = tpu.concatenate %454, %455 in 1 : vector<32x127xbf16>, vector<32x1xbf16> -> vector<32x128xbf16>
      %457 = vector.extract_strided_slice %441 {offsets = [0, 127], sizes = [32, 1], strides = [1, 1]} : vector<32x128xbf16> to vector<32x1xbf16>
      %458 = vector.extract_strided_slice %441 {offsets = [0, 0], sizes = [32, 127], strides = [1, 1]} : vector<32x128xbf16> to vector<32x127xbf16>
      %459 = tpu.concatenate %457, %458 in 1 : vector<32x1xbf16>, vector<32x127xbf16> -> vector<32x128xbf16>
      %460 = arith.addf %438, %450 : vector<32x128xbf16>
      %461 = arith.addf %460, %444 : vector<32x128xbf16>
      %462 = arith.addf %461, %456 : vector<32x128xbf16>
      %463 = arith.addf %462, %441 : vector<32x128xbf16>
      %464 = arith.addf %463, %459 : vector<32x128xbf16>
      %465 = arith.addf %464, %447 : vector<32x128xbf16>
      %466 = arith.addf %465, %453 : vector<32x128xbf16>
      %467 = arith.mulf %438, %450 : vector<32x128xbf16>
      %468 = arith.mulf %450, %444 : vector<32x128xbf16>
      %469 = arith.addf %467, %468 : vector<32x128xbf16>
      %470 = arith.mulf %444, %456 : vector<32x128xbf16>
      %471 = arith.addf %469, %470 : vector<32x128xbf16>
      %472 = arith.mulf %456, %441 : vector<32x128xbf16>
      %473 = arith.addf %471, %472 : vector<32x128xbf16>
      %474 = arith.mulf %441, %459 : vector<32x128xbf16>
      %475 = arith.addf %473, %474 : vector<32x128xbf16>
      %476 = arith.mulf %459, %447 : vector<32x128xbf16>
      %477 = arith.addf %475, %476 : vector<32x128xbf16>
      %478 = arith.mulf %447, %453 : vector<32x128xbf16>
      %479 = arith.addf %477, %478 : vector<32x128xbf16>
      %480 = arith.mulf %453, %438 : vector<32x128xbf16>
      %481 = arith.addf %479, %480 : vector<32x128xbf16>
      %482 = arith.subf %466, %481 : vector<32x128xbf16>
      %483 = arith.mulf %438, %444 : vector<32x128xbf16>
      %484 = arith.mulf %483, %441 : vector<32x128xbf16>
      %485 = arith.mulf %444, %441 : vector<32x128xbf16>
      %486 = arith.mulf %485, %447 : vector<32x128xbf16>
      %cst_56 = arith.constant 5.000000e-01 : bf16
      %487 = vector.broadcast %cst_56 : bf16 to vector<32x128xbf16>
      %488 = arith.cmpf ogt, %292, %487 : vector<32x128xbf16>
      %cst_57 = arith.constant 2.000000e+00 : bf16
      %489 = vector.broadcast %cst_57 : bf16 to vector<32x128xbf16>
      %490 = arith.cmpf oge, %466, %489 : vector<32x128xbf16>
      %491 = arith.andi %488, %490 : vector<32x128xi1>
      %cst_58 = arith.constant 6.000000e+00 : bf16
      %492 = vector.broadcast %cst_58 : bf16 to vector<32x128xbf16>
      %493 = arith.cmpf ole, %466, %492 : vector<32x128xbf16>
      %494 = arith.andi %491, %493 : vector<32x128xi1>
      %cst_59 = arith.constant 1.000000e+00 : bf16
      %495 = vector.broadcast %cst_59 : bf16 to vector<32x128xbf16>
      %496 = arith.cmpf oeq, %482, %495 : vector<32x128xbf16>
      %497 = arith.andi %494, %496 : vector<32x128xi1>
      %cst_60 = arith.constant 0.000000e+00 : bf16
      %498 = vector.broadcast %cst_60 : bf16 to vector<32x128xbf16>
      %499 = arith.cmpf oeq, %484, %498 : vector<32x128xbf16>
      %500 = arith.andi %497, %499 : vector<32x128xi1>
      %cst_61 = arith.constant 0.000000e+00 : bf16
      %501 = vector.broadcast %cst_61 : bf16 to vector<32x128xbf16>
      %502 = arith.cmpf oeq, %486, %501 : vector<32x128xbf16>
      %503 = arith.andi %500, %502 : vector<32x128xi1>
      %cst_62 = arith.constant 0.000000e+00 : bf16
      %504 = vector.broadcast %cst_62 : bf16 to vector<32x128xbf16>
      %505 = arith.select %503, %504, %292 : vector<32x128xi1>, vector<32x128xbf16>
      %506 = vector.extract_strided_slice %505 {offsets = [31, 0], sizes = [1, 128], strides = [1, 1]} : vector<32x128xbf16> to vector<1x128xbf16>
      %507 = vector.extract_strided_slice %505 {offsets = [0, 0], sizes = [31, 128], strides = [1, 1]} : vector<32x128xbf16> to vector<31x128xbf16>
      %508 = tpu.concatenate %506, %507 in 0 : vector<1x128xbf16>, vector<31x128xbf16> -> vector<32x128xbf16>
      %509 = vector.extract_strided_slice %505 {offsets = [1, 0], sizes = [31, 128], strides = [1, 1]} : vector<32x128xbf16> to vector<31x128xbf16>
      %510 = vector.extract_strided_slice %505 {offsets = [0, 0], sizes = [1, 128], strides = [1, 1]} : vector<32x128xbf16> to vector<1x128xbf16>
      %511 = tpu.concatenate %509, %510 in 0 : vector<31x128xbf16>, vector<1x128xbf16> -> vector<32x128xbf16>
      %512 = vector.extract_strided_slice %505 {offsets = [0, 1], sizes = [32, 127], strides = [1, 1]} : vector<32x128xbf16> to vector<32x127xbf16>
      %513 = vector.extract_strided_slice %505 {offsets = [0, 0], sizes = [32, 1], strides = [1, 1]} : vector<32x128xbf16> to vector<32x1xbf16>
      %514 = tpu.concatenate %512, %513 in 1 : vector<32x127xbf16>, vector<32x1xbf16> -> vector<32x128xbf16>
      %515 = vector.extract_strided_slice %505 {offsets = [0, 127], sizes = [32, 1], strides = [1, 1]} : vector<32x128xbf16> to vector<32x1xbf16>
      %516 = vector.extract_strided_slice %505 {offsets = [0, 0], sizes = [32, 127], strides = [1, 1]} : vector<32x128xbf16> to vector<32x127xbf16>
      %517 = tpu.concatenate %515, %516 in 1 : vector<32x1xbf16>, vector<32x127xbf16> -> vector<32x128xbf16>
      %518 = vector.extract_strided_slice %508 {offsets = [0, 1], sizes = [32, 127], strides = [1, 1]} : vector<32x128xbf16> to vector<32x127xbf16>
      %519 = vector.extract_strided_slice %508 {offsets = [0, 0], sizes = [32, 1], strides = [1, 1]} : vector<32x128xbf16> to vector<32x1xbf16>
      %520 = tpu.concatenate %518, %519 in 1 : vector<32x127xbf16>, vector<32x1xbf16> -> vector<32x128xbf16>
      %521 = vector.extract_strided_slice %508 {offsets = [0, 127], sizes = [32, 1], strides = [1, 1]} : vector<32x128xbf16> to vector<32x1xbf16>
      %522 = vector.extract_strided_slice %508 {offsets = [0, 0], sizes = [32, 127], strides = [1, 1]} : vector<32x128xbf16> to vector<32x127xbf16>
      %523 = tpu.concatenate %521, %522 in 1 : vector<32x1xbf16>, vector<32x127xbf16> -> vector<32x128xbf16>
      %524 = vector.extract_strided_slice %511 {offsets = [0, 1], sizes = [32, 127], strides = [1, 1]} : vector<32x128xbf16> to vector<32x127xbf16>
      %525 = vector.extract_strided_slice %511 {offsets = [0, 0], sizes = [32, 1], strides = [1, 1]} : vector<32x128xbf16> to vector<32x1xbf16>
      %526 = tpu.concatenate %524, %525 in 1 : vector<32x127xbf16>, vector<32x1xbf16> -> vector<32x128xbf16>
      %527 = vector.extract_strided_slice %511 {offsets = [0, 127], sizes = [32, 1], strides = [1, 1]} : vector<32x128xbf16> to vector<32x1xbf16>
      %528 = vector.extract_strided_slice %511 {offsets = [0, 0], sizes = [32, 127], strides = [1, 1]} : vector<32x128xbf16> to vector<32x127xbf16>
      %529 = tpu.concatenate %527, %528 in 1 : vector<32x1xbf16>, vector<32x127xbf16> -> vector<32x128xbf16>
      %530 = arith.addf %508, %520 : vector<32x128xbf16>
      %531 = arith.addf %530, %514 : vector<32x128xbf16>
      %532 = arith.addf %531, %526 : vector<32x128xbf16>
      %533 = arith.addf %532, %511 : vector<32x128xbf16>
      %534 = arith.addf %533, %529 : vector<32x128xbf16>
      %535 = arith.addf %534, %517 : vector<32x128xbf16>
      %536 = arith.addf %535, %523 : vector<32x128xbf16>
      %537 = arith.mulf %508, %520 : vector<32x128xbf16>
      %538 = arith.mulf %520, %514 : vector<32x128xbf16>
      %539 = arith.addf %537, %538 : vector<32x128xbf16>
      %540 = arith.mulf %514, %526 : vector<32x128xbf16>
      %541 = arith.addf %539, %540 : vector<32x128xbf16>
      %542 = arith.mulf %526, %511 : vector<32x128xbf16>
      %543 = arith.addf %541, %542 : vector<32x128xbf16>
      %544 = arith.mulf %511, %529 : vector<32x128xbf16>
      %545 = arith.addf %543, %544 : vector<32x128xbf16>
      %546 = arith.mulf %529, %517 : vector<32x128xbf16>
      %547 = arith.addf %545, %546 : vector<32x128xbf16>
      %548 = arith.mulf %517, %523 : vector<32x128xbf16>
      %549 = arith.addf %547, %548 : vector<32x128xbf16>
      %550 = arith.mulf %523, %508 : vector<32x128xbf16>
      %551 = arith.addf %549, %550 : vector<32x128xbf16>
      %552 = arith.subf %536, %551 : vector<32x128xbf16>
      %553 = arith.mulf %508, %514 : vector<32x128xbf16>
      %554 = arith.mulf %553, %517 : vector<32x128xbf16>
      %555 = arith.mulf %508, %511 : vector<32x128xbf16>
      %556 = arith.mulf %555, %517 : vector<32x128xbf16>
      %cst_63 = arith.constant 5.000000e-01 : bf16
      %557 = vector.broadcast %cst_63 : bf16 to vector<32x128xbf16>
      %558 = arith.cmpf ogt, %505, %557 : vector<32x128xbf16>
      %cst_64 = arith.constant 2.000000e+00 : bf16
      %559 = vector.broadcast %cst_64 : bf16 to vector<32x128xbf16>
      %560 = arith.cmpf oge, %536, %559 : vector<32x128xbf16>
      %561 = arith.andi %558, %560 : vector<32x128xi1>
      %cst_65 = arith.constant 6.000000e+00 : bf16
      %562 = vector.broadcast %cst_65 : bf16 to vector<32x128xbf16>
      %563 = arith.cmpf ole, %536, %562 : vector<32x128xbf16>
      %564 = arith.andi %561, %563 : vector<32x128xi1>
      %cst_66 = arith.constant 1.000000e+00 : bf16
      %565 = vector.broadcast %cst_66 : bf16 to vector<32x128xbf16>
      %566 = arith.cmpf oeq, %552, %565 : vector<32x128xbf16>
      %567 = arith.andi %564, %566 : vector<32x128xi1>
      %cst_67 = arith.constant 0.000000e+00 : bf16
      %568 = vector.broadcast %cst_67 : bf16 to vector<32x128xbf16>
      %569 = arith.cmpf oeq, %554, %568 : vector<32x128xbf16>
      %570 = arith.andi %567, %569 : vector<32x128xi1>
      %cst_68 = arith.constant 0.000000e+00 : bf16
      %571 = vector.broadcast %cst_68 : bf16 to vector<32x128xbf16>
      %572 = arith.cmpf oeq, %556, %571 : vector<32x128xbf16>
      %573 = arith.andi %570, %572 : vector<32x128xi1>
      %cst_69 = arith.constant 0.000000e+00 : bf16
      %574 = vector.broadcast %cst_69 : bf16 to vector<32x128xbf16>
      %575 = arith.select %573, %574, %505 : vector<32x128xi1>, vector<32x128xbf16>
      %576 = vector.extract_strided_slice %432 {offsets = [31, 0], sizes = [1, 128], strides = [1, 1]} : vector<32x128xbf16> to vector<1x128xbf16>
      %577 = vector.extract_strided_slice %432 {offsets = [0, 0], sizes = [31, 128], strides = [1, 1]} : vector<32x128xbf16> to vector<31x128xbf16>
      %578 = tpu.concatenate %576, %577 in 0 : vector<1x128xbf16>, vector<31x128xbf16> -> vector<32x128xbf16>
      %579 = vector.extract_strided_slice %432 {offsets = [1, 0], sizes = [31, 128], strides = [1, 1]} : vector<32x128xbf16> to vector<31x128xbf16>
      %580 = vector.extract_strided_slice %432 {offsets = [0, 0], sizes = [1, 128], strides = [1, 1]} : vector<32x128xbf16> to vector<1x128xbf16>
      %581 = tpu.concatenate %579, %580 in 0 : vector<31x128xbf16>, vector<1x128xbf16> -> vector<32x128xbf16>
      %582 = vector.extract_strided_slice %432 {offsets = [0, 1], sizes = [32, 127], strides = [1, 1]} : vector<32x128xbf16> to vector<32x127xbf16>
      %583 = vector.extract_strided_slice %432 {offsets = [0, 0], sizes = [32, 1], strides = [1, 1]} : vector<32x128xbf16> to vector<32x1xbf16>
      %584 = tpu.concatenate %582, %583 in 1 : vector<32x127xbf16>, vector<32x1xbf16> -> vector<32x128xbf16>
      %585 = vector.extract_strided_slice %432 {offsets = [0, 127], sizes = [32, 1], strides = [1, 1]} : vector<32x128xbf16> to vector<32x1xbf16>
      %586 = vector.extract_strided_slice %432 {offsets = [0, 0], sizes = [32, 127], strides = [1, 1]} : vector<32x128xbf16> to vector<32x127xbf16>
      %587 = tpu.concatenate %585, %586 in 1 : vector<32x1xbf16>, vector<32x127xbf16> -> vector<32x128xbf16>
      %588 = vector.extract_strided_slice %578 {offsets = [0, 1], sizes = [32, 127], strides = [1, 1]} : vector<32x128xbf16> to vector<32x127xbf16>
      %589 = vector.extract_strided_slice %578 {offsets = [0, 0], sizes = [32, 1], strides = [1, 1]} : vector<32x128xbf16> to vector<32x1xbf16>
      %590 = tpu.concatenate %588, %589 in 1 : vector<32x127xbf16>, vector<32x1xbf16> -> vector<32x128xbf16>
      %591 = vector.extract_strided_slice %578 {offsets = [0, 127], sizes = [32, 1], strides = [1, 1]} : vector<32x128xbf16> to vector<32x1xbf16>
      %592 = vector.extract_strided_slice %578 {offsets = [0, 0], sizes = [32, 127], strides = [1, 1]} : vector<32x128xbf16> to vector<32x127xbf16>
      %593 = tpu.concatenate %591, %592 in 1 : vector<32x1xbf16>, vector<32x127xbf16> -> vector<32x128xbf16>
      %594 = vector.extract_strided_slice %581 {offsets = [0, 1], sizes = [32, 127], strides = [1, 1]} : vector<32x128xbf16> to vector<32x127xbf16>
      %595 = vector.extract_strided_slice %581 {offsets = [0, 0], sizes = [32, 1], strides = [1, 1]} : vector<32x128xbf16> to vector<32x1xbf16>
      %596 = tpu.concatenate %594, %595 in 1 : vector<32x127xbf16>, vector<32x1xbf16> -> vector<32x128xbf16>
      %597 = vector.extract_strided_slice %581 {offsets = [0, 127], sizes = [32, 1], strides = [1, 1]} : vector<32x128xbf16> to vector<32x1xbf16>
      %598 = vector.extract_strided_slice %581 {offsets = [0, 0], sizes = [32, 127], strides = [1, 1]} : vector<32x128xbf16> to vector<32x127xbf16>
      %599 = tpu.concatenate %597, %598 in 1 : vector<32x1xbf16>, vector<32x127xbf16> -> vector<32x128xbf16>
      %600 = arith.addf %578, %590 : vector<32x128xbf16>
      %601 = arith.addf %600, %584 : vector<32x128xbf16>
      %602 = arith.addf %601, %596 : vector<32x128xbf16>
      %603 = arith.addf %602, %581 : vector<32x128xbf16>
      %604 = arith.addf %603, %599 : vector<32x128xbf16>
      %605 = arith.addf %604, %587 : vector<32x128xbf16>
      %606 = arith.addf %605, %593 : vector<32x128xbf16>
      %607 = arith.mulf %578, %590 : vector<32x128xbf16>
      %608 = arith.mulf %590, %584 : vector<32x128xbf16>
      %609 = arith.addf %607, %608 : vector<32x128xbf16>
      %610 = arith.mulf %584, %596 : vector<32x128xbf16>
      %611 = arith.addf %609, %610 : vector<32x128xbf16>
      %612 = arith.mulf %596, %581 : vector<32x128xbf16>
      %613 = arith.addf %611, %612 : vector<32x128xbf16>
      %614 = arith.mulf %581, %599 : vector<32x128xbf16>
      %615 = arith.addf %613, %614 : vector<32x128xbf16>
      %616 = arith.mulf %599, %587 : vector<32x128xbf16>
      %617 = arith.addf %615, %616 : vector<32x128xbf16>
      %618 = arith.mulf %587, %593 : vector<32x128xbf16>
      %619 = arith.addf %617, %618 : vector<32x128xbf16>
      %620 = arith.mulf %593, %578 : vector<32x128xbf16>
      %621 = arith.addf %619, %620 : vector<32x128xbf16>
      %622 = arith.subf %606, %621 : vector<32x128xbf16>
      %623 = arith.mulf %578, %584 : vector<32x128xbf16>
      %624 = arith.mulf %623, %581 : vector<32x128xbf16>
      %625 = arith.mulf %584, %581 : vector<32x128xbf16>
      %626 = arith.mulf %625, %587 : vector<32x128xbf16>
      %cst_70 = arith.constant 5.000000e-01 : bf16
      %627 = vector.broadcast %cst_70 : bf16 to vector<32x128xbf16>
      %628 = arith.cmpf ogt, %432, %627 : vector<32x128xbf16>
      %cst_71 = arith.constant 2.000000e+00 : bf16
      %629 = vector.broadcast %cst_71 : bf16 to vector<32x128xbf16>
      %630 = arith.cmpf oge, %606, %629 : vector<32x128xbf16>
      %631 = arith.andi %628, %630 : vector<32x128xi1>
      %cst_72 = arith.constant 6.000000e+00 : bf16
      %632 = vector.broadcast %cst_72 : bf16 to vector<32x128xbf16>
      %633 = arith.cmpf ole, %606, %632 : vector<32x128xbf16>
      %634 = arith.andi %631, %633 : vector<32x128xi1>
      %cst_73 = arith.constant 1.000000e+00 : bf16
      %635 = vector.broadcast %cst_73 : bf16 to vector<32x128xbf16>
      %636 = arith.cmpf oeq, %622, %635 : vector<32x128xbf16>
      %637 = arith.andi %634, %636 : vector<32x128xi1>
      %cst_74 = arith.constant 0.000000e+00 : bf16
      %638 = vector.broadcast %cst_74 : bf16 to vector<32x128xbf16>
      %639 = arith.cmpf oeq, %624, %638 : vector<32x128xbf16>
      %640 = arith.andi %637, %639 : vector<32x128xi1>
      %cst_75 = arith.constant 0.000000e+00 : bf16
      %641 = vector.broadcast %cst_75 : bf16 to vector<32x128xbf16>
      %642 = arith.cmpf oeq, %626, %641 : vector<32x128xbf16>
      %643 = arith.andi %640, %642 : vector<32x128xi1>
      %cst_76 = arith.constant 0.000000e+00 : bf16
      %644 = vector.broadcast %cst_76 : bf16 to vector<32x128xbf16>
      %645 = arith.select %643, %644, %432 : vector<32x128xi1>, vector<32x128xbf16>
      %646 = vector.extract_strided_slice %645 {offsets = [31, 0], sizes = [1, 128], strides = [1, 1]} : vector<32x128xbf16> to vector<1x128xbf16>
      %647 = vector.extract_strided_slice %645 {offsets = [0, 0], sizes = [31, 128], strides = [1, 1]} : vector<32x128xbf16> to vector<31x128xbf16>
      %648 = tpu.concatenate %646, %647 in 0 : vector<1x128xbf16>, vector<31x128xbf16> -> vector<32x128xbf16>
      %649 = vector.extract_strided_slice %645 {offsets = [1, 0], sizes = [31, 128], strides = [1, 1]} : vector<32x128xbf16> to vector<31x128xbf16>
      %650 = vector.extract_strided_slice %645 {offsets = [0, 0], sizes = [1, 128], strides = [1, 1]} : vector<32x128xbf16> to vector<1x128xbf16>
      %651 = tpu.concatenate %649, %650 in 0 : vector<31x128xbf16>, vector<1x128xbf16> -> vector<32x128xbf16>
      %652 = vector.extract_strided_slice %645 {offsets = [0, 1], sizes = [32, 127], strides = [1, 1]} : vector<32x128xbf16> to vector<32x127xbf16>
      %653 = vector.extract_strided_slice %645 {offsets = [0, 0], sizes = [32, 1], strides = [1, 1]} : vector<32x128xbf16> to vector<32x1xbf16>
      %654 = tpu.concatenate %652, %653 in 1 : vector<32x127xbf16>, vector<32x1xbf16> -> vector<32x128xbf16>
      %655 = vector.extract_strided_slice %645 {offsets = [0, 127], sizes = [32, 1], strides = [1, 1]} : vector<32x128xbf16> to vector<32x1xbf16>
      %656 = vector.extract_strided_slice %645 {offsets = [0, 0], sizes = [32, 127], strides = [1, 1]} : vector<32x128xbf16> to vector<32x127xbf16>
      %657 = tpu.concatenate %655, %656 in 1 : vector<32x1xbf16>, vector<32x127xbf16> -> vector<32x128xbf16>
      %658 = vector.extract_strided_slice %648 {offsets = [0, 1], sizes = [32, 127], strides = [1, 1]} : vector<32x128xbf16> to vector<32x127xbf16>
      %659 = vector.extract_strided_slice %648 {offsets = [0, 0], sizes = [32, 1], strides = [1, 1]} : vector<32x128xbf16> to vector<32x1xbf16>
      %660 = tpu.concatenate %658, %659 in 1 : vector<32x127xbf16>, vector<32x1xbf16> -> vector<32x128xbf16>
      %661 = vector.extract_strided_slice %648 {offsets = [0, 127], sizes = [32, 1], strides = [1, 1]} : vector<32x128xbf16> to vector<32x1xbf16>
      %662 = vector.extract_strided_slice %648 {offsets = [0, 0], sizes = [32, 127], strides = [1, 1]} : vector<32x128xbf16> to vector<32x127xbf16>
      %663 = tpu.concatenate %661, %662 in 1 : vector<32x1xbf16>, vector<32x127xbf16> -> vector<32x128xbf16>
      %664 = vector.extract_strided_slice %651 {offsets = [0, 1], sizes = [32, 127], strides = [1, 1]} : vector<32x128xbf16> to vector<32x127xbf16>
      %665 = vector.extract_strided_slice %651 {offsets = [0, 0], sizes = [32, 1], strides = [1, 1]} : vector<32x128xbf16> to vector<32x1xbf16>
      %666 = tpu.concatenate %664, %665 in 1 : vector<32x127xbf16>, vector<32x1xbf16> -> vector<32x128xbf16>
      %667 = vector.extract_strided_slice %651 {offsets = [0, 127], sizes = [32, 1], strides = [1, 1]} : vector<32x128xbf16> to vector<32x1xbf16>
      %668 = vector.extract_strided_slice %651 {offsets = [0, 0], sizes = [32, 127], strides = [1, 1]} : vector<32x128xbf16> to vector<32x127xbf16>
      %669 = tpu.concatenate %667, %668 in 1 : vector<32x1xbf16>, vector<32x127xbf16> -> vector<32x128xbf16>
      %670 = arith.addf %648, %660 : vector<32x128xbf16>
      %671 = arith.addf %670, %654 : vector<32x128xbf16>
      %672 = arith.addf %671, %666 : vector<32x128xbf16>
      %673 = arith.addf %672, %651 : vector<32x128xbf16>
      %674 = arith.addf %673, %669 : vector<32x128xbf16>
      %675 = arith.addf %674, %657 : vector<32x128xbf16>
      %676 = arith.addf %675, %663 : vector<32x128xbf16>
      %677 = arith.mulf %648, %660 : vector<32x128xbf16>
      %678 = arith.mulf %660, %654 : vector<32x128xbf16>
      %679 = arith.addf %677, %678 : vector<32x128xbf16>
      %680 = arith.mulf %654, %666 : vector<32x128xbf16>
      %681 = arith.addf %679, %680 : vector<32x128xbf16>
      %682 = arith.mulf %666, %651 : vector<32x128xbf16>
      %683 = arith.addf %681, %682 : vector<32x128xbf16>
      %684 = arith.mulf %651, %669 : vector<32x128xbf16>
      %685 = arith.addf %683, %684 : vector<32x128xbf16>
      %686 = arith.mulf %669, %657 : vector<32x128xbf16>
      %687 = arith.addf %685, %686 : vector<32x128xbf16>
      %688 = arith.mulf %657, %663 : vector<32x128xbf16>
      %689 = arith.addf %687, %688 : vector<32x128xbf16>
      %690 = arith.mulf %663, %648 : vector<32x128xbf16>
      %691 = arith.addf %689, %690 : vector<32x128xbf16>
      %692 = arith.subf %676, %691 : vector<32x128xbf16>
      %693 = arith.mulf %648, %654 : vector<32x128xbf16>
      %694 = arith.mulf %693, %657 : vector<32x128xbf16>
      %695 = arith.mulf %648, %651 : vector<32x128xbf16>
      %696 = arith.mulf %695, %657 : vector<32x128xbf16>
      %cst_77 = arith.constant 5.000000e-01 : bf16
      %697 = vector.broadcast %cst_77 : bf16 to vector<32x128xbf16>
      %698 = arith.cmpf ogt, %645, %697 : vector<32x128xbf16>
      %cst_78 = arith.constant 2.000000e+00 : bf16
      %699 = vector.broadcast %cst_78 : bf16 to vector<32x128xbf16>
      %700 = arith.cmpf oge, %676, %699 : vector<32x128xbf16>
      %701 = arith.andi %698, %700 : vector<32x128xi1>
      %cst_79 = arith.constant 6.000000e+00 : bf16
      %702 = vector.broadcast %cst_79 : bf16 to vector<32x128xbf16>
      %703 = arith.cmpf ole, %676, %702 : vector<32x128xbf16>
      %704 = arith.andi %701, %703 : vector<32x128xi1>
      %cst_80 = arith.constant 1.000000e+00 : bf16
      %705 = vector.broadcast %cst_80 : bf16 to vector<32x128xbf16>
      %706 = arith.cmpf oeq, %692, %705 : vector<32x128xbf16>
      %707 = arith.andi %704, %706 : vector<32x128xi1>
      %cst_81 = arith.constant 0.000000e+00 : bf16
      %708 = vector.broadcast %cst_81 : bf16 to vector<32x128xbf16>
      %709 = arith.cmpf oeq, %694, %708 : vector<32x128xbf16>
      %710 = arith.andi %707, %709 : vector<32x128xi1>
      %cst_82 = arith.constant 0.000000e+00 : bf16
      %711 = vector.broadcast %cst_82 : bf16 to vector<32x128xbf16>
      %712 = arith.cmpf oeq, %696, %711 : vector<32x128xbf16>
      %713 = arith.andi %710, %712 : vector<32x128xi1>
      %cst_83 = arith.constant 0.000000e+00 : bf16
      %714 = vector.broadcast %cst_83 : bf16 to vector<32x128xbf16>
      %715 = arith.select %713, %714, %645 : vector<32x128xi1>, vector<32x128xbf16>
      %716 = arith.ori %503, %573 : vector<32x128xi1>
      %717 = arith.ori %716, %643 : vector<32x128xi1>
      %718 = arith.ori %717, %713 : vector<32x128xi1>
      %c0_84 = arith.constant 0 : index
      %c0_85 = arith.constant 0 : index
      %719 = vector.load %arg4[%c0_84, %c0_85] : memref<32x128xbf16, #tpu.memory_space<vmem>>, vector<32x128xbf16>
      tpu.vector_store %arg4[%c0_84, %c0_85], %575 {strides = array<i32>} : memref<32x128xbf16, #tpu.memory_space<vmem>>, vector<32x128xbf16>,
      %c0_86 = arith.constant 0 : index
      %c0_87 = arith.constant 0 : index
      %720 = vector.load %arg5[%c0_86, %c0_87] : memref<32x128xbf16, #tpu.memory_space<vmem>>, vector<32x128xbf16>
      tpu.vector_store %arg5[%c0_86, %c0_87], %715 {strides = array<i32>} : memref<32x128xbf16, #tpu.memory_space<vmem>>, vector<32x128xbf16>,
      %721 = arith.ori %435, %718 : vector<32x128xi1>
      %722 = arith.extui %721 : vector<32x128xi1> to vector<32x128xi32>
      %723 = arith.sitofp %722 : vector<32x128xi32> to vector<32x128xf32>
      %724 = vector.shape_cast %723 : vector<32x128xf32> to vector<1x32x128xf32>
      %cst_88 = arith.constant dense<0.000000e+00> : vector<1xf32>
      %725 = vector.multi_reduction <add>, %724, %cst_88 [1, 2] : vector<1x32x128xf32> to vector<1xf32>
      %726 = vector.shape_cast %725 : vector<1xf32> to vector<1x1x1xf32>
      %727 = vector.extract %726[0, 0, 0] : f32 from vector<1x1x1xf32>
      %c1_i32_89 = arith.constant 1 : i32
      %728 = arith.addi %arg6, %c1_i32_89 : i32
      %cst_90 = arith.constant 5.000000e-01 : f32
      %729 = arith.cmpf ogt, %727, %cst_90 : f32
      %730 = arith.extui %729 : i1 to i32
      scf.yield %728, %730 : i32, i32
    }
    %c0_9 = arith.constant 0 : index
    %c0_10 = arith.constant 0 : index
    %7 = vector.load %arg4[%c0_9, %c0_10] : memref<32x128xbf16, #tpu.memory_space<vmem>>, vector<32x128xbf16>
    %c0_11 = arith.constant 0 : index
    %c0_12 = arith.constant 0 : index
    %8 = vector.load %arg5[%c0_11, %c0_12] : memref<32x128xbf16, #tpu.memory_space<vmem>>, vector<32x128xbf16>
    %9 = arith.extf %7 : vector<32x128xbf16> to vector<32x128xf32>
    %10 = vector.shape_cast %9 : vector<32x128xf32> to vector<1x32x128xf32>
    %cst = arith.constant dense<0.000000e+00> : vector<1xf32>
    %11 = vector.multi_reduction <add>, %10, %cst [1, 2] : vector<1x32x128xf32> to vector<1xf32>
    %12 = vector.shape_cast %11 : vector<1xf32> to vector<1x1x1xf32>
    %13 = vector.extract %12[0, 0, 0] : f32 from vector<1x1x1xf32>
    %14 = arith.extf %8 : vector<32x128xbf16> to vector<32x128xf32>
    %15 = vector.shape_cast %14 : vector<32x128xf32> to vector<1x32x128xf32>
    %cst_13 = arith.constant dense<0.000000e+00> : vector<1xf32>
    %16 = vector.multi_reduction <add>, %15, %cst_13 [1, 2] : vector<1x32x128xf32> to vector<1xf32>
    %17 = vector.shape_cast %16 : vector<1xf32> to vector<1x1x1xf32>
    %18 = vector.extract %17[0, 0, 0] : f32 from vector<1x1x1xf32>
    %19 = vector.extract_strided_slice %8 {offsets = [29, 0], sizes = [3, 128], strides = [1, 1]} : vector<32x128xbf16> to vector<3x128xbf16>
    %20 = vector.extract_strided_slice %8 {offsets = [0, 0], sizes = [29, 128], strides = [1, 1]} : vector<32x128xbf16> to vector<29x128xbf16>
    %21 = tpu.concatenate %19, %20 in 0 : vector<3x128xbf16>, vector<29x128xbf16> -> vector<32x128xbf16>
    %22 = vector.extract_strided_slice %8 {offsets = [3, 0], sizes = [29, 128], strides = [1, 1]} : vector<32x128xbf16> to vector<29x128xbf16>
    %23 = vector.extract_strided_slice %8 {offsets = [0, 0], sizes = [3, 128], strides = [1, 1]} : vector<32x128xbf16> to vector<3x128xbf16>
    %24 = tpu.concatenate %22, %23 in 0 : vector<29x128xbf16>, vector<3x128xbf16> -> vector<32x128xbf16>
    %25 = arith.maximumf %21, %24 : vector<32x128xbf16>
    %26 = vector.extract_strided_slice %8 {offsets = [0, 127], sizes = [32, 1], strides = [1, 1]} : vector<32x128xbf16> to vector<32x1xbf16>
    %27 = vector.extract_strided_slice %8 {offsets = [0, 0], sizes = [32, 127], strides = [1, 1]} : vector<32x128xbf16> to vector<32x127xbf16>
    %28 = tpu.concatenate %26, %27 in 1 : vector<32x1xbf16>, vector<32x127xbf16> -> vector<32x128xbf16>
    %29 = vector.extract_strided_slice %8 {offsets = [0, 1], sizes = [32, 127], strides = [1, 1]} : vector<32x128xbf16> to vector<32x127xbf16>
    %30 = vector.extract_strided_slice %8 {offsets = [0, 0], sizes = [32, 1], strides = [1, 1]} : vector<32x128xbf16> to vector<32x1xbf16>
    %31 = tpu.concatenate %29, %30 in 1 : vector<32x127xbf16>, vector<32x1xbf16> -> vector<32x128xbf16>
    %32 = arith.maximumf %28, %31 : vector<32x128xbf16>
    %33 = arith.maximumf %8, %32 : vector<32x128xbf16>
    %34 = vector.extract_strided_slice %33 {offsets = [0, 127], sizes = [32, 1], strides = [1, 1]} : vector<32x128xbf16> to vector<32x1xbf16>
    %35 = vector.extract_strided_slice %33 {offsets = [0, 0], sizes = [32, 127], strides = [1, 1]} : vector<32x128xbf16> to vector<32x127xbf16>
    %36 = tpu.concatenate %34, %35 in 1 : vector<32x1xbf16>, vector<32x127xbf16> -> vector<32x128xbf16>
    %37 = vector.extract_strided_slice %33 {offsets = [0, 1], sizes = [32, 127], strides = [1, 1]} : vector<32x128xbf16> to vector<32x127xbf16>
    %38 = vector.extract_strided_slice %33 {offsets = [0, 0], sizes = [32, 1], strides = [1, 1]} : vector<32x128xbf16> to vector<32x1xbf16>
    %39 = tpu.concatenate %37, %38 in 1 : vector<32x127xbf16>, vector<32x1xbf16> -> vector<32x128xbf16>
    %40 = arith.maximumf %36, %39 : vector<32x128xbf16>
    %41 = arith.maximumf %33, %40 : vector<32x128xbf16>
    %42 = vector.extract_strided_slice %41 {offsets = [31, 0], sizes = [1, 128], strides = [1, 1]} : vector<32x128xbf16> to vector<1x128xbf16>
    %43 = vector.extract_strided_slice %41 {offsets = [0, 0], sizes = [31, 128], strides = [1, 1]} : vector<32x128xbf16> to vector<31x128xbf16>
    %44 = tpu.concatenate %42, %43 in 0 : vector<1x128xbf16>, vector<31x128xbf16> -> vector<32x128xbf16>
    %45 = vector.extract_strided_slice %41 {offsets = [1, 0], sizes = [31, 128], strides = [1, 1]} : vector<32x128xbf16> to vector<31x128xbf16>
    %46 = vector.extract_strided_slice %41 {offsets = [0, 0], sizes = [1, 128], strides = [1, 1]} : vector<32x128xbf16> to vector<1x128xbf16>
    %47 = tpu.concatenate %45, %46 in 0 : vector<31x128xbf16>, vector<1x128xbf16> -> vector<32x128xbf16>
    %48 = arith.maximumf %44, %47 : vector<32x128xbf16>
    %49 = arith.maximumf %25, %48 : vector<32x128xbf16>
    %50 = vector.extract_strided_slice %41 {offsets = [30, 0], sizes = [2, 128], strides = [1, 1]} : vector<32x128xbf16> to vector<2x128xbf16>
    %51 = vector.extract_strided_slice %41 {offsets = [0, 0], sizes = [30, 128], strides = [1, 1]} : vector<32x128xbf16> to vector<30x128xbf16>
    %52 = tpu.concatenate %50, %51 in 0 : vector<2x128xbf16>, vector<30x128xbf16> -> vector<32x128xbf16>
    %53 = vector.extract_strided_slice %41 {offsets = [2, 0], sizes = [30, 128], strides = [1, 1]} : vector<32x128xbf16> to vector<30x128xbf16>
    %54 = vector.extract_strided_slice %41 {offsets = [0, 0], sizes = [2, 128], strides = [1, 1]} : vector<32x128xbf16> to vector<2x128xbf16>
    %55 = tpu.concatenate %53, %54 in 0 : vector<30x128xbf16>, vector<2x128xbf16> -> vector<32x128xbf16>
    %56 = arith.maximumf %52, %55 : vector<32x128xbf16>
    %57 = arith.maximumf %49, %56 : vector<32x128xbf16>
    %58 = vector.extract_strided_slice %41 {offsets = [0, 127], sizes = [32, 1], strides = [1, 1]} : vector<32x128xbf16> to vector<32x1xbf16>
    %59 = vector.extract_strided_slice %41 {offsets = [0, 0], sizes = [32, 127], strides = [1, 1]} : vector<32x128xbf16> to vector<32x127xbf16>
    %60 = tpu.concatenate %58, %59 in 1 : vector<32x1xbf16>, vector<32x127xbf16> -> vector<32x128xbf16>
    %61 = vector.extract_strided_slice %41 {offsets = [0, 1], sizes = [32, 127], strides = [1, 1]} : vector<32x128xbf16> to vector<32x127xbf16>
    %62 = vector.extract_strided_slice %41 {offsets = [0, 0], sizes = [32, 1], strides = [1, 1]} : vector<32x128xbf16> to vector<32x1xbf16>
    %63 = tpu.concatenate %61, %62 in 1 : vector<32x127xbf16>, vector<32x1xbf16> -> vector<32x128xbf16>
    %64 = arith.maximumf %60, %63 : vector<32x128xbf16>
    %65 = arith.maximumf %41, %64 : vector<32x128xbf16>
    %66 = arith.maximumf %57, %65 : vector<32x128xbf16>
    %67 = arith.mulf %66, %7 : vector<32x128xbf16>
    %68 = arith.extf %67 : vector<32x128xbf16> to vector<32x128xf32>
    %69 = vector.shape_cast %68 : vector<32x128xf32> to vector<1x32x128xf32>
    %cst_14 = arith.constant dense<0.000000e+00> : vector<1xf32>
    %70 = vector.multi_reduction <add>, %69, %cst_14 [1, 2] : vector<1x32x128xf32> to vector<1xf32>
    %71 = vector.shape_cast %70 : vector<1xf32> to vector<1x1x1xf32>
    %72 = vector.extract %71[0, 0, 0] : f32 from vector<1x1x1xf32>
    %73 = vector.extract_strided_slice %7 {offsets = [29, 0], sizes = [3, 128], strides = [1, 1]} : vector<32x128xbf16> to vector<3x128xbf16>
    %74 = vector.extract_strided_slice %7 {offsets = [0, 0], sizes = [29, 128], strides = [1, 1]} : vector<32x128xbf16> to vector<29x128xbf16>
    %75 = tpu.concatenate %73, %74 in 0 : vector<3x128xbf16>, vector<29x128xbf16> -> vector<32x128xbf16>
    %76 = vector.extract_strided_slice %7 {offsets = [3, 0], sizes = [29, 128], strides = [1, 1]} : vector<32x128xbf16> to vector<29x128xbf16>
    %77 = vector.extract_strided_slice %7 {offsets = [0, 0], sizes = [3, 128], strides = [1, 1]} : vector<32x128xbf16> to vector<3x128xbf16>
    %78 = tpu.concatenate %76, %77 in 0 : vector<29x128xbf16>, vector<3x128xbf16> -> vector<32x128xbf16>
    %79 = arith.maximumf %75, %78 : vector<32x128xbf16>
    %80 = vector.extract_strided_slice %7 {offsets = [0, 127], sizes = [32, 1], strides = [1, 1]} : vector<32x128xbf16> to vector<32x1xbf16>
    %81 = vector.extract_strided_slice %7 {offsets = [0, 0], sizes = [32, 127], strides = [1, 1]} : vector<32x128xbf16> to vector<32x127xbf16>
    %82 = tpu.concatenate %80, %81 in 1 : vector<32x1xbf16>, vector<32x127xbf16> -> vector<32x128xbf16>
    %83 = vector.extract_strided_slice %7 {offsets = [0, 1], sizes = [32, 127], strides = [1, 1]} : vector<32x128xbf16> to vector<32x127xbf16>
    %84 = vector.extract_strided_slice %7 {offsets = [0, 0], sizes = [32, 1], strides = [1, 1]} : vector<32x128xbf16> to vector<32x1xbf16>
    %85 = tpu.concatenate %83, %84 in 1 : vector<32x127xbf16>, vector<32x1xbf16> -> vector<32x128xbf16>
    %86 = arith.maximumf %82, %85 : vector<32x128xbf16>
    %87 = arith.maximumf %7, %86 : vector<32x128xbf16>
    %88 = vector.extract_strided_slice %87 {offsets = [0, 127], sizes = [32, 1], strides = [1, 1]} : vector<32x128xbf16> to vector<32x1xbf16>
    %89 = vector.extract_strided_slice %87 {offsets = [0, 0], sizes = [32, 127], strides = [1, 1]} : vector<32x128xbf16> to vector<32x127xbf16>
    %90 = tpu.concatenate %88, %89 in 1 : vector<32x1xbf16>, vector<32x127xbf16> -> vector<32x128xbf16>
    %91 = vector.extract_strided_slice %87 {offsets = [0, 1], sizes = [32, 127], strides = [1, 1]} : vector<32x128xbf16> to vector<32x127xbf16>
    %92 = vector.extract_strided_slice %87 {offsets = [0, 0], sizes = [32, 1], strides = [1, 1]} : vector<32x128xbf16> to vector<32x1xbf16>
    %93 = tpu.concatenate %91, %92 in 1 : vector<32x127xbf16>, vector<32x1xbf16> -> vector<32x128xbf16>
    %94 = arith.maximumf %90, %93 : vector<32x128xbf16>
    %95 = arith.maximumf %87, %94 : vector<32x128xbf16>
    %96 = vector.extract_strided_slice %95 {offsets = [31, 0], sizes = [1, 128], strides = [1, 1]} : vector<32x128xbf16> to vector<1x128xbf16>
    %97 = vector.extract_strided_slice %95 {offsets = [0, 0], sizes = [31, 128], strides = [1, 1]} : vector<32x128xbf16> to vector<31x128xbf16>
    %98 = tpu.concatenate %96, %97 in 0 : vector<1x128xbf16>, vector<31x128xbf16> -> vector<32x128xbf16>
    %99 = vector.extract_strided_slice %95 {offsets = [1, 0], sizes = [31, 128], strides = [1, 1]} : vector<32x128xbf16> to vector<31x128xbf16>
    %100 = vector.extract_strided_slice %95 {offsets = [0, 0], sizes = [1, 128], strides = [1, 1]} : vector<32x128xbf16> to vector<1x128xbf16>
    %101 = tpu.concatenate %99, %100 in 0 : vector<31x128xbf16>, vector<1x128xbf16> -> vector<32x128xbf16>
    %102 = arith.maximumf %98, %101 : vector<32x128xbf16>
    %103 = arith.maximumf %79, %102 : vector<32x128xbf16>
    %104 = vector.extract_strided_slice %95 {offsets = [30, 0], sizes = [2, 128], strides = [1, 1]} : vector<32x128xbf16> to vector<2x128xbf16>
    %105 = vector.extract_strided_slice %95 {offsets = [0, 0], sizes = [30, 128], strides = [1, 1]} : vector<32x128xbf16> to vector<30x128xbf16>
    %106 = tpu.concatenate %104, %105 in 0 : vector<2x128xbf16>, vector<30x128xbf16> -> vector<32x128xbf16>
    %107 = vector.extract_strided_slice %95 {offsets = [2, 0], sizes = [30, 128], strides = [1, 1]} : vector<32x128xbf16> to vector<30x128xbf16>
    %108 = vector.extract_strided_slice %95 {offsets = [0, 0], sizes = [2, 128], strides = [1, 1]} : vector<32x128xbf16> to vector<2x128xbf16>
    %109 = tpu.concatenate %107, %108 in 0 : vector<30x128xbf16>, vector<2x128xbf16> -> vector<32x128xbf16>
    %110 = arith.maximumf %106, %109 : vector<32x128xbf16>
    %111 = arith.maximumf %103, %110 : vector<32x128xbf16>
    %112 = vector.extract_strided_slice %95 {offsets = [0, 127], sizes = [32, 1], strides = [1, 1]} : vector<32x128xbf16> to vector<32x1xbf16>
    %113 = vector.extract_strided_slice %95 {offsets = [0, 0], sizes = [32, 127], strides = [1, 1]} : vector<32x128xbf16> to vector<32x127xbf16>
    %114 = tpu.concatenate %112, %113 in 1 : vector<32x1xbf16>, vector<32x127xbf16> -> vector<32x128xbf16>
    %115 = vector.extract_strided_slice %95 {offsets = [0, 1], sizes = [32, 127], strides = [1, 1]} : vector<32x128xbf16> to vector<32x127xbf16>
    %116 = vector.extract_strided_slice %95 {offsets = [0, 0], sizes = [32, 1], strides = [1, 1]} : vector<32x128xbf16> to vector<32x1xbf16>
    %117 = tpu.concatenate %115, %116 in 1 : vector<32x127xbf16>, vector<32x1xbf16> -> vector<32x128xbf16>
    %118 = arith.maximumf %114, %117 : vector<32x128xbf16>
    %119 = arith.maximumf %95, %118 : vector<32x128xbf16>
    %120 = arith.maximumf %111, %119 : vector<32x128xbf16>
    %121 = arith.mulf %120, %8 : vector<32x128xbf16>
    %122 = arith.extf %121 : vector<32x128xbf16> to vector<32x128xf32>
    %123 = vector.shape_cast %122 : vector<32x128xf32> to vector<1x32x128xf32>
    %cst_15 = arith.constant dense<0.000000e+00> : vector<1xf32>
    %124 = vector.multi_reduction <add>, %123, %cst_15 [1, 2] : vector<1x32x128xf32> to vector<1xf32>
    %125 = vector.shape_cast %124 : vector<1xf32> to vector<1x1x1xf32>
    %126 = vector.extract %125[0, 0, 0] : f32 from vector<1x1x1xf32>
    %127 = arith.subf %13, %72 : f32
    %128 = arith.subf %18, %126 : f32
    %129 = tpu.iota {dimensions = array<i32: 0>} : vector<8x128xi32>
    %130 = tpu.iota {dimensions = array<i32: 1>} : vector<8x128xi32>
    %c0_i32_16 = arith.constant 0 : i32
    %131 = vector.broadcast %c0_i32_16 : i32 to vector<8x128xi32>
    %132 = arith.cmpi eq, %130, %131 : vector<8x128xi32>
    %c1_i32_17 = arith.constant 1 : i32
    %133 = vector.broadcast %c1_i32_17 : i32 to vector<8x128xi32>
    %134 = arith.cmpi eq, %130, %133 : vector<8x128xi32>
    %c2_i32 = arith.constant 2 : i32
    %135 = vector.broadcast %c2_i32 : i32 to vector<8x128xi32>
    %136 = arith.cmpi eq, %130, %135 : vector<8x128xi32>
    %cst_18 = arith.constant 0.000000e+00 : f32
    %137 = vector.broadcast %128 : f32 to vector<8x128xf32>
    %138 = vector.broadcast %cst_18 : f32 to vector<8x128xf32>
    %139 = arith.select %136, %137, %138 : vector<8x128xi1>, vector<8x128xf32>
    %140 = vector.broadcast %127 : f32 to vector<8x128xf32>
    %141 = arith.select %134, %140, %139 : vector<8x128xi1>, vector<8x128xf32>
    %142 = vector.broadcast %72 : f32 to vector<8x128xf32>
    %143 = arith.select %132, %142, %141 : vector<8x128xi1>, vector<8x128xf32>
    %c0_i32_19 = arith.constant 0 : i32
    %144 = vector.broadcast %c0_i32_19 : i32 to vector<8x128xi32>
    %145 = arith.cmpi eq, %129, %144 : vector<8x128xi32>
    %cst_20 = arith.constant 0.000000e+00 : f32
    %146 = vector.broadcast %cst_20 : f32 to vector<8x128xf32>
    %147 = arith.select %145, %143, %146 : vector<8x128xi1>, vector<8x128xf32>
    %c0_21 = arith.constant 0 : index
    %c0_22 = arith.constant 0 : index
    %c0_23 = arith.constant 0 : index
    %148 = vector.load %arg3[%c0_21, %c0_22, %c0_23] : memref<1x8x128xf32, #tpu.memory_space<vmem>>, vector<1x8x128xf32>
    %149 = vector.shape_cast %148 : vector<1x8x128xf32> to vector<8x128xf32>
    %150 = vector.shape_cast %147 : vector<8x128xf32> to vector<1x8x128xf32>
    tpu.vector_store %arg3[%c0_21, %c0_22, %c0_23], %150 {strides = array<i32>} : memref<1x8x128xf32, #tpu.memory_space<vmem>>, vector<1x8x128xf32>,
    return
  }
  func.func @transform_0(%arg0: i32) -> (i32, i32, i32) {
    %c0_i32 = arith.constant 0 : i32
    %c0_i32_0 = arith.constant 0 : i32
    %c0_i32_1 = arith.constant 0 : i32
    return %arg0, %c0_i32, %c0_i32_0 : i32, i32, i32
  }
  func.func @transform_1(%arg0: i32) -> (i32, i32, i32) {
    %c0_i32 = arith.constant 0 : i32
    %c0_i32_0 = arith.constant 0 : i32
    %c0_i32_1 = arith.constant 0 : i32
    return %arg0, %c0_i32, %c0_i32_0 : i32, i32, i32
  }
  func.func @transform_2(%arg0: i32) -> (i32, i32, i32) {
    %c0_i32 = arith.constant 0 : i32
    %c0_i32_0 = arith.constant 0 : i32
    %c0_i32_1 = arith.constant 0 : i32
    return %arg0, %c0_i32, %c0_i32_0 : i32, i32, i32
  }
}

</mosaic_0001>

<bundles_post_ra>
// kernel: tpu_custom_call.1
= control target key start
LH: loop header
LB: loop body
LE: loop exit
PB: predicated region body
PF: predicated region fallthrough
CT: control target
= control target key end

     0   :  { %7 = vsyncpa [#allocation5], 0  ;;  %s6884_s0 = inlined_call_operand.hbm [shape: bf16[2,32,128], index: 0, kind: input, shape index: {}]   ;;  %s6885_s1 = inlined_call_operand.hbm [shape: bf16[2,32,128], index: 1, kind: input, shape index: {}]   ;;  %s6886_s2 = inlined_call_operand.hbm [shape: f32[2,8,128], index: 2, kind: output, shape index: {}]  }
   0x1   :  { %9 = vsyncpa [#allocation5 + $0x1], 0 }
   0x2   :  { %10 = vsyncpa [#allocation8], 0 }
   0x3   :  { %12 = vsyncpa [#allocation8 + $0x1], 0 }
   0x4   :  { %13 = vsyncpa [#allocation6], 0 }
   0x5   :  { %15 = vsyncpa [#allocation6 + $0x1], 0  ;;  %s3678_s9 = smov 0   ;;  %s3680_s10 = smov 0  }
   0x6   :  { %s3682_s11 = smov 0   ;;  %s3684_s12 = smov 0  }
   0x7 LB: > { %s3699_s13 = sadd.s32 4294967295, %s3646_s12   ;;  %s3162_s14 = sadd.s32 4294967294, %s3646_s12   ;;  %s3646_s12 = sphi %s3684_s12, %s7620_s12   ;;  %s3642_s11 = sphi %s3682_s11, %s7619_s11   ;;  %s3638_s10 = sphi %s3680_s10, %s7618_s10   ;;  %s3634_s9 = sphi %s3678_s9, %s7617_s9  }
   0x8   : > { %s3703_s15 = sadd.s32 1, %s3646_s12   ;;  %s28_s16 = sadd.s32 1, %s3642_s11 }
   0x9   : > { %s25_s17 = ssub.s32 %s3646_s12, %s3703_s15  ;;  %p35_p0 = scmp.ne.s32.totalorder %s3642_s11, %s3638_s10 }
   0xa   : > { %p26_p1 = scmp.eq.s32.totalorder %s25_s17, 0  ;;  %p36_p2 = scmp.eq.s32.totalorder %s3646_s12, 0 }
   0xb   : > { %p41_p3 = scmp.ne.s32.totalorder %s3638_s10, %s3634_s9  ;;  %p42_p4 = scmp.eq.s32.totalorder %s3699_s13, 0 }
   0xc   : > { %s3715_s18 = scalar_select %p26_p1, %s3642_s11, %s28_s16  }
   0xd   : > { %p3717_p5 = por %p36_p2, %p35_p0  ;;  %p3721_p6 = por %p42_p4, %p41_p3 }
   0xe   : > { %p91_p7 = scmp.eq.s32.totalorder %s3699_s13, 1  ;;  %p97_p8 = scmp.eq.s32.totalorder %s3162_s14, 1 }
   0xf   : > { %s6981_s20 = scalar_select %p3721_p6, 1, 0 }
  0x10   : > { %p3452_p10 = scmp.lt.s32.totalorder %s3646_s12, 2  ;;  %p3728_p11 = por %p91_p7, %p35_p0 }
  0x11   : > { %p3732_p12 = por %p97_p8, %p41_p3  ;;  %s3737_s23 = sand.u32 1, %s3642_s11  }
  0x12   : > { %s6982_s21 = scalar_select %p3728_p11, 1, 0 }
  0x13   : > { %s6983_s22 = scalar_select %p3732_p12, 1, 0 }
  0x14   : > { %s3423_s24 = sshll.u32 %s3646_s12, 8  ;;  %s3165_s25 = sshll.u32 %s3737_s23, 4 }
  0x15   : > { %s3746_s28 = scalar_lea.hbm %s6884_s0, %s3423_s24  ;;  %s121_s29 = scalar_lea.vmem [#allocation4], %s3165_s25 }
  0x16   : > { %s128_s30 = sshll.u32 %s121_s29, 4  ;;  %p3752_p13 = pnand %p3452_p10, %p3717_p5  ;;  %s3756_s30 = int_to_ptr.vmem [resolvable:$true] %s128_s30 }
  0x17   : > { %s118_s4 = scalar_lea.sflag [#allocation5], %s3737_s23  ;;  %s3518_s5 = scalar_lea.hbm %s3746_s28, 256 }
  0x18   : > { %p3519_p0 = scmp.ne.s32.totalorder %s3746_s28, %s3518_s5  ;;  %p3520_p1 = pneg %p3752_p13 }
  0x19   : > { %s3523_s8 = scalar_lea.hbm %s6884_s0, 512  ;;  %p3524_p4 = scmp.lt.s32.totalorder %s3746_s28, %s6884_s0 }
  0x1a   : > { %p3521_p2 = pnand %p3520_p1, %p3519_p0  ;;  %p3525_p5 = scmp.lt.s32.totalorder %s3523_s8, %s3518_s5 }
  0x1c   : > { %p3522_p3 = pneg %p3521_p2  ;;  %p3526_p7 = por %p3525_p5, %p3524_p4 }
  0x1e   : > { %p3527_p8 = pnand %p3526_p7, %p3522_p3 }
  0x20   : > { %3530 = shalt.err (!%p3527_p8)
}
  0x21   : > { %s3531_s17 = scalar_lea.vmem %s3756_s30, 256  ;;  %s3652_s19 = smov [#allocation4]  }
  0x22   : > { %p3532_p10 = scmp.ne.s32.totalorder %s3756_s30, %s3531_s17  ;;  %s3536_s26 = sshll.u32 %s3652_s19, 4  ;;  %s3537_s26 = int_to_ptr.vmem [resolvable:$false] %s3536_s26 }
  0x23   : > { %s3538_s27 = scalar_lea.vmem %s3537_s26, 512  ;;  %p3539_p9 = scmp.lt.s32.totalorder %s3756_s30, %s3537_s26 }
  0x24   : > { %p3534_p0 = pnand %p3532_p10, %p3520_p1  ;;  %p3540_p12 = scmp.lt.s32.totalorder %s3538_s27, %s3531_s17 }
  0x26   : > { %p3535_p2 = pneg %p3534_p0  ;;  %p3541_p11 = por %p3540_p12, %p3539_p9 }
  0x28   : > { %p3542_p4 = pnand %p3541_p11, %p3535_p2 }
  0x2a   : > { %3545 = shalt.err (!%p3542_p4)
}
  0x2b   : > { %s3653_s29 = smov 64   ;;  %s3654_s5 = smov 4  }
  0x2c   : > { %3444 = dma.hbm_to_vmem [thread:$0]  (!%p3752_p13), %s3746_s28, 256, %s3756_s30, %s118_s4, %s3653_s29, %s3653_s29, %s3654_s5  }
  0x2d   : > { %p3171_p9 = scmp.ge.s32.totalorder %s3646_s12, 1  ;;  %p157_p11 = scmp.lt.s32.totalorder %s3646_s12, 3 }
  0x2e   : > { %s3799_s14 = scalar_lea.hbm %s6885_s1, %s3423_s24  ;;  %s142_s16 = scalar_lea.vmem [#allocation7], %s3165_s25 }
  0x2f   : > { %p3790_p12 = pnand %p3171_p9, %p157_p11  ;;  %s149_s17 = sshll.u32 %s142_s16, 4  ;;  %s3803_s17 = int_to_ptr.vmem [resolvable:$true] %s149_s17 }
  0x30   : > { %s139_s28 = scalar_lea.sflag [#allocation8], %s3737_s23  ;;  %s3546_s30 = scalar_lea.hbm %s3799_s14, 256 }
  0x31   : > { %p3547_p3 = scmp.ne.s32.totalorder %s3799_s14, %s3546_s30  ;;  %s3551_s24 = scalar_lea.hbm %s6885_s1, 512 }
  0x32   : > { %p3552_p8 = scmp.lt.s32.totalorder %s3799_s14, %s6885_s1  ;;  %p3553_p10 = scmp.lt.s32.totalorder %s3551_s24, %s3546_s30 }
  0x33   : > { %p3549_p5 = pnand %p3547_p3, %p3520_p1 }
  0x34   : > { %p3554_p0 = por %p3553_p10, %p3552_p8 }
  0x35   : > { %p3550_p7 = pneg %p3549_p5 }
  0x37   : > { %p3555_p2 = pnand %p3554_p0, %p3550_p7 }
  0x39   : > { %3558 = shalt.err (!%p3555_p2)
}
  0x3a   : > { %s3559_s23 = scalar_lea.vmem %s3803_s17, 256  ;;  %s3655_s25 = smov [#allocation7]  }
  0x3b   : > { %p3560_p4 = scmp.ne.s32.totalorder %s3803_s17, %s3559_s23  ;;  %s3564_s7 = sshll.u32 %s3655_s25, 4  ;;  %s3565_s7 = int_to_ptr.vmem [resolvable:$false] %s3564_s7 }
  0x3c   : > { %s3566_s8 = scalar_lea.vmem %s3565_s7, 512  ;;  %p3567_p3 = scmp.lt.s32.totalorder %s3803_s17, %s3565_s7 }
  0x3d   : > { %p3562_p9 = pnand %p3560_p4, %p3520_p1  ;;  %p3568_p5 = scmp.lt.s32.totalorder %s3566_s8, %s3559_s23 }
  0x3f   : > { %p3563_p11 = pneg %p3562_p9  ;;  %p3569_p6 = por %p3568_p5, %p3567_p3 }
  0x41   : > { %p3570_p8 = pnand %p3569_p6, %p3563_p11 }
  0x43   : > { %3573 = shalt.err (!%p3570_p8)
}
  0x44   : > { %3447 = dma.hbm_to_vmem [thread:$0]  (!%p3752_p13), %s3799_s14, 256, %s3803_s17, %s139_s28, %s3653_s29, %s3653_s29, %s3654_s5  }
  0x45   : > { %161 = sbr.rel (%p3790_p12) target bundleno = 1773 (0x6ed), region = 28 }
  0x4a   : > { %s3834_s16 = sand.u32 1, %s3638_s10   ;;  %p6986_p6 = scmp.ne.s32.totalorder %s6981_s20, 0 }
  0x4b   : > { %s3172_s30 = sshll.u32 %s3834_s16, 4  ;;  %s164_s4 = scalar_lea.sflag [#allocation5], %s3834_s16 }
  0x4c   : > { %s167_s19 = scalar_lea.vmem [#allocation4], %s3172_s30 }
  0x4d   : > { %3621 = dma.done.wait (%p6986_p6), %s164_s4, 256  }
  0x4e   : > { %3623 = vsyncadd (%p6986_p6), %s164_s4, 4294967040  ;;  %s173_s3 = scalar_lea.sflag [#allocation8], %s3834_s16  ;;  %s176_s29 = scalar_lea.vmem [#allocation7], %s3172_s30 }
  0x4f   : > { %3625 = dma.done.wait (%p6986_p6), %s173_s3, 256  }
  0x50   : > { %3627 = vsyncadd (%p6986_p6), %s173_s3, 4294967040  ;;  %s3174_s5 = sshll.u32 %s3834_s16, 3  ;;  %v209_v0 = vld [vmem:[%s167_s19] sm:$0xff]   ;;  %v211_v1 = vld [vmem:[%s167_s19 + $0x8] sm:$0xff]   ;;  %s3850_s14 = smov 0  }
  0x51   : > { %v217_v2 = vld [vmem:[%s176_s29] sm:$0xff]   ;;  %213 = vst [vmem:[#allocation2] sm:$0xff] %v209_v0   ;;  %215 = vst [vmem:[#allocation2 + $0x8] sm:$0xff] %v211_v1   ;;  %v219_v3 = vld [vmem:[%s176_s29 + $0x8] sm:$0xff]   ;;  %s3848_s6 = scalar_lea.vmem [#allocation9], %s3174_s5 }
  0x52   : > { %221 = vst [vmem:[#allocation3] sm:$0xff] %v217_v2   ;;  %223 = vst [vmem:[#allocation3 + $0x8] sm:$0xff] %v219_v3  }
  0x53 LB: >> { %vm6889_vm0 = vcmask 1040384   ;;  %vm6890_vm1 = vsmask.f32 256  ;;  %vm6891_vm2 = vsmask.f32 7424  ;;  %s3656_s20 = smov 127   ;;  %s3650_s14 = sphi %s3850_s14, %s2396_s14  }
  0x54   : >> { %vm293_vm3 = vcmask 1047552   ;;  %vm3902_vm4 = vmand %vm6889_vm0, %vm6890_vm1  ;;  %v6987_v31 = vmov 0  ;;  %v6990_v38 = vmov 0  ;;  %s3657_s17 = smov 1   ;;  %s2396_s14 = sadd.s32 1, %s3650_s14  }
  0x55   : >> { %v6988_v31 = vsel %vm3902_vm4, 4294967295, %v6987_v31  ;;  %vm3909_vm5 = vmand %vm293_vm3, %vm6891_vm2  ;;  %p228_p1 = scmp.lt.s32.totalorder %s2396_s14, 6 }
  0x56   : >> { %6989 = vst [vmem:[#allocation13_spill] sm:$0xff] %v6988_v31  ;;  %v6991_v38 = vsel %vm3909_vm5, 4294967295, %v6990_v38 }
  0x57   : >> { %6992 = vst [vmem:[#allocation14_spill] sm:$0xff] %v6991_v38 }
  0x58   : >> { %v3855_v4 = vld [vmem:[#allocation2 + $0x8] sm:$0xf]  ;;  %v3857_v5 = vld [vmem:[#allocation2 + $0xc] sm:$0xf]  ;;  %v3863_v7 = vld [vmem:[#allocation2] sm:$0xf] }
  0x59   : >> { %v3861_v6 = vcombine.low %v3855_v4, %v3857_v5  ;;  %v3865_v8 = vld [vmem:[#allocation2 + $0x4] sm:$0xf]  ;;  %v3867_v9 = vld [vmem:[#allocation3] sm:$0xf]  ;;  %v3175_v10 = vcombine.low %v3857_v5, %v3857_v5  ;;  %v3875_v12 = vld [vmem:[#allocation3 + $0x4] sm:$0xf]  ;;  %v3178_v13 = vcombine.low %v3863_v7, %v3863_v7 }
  0x5a   : >> { %v3873_v11 = vcombine.low %v3863_v7, %v3865_v8  ;;  %v3884_v15 = vcombine.low %v3867_v9, %v3875_v12  ;;  %v3887_v18 = vld [vmem:[#allocation3 + $0xc] sm:$0xf]  ;;  %v3894_v26 = vld [vmem:[#allocation3 + $0x8] sm:$0xf]  ;;  %v3226_v54 = vcombine.low %v3867_v9, %v3867_v9  ;;  %vm400_vm11 = vcmp.gt.bf16.partialorder %v3863_v7, 1056980736 }
  0x5b   : >> { %298 = vrot.lane.b32.xlu1 %v3861_v6, %s3656_s20  ;;  %v267_v14 = vshrl.u32 %v3861_v6, 16  ;;  %v246_v16 = vshrl.u32 %v3175_v10, 16  ;;  %v270_v17 = vshll.u32 %v3861_v6, 16  ;;  %v289_v21 = vshll.u32 %v3178_v13, 16 }
  0x5c   : >> { %296 = vrot.lane.b32.xlu0 %v3873_v11, %s3656_s20  ;;  %v260_v19 = vshrl.u32 %v3873_v11, 16  ;;  %v263_v20 = vshll.u32 %v3873_v11, 16  ;;  %v785_v22 = vshrl.u32 %v3884_v15, 16  ;;  %v3223_v30 = vcombine.low %v3887_v18, %v3887_v18 }
  0x5d   : >> { %v248_v23 = vrot.slane %v246_v16, 3  ;;  %v269_v24 = vrot.slane %v267_v14, 7  ;;  %v282_v25 = vrot.slane %v270_v17, 1  ;;  %v291_v29 = vrot.slane %v289_v21, 1 }
  0x5e   : >> { %v262_v27 = vrot.slane %v260_v19, 7  ;;  %v280_v28 = vrot.slane %v263_v20, 1  ;;  %v787_v34 = vrot.slane %v785_v22, 7  ;;  %v788_v35 = vshll.u32 %v3884_v15, 16 }
  0x5f   : >> { %816 = vrot.lane.b32.xlu1 %v3884_v15, %s3656_s20  ;;  %v272_v32 = vor.u32 %v270_v17, %v269_v24  ;;  %v284_v33 = vor.u32 %v282_v25, %v267_v14  ;;  %v772_v39 = vshrl.u32 %v3223_v30, 16  ;;  %v3225_v40 = vcombine.low %v3894_v26, %v3887_v18 }
  0x60   : >> { %v265_v36 = vor.u32 %v263_v20, %v262_v27  ;;  %v281_v37 = vor.u32 %v280_v28, %v260_v19  ;;  %v790_v48 = vor.u32 %v788_v35, %v787_v34  ;;  %v802_v52 = vrot.slane %v788_v35, 1 }
  0x61   : >> { %v3916_v41 = vsel %vm6890_vm1, %v262_v27, %v272_v32  ;;  %v792_v43 = vshrl.u32 %v3225_v40, 16  ;;  %v3928_v44 = vsel %vm3909_vm5, %v284_v33, %v291_v29  ;;  %v795_v45 = vshll.u32 %v3225_v40, 16 }
  0x62   : >> { %v3920_v42 = vsel %vm3902_vm4, %v248_v23, %v265_v36  ;;  %v3931_v46 = vsel %vm6891_vm2, %v281_v37, %v282_v25  ;;  %v774_v47 = vrot.slane %v772_v39, 3  ;;  %v803_v55 = vor.u32 %v802_v52, %v785_v22 }
  0x63   : >> { %313 = vrot.lane.b32.xlu0 %v3920_v42, %s3656_s20  ;;  %315 = vrot.lane.b32.xlu1 %v3916_v41, %s3656_s20  ;;  %v794_v49 = vrot.slane %v792_v43, 7  ;;  %v804_v56 = vrot.slane %v795_v45, 1  ;;  %v811_v57 = vshll.u32 %v3226_v54, 16  ;;  %v6903_v29 = vmov 0  }
  0x64   : >> { %v3939_v51 = vsel %vm3902_vm4, %v774_v47, %v790_v48  ;;  %vm401_vm14 = vcmp.gt.bf16.partialorder %v3865_v8, 1056980736 }
  0x65   : >> { %v797_v50 = vor.u32 %v795_v45, %v794_v49  ;;  %v3954_v58 = vsel %vm6891_vm2, %v803_v55, %v804_v56  ;;  %v806_v59 = vor.u32 %v804_v56, %v792_v43  ;;  %v813_v60 = vrot.slane %v811_v57, 1 }
  0x67   : >> { %330 = vrot.lane.b32.xlu0 %v3931_v46, %s3656_s20  ;;  %332 = vrot.lane.b32.xlu1 %v3928_v44, %s3656_s20  ;;  %v3942_v53 = vsel %vm6890_vm1, %v787_v34, %v797_v50  ;;  %v3962_v61 = vsel %vm3909_vm5, %v806_v59, %v813_v60  ;;  %vm7029_vm5 = vcmp.gt.bf16.partialorder %v3855_v4, 1056980736 }
  0x6b   : >> { %833 = vrot.lane.b32.xlu0 %v3939_v51, %s3656_s20  ;;  %835 = vrot.lane.b32.xlu1 %v3942_v53, %s3656_s20 }
  0x6f   : >> { %818 = vrot.lane.b32.xlu0 %v3225_v40, %s3656_s20  ;;  %338 = vrot.lane.b32.xlu1 %v3931_v46, %s3657_s17 }
  0x73   : >> { %850 = vrot.lane.b32.xlu0 %v3954_v58, %s3656_s20  ;;  %304 = vrot.lane.b32.xlu1 %v3873_v11, %s3657_s17 }
  0x77   : >> { %852 = vrot.lane.b32.xlu0 %v3962_v61, %s3656_s20  ;;  %858 = vrot.lane.b32.xlu1 %v3954_v58, %s3657_s17 }
  0x7b   : >> { %340 = vrot.lane.b32.xlu0 %v3928_v44, %s3657_s17  ;;  %321 = vrot.lane.b32.xlu1 %v3920_v42, %s3657_s17 }
  0x7f   : >> { %306 = vrot.lane.b32.xlu0 %v3861_v6, %s3657_s17  ;;  %860 = vrot.lane.b32.xlu1 %v3962_v61, %s3657_s17 }
  0x83   : >> { %824 = vrot.lane.b32.xlu0 %v3884_v15, %s3657_s17  ;;  %826 = vrot.lane.b32.xlu1 %v3225_v40, %s3657_s17 }
  0x87   : >> { %323 = vrot.lane.b32.xlu0 %v3916_v41, %s3657_s17  ;;  %843 = vrot.lane.b32.xlu1 %v3942_v53, %s3657_s17 }
  0x8b   : >> { %841 = vrot.lane.b32.xlu0 %v3939_v51, %s3657_s17 }
  0xcd   : >> { %v3985_v62 = vpop.permute.xlu1 %298 }
  0xce   : >> { %v297_v63 = vpop.permute.xlu0 %296  ;;  %v393_v3 = vmul.bf16 %v3985_v62, %v3916_v41  ;;  %v397_v45 = vmul.bf16 %v3985_v62, %v3928_v44 }
  0xcf   : >> { %v392_v6 = vmul.bf16 %v297_v63, %v3920_v42  ;;  %v396_v43 = vmul.bf16 %v297_v63, %v3931_v46 }
  0xd0   : >> { %v395_v13 = vmul.bf16 %v393_v3, %v3928_v44 }
  0xd1   : >> { %v3987_v0 = vpop.permute.xlu1 %816  ;;  %v394_v14 = vmul.bf16 %v392_v6, %v3931_v46 }
  0xd2   : >> { %v912_v15 = vmul.bf16 %v3987_v0, %v3939_v51  ;;  %vm465_vm6 = vcmp.eq.bf16.partialorder %v395_v13, 0  ;;  %v916_v47 = vmul.bf16 %v3987_v0, %v3954_v58 }
  0xd3   : >> { %vm464_vm7 = vcmp.eq.bf16.partialorder %v394_v14, 0  ;;  %v4007_v30 = vsel %vm465_vm6, 65537, %v6903_v29 }
  0xd4   : >> { %v914_v20 = vmul.bf16 %v912_v15, %v3954_v58  ;;  %v4010_v32 = vsel %vm464_vm7, 65537, %v6903_v29  ;;  %v3194_v48 = vcombine.high %v4007_v30, %v4007_v30 }
  0xd5   : >> { %v314_v1 = vpop.permute.xlu0 %313  ;;  %v316_v2 = vpop.permute.xlu1 %315  ;;  %v3191_v49 = vcombine.low %v4010_v32, %v4010_v32  ;;  %v3192_v54 = vcombine.high %v4010_v32, %v4010_v32 }
  0xd6   : >> { %v346_v16 = vadd.bf16 %v314_v1, %v3920_v42  ;;  %v360_v21 = vmul.bf16 %v314_v1, %v3920_v42  ;;  %v362_v22 = vmul.bf16 %v314_v1, %v297_v63  ;;  %v347_v27 = vadd.bf16 %v316_v2, %v3916_v41 }
  0xd7   : >> { %v361_v33 = vmul.bf16 %v316_v2, %v3916_v41  ;;  %v363_v34 = vmul.bf16 %v316_v2, %v3985_v62  ;;  %vm984_vm8 = vcmp.eq.bf16.partialorder %v914_v20, 0  ;;  %vm4114_vm6 = vcmp.ne.s16.totalorder %v3191_v49, 0 }
  0xd8   : >> { %v348_v23 = vadd.bf16 %v346_v16, %v297_v63  ;;  %v364_v35 = vadd.bf16 %v362_v22, %v360_v21  ;;  %v349_v52 = vadd.bf16 %v347_v27, %v3985_v62  ;;  %v4031_v55 = vsel %vm984_vm8, 65537, %v6903_v29 }
  0xd9   : >> { %v331_v10 = vpop.permute.xlu0 %330  ;;  %v3992_v11 = vpop.permute.xlu1 %332  ;;  %v365_v56 = vadd.bf16 %v363_v34, %v361_v33 }
  0xda   : >> { %v366_v28 = vmul.bf16 %v331_v10, %v297_v63  ;;  %v350_v36 = vadd.bf16 %v348_v23, %v331_v10  ;;  %v367_v57 = vmul.bf16 %v3992_v11, %v3985_v62  ;;  %v370_v59 = vmul.bf16 %v331_v10, %v3931_v46 }
  0xdb   : >> { %v351_v10 = vadd.bf16 %v349_v52, %v3992_v11  ;;  %v7047_v62 = vmov 0 }
  0xdc   : >> { %v368_v50 = vadd.bf16 %v366_v28, %v364_v35  ;;  %v352_v63 = vadd.bf16 %v350_v36, %v3931_v46  ;;  %v369_v22 = vadd.bf16 %v367_v57, %v365_v56 }
  0xdd   : >> { %v834_v17 = vpop.permute.xlu0 %833  ;;  %v3999_v19 = vpop.permute.xlu1 %835 }
  0xde   : >> { %v866_v6 = vadd.bf16 %v834_v17, %v3939_v51  ;;  %v880_v13 = vmul.bf16 %v834_v17, %v3939_v51  ;;  %v882_v14 = vmul.bf16 %v834_v17, %v3987_v0  ;;  %v372_v16 = vadd.bf16 %v370_v59, %v368_v50 }
  0xdf   : >> { %v867_v23 = vadd.bf16 %v3999_v19, %v3942_v53  ;;  %v881_v27 = vmul.bf16 %v3999_v19, %v3942_v53 }
  0xe1   : >> { %v4003_v24 = vpop.permute.xlu0 %818  ;;  %v339_v25 = vpop.permute.xlu1 %338 }
  0xe2   : >> { %v913_v37 = vmul.bf16 %v4003_v24, %v3942_v53  ;;  %v374_v1 = vmul.bf16 %v339_v25, %v3931_v46  ;;  %v354_v20 = vadd.bf16 %v352_v63, %v339_v25  ;;  %v371_v46 = vmul.bf16 %v3992_v11, %v3928_v44 }
  0xe3   : >> { %v883_v36 = vmul.bf16 %v3999_v19, %v4003_v24  ;;  %v868_v11 = vadd.bf16 %v866_v6, %v3987_v0 }
  0xe4   : >> { %v915_v60 = vmul.bf16 %v913_v37, %v3962_v61  ;;  %v376_v28 = vadd.bf16 %v374_v1, %v372_v16  ;;  %v373_v56 = vadd.bf16 %v371_v46, %v369_v22 }
  0xe5   : >> { %v4016_v39 = vpop.permute.xlu0 %850  ;;  %v305_v40 = vpop.permute.xlu1 %304  ;;  %v885_v16 = vadd.bf16 %v883_v36, %v881_v27 }
  0xe6   : >> { %v398_v15 = vmul.bf16 %v396_v43, %v305_v40  ;;  %v378_v21 = vmul.bf16 %v339_v25, %v305_v40  ;;  %vm985_vm9 = vcmp.eq.bf16.partialorder %v915_v60, 0  ;;  %v886_v17 = vmul.bf16 %v4016_v39, %v3987_v0 }
  0xe7   : >> { %v356_v35 = vadd.bf16 %v354_v20, %v305_v40  ;;  %v884_v25 = vadd.bf16 %v882_v14, %v880_v13  ;;  %v4062_v57 = vsel %vm985_vm9, 65537, %v6903_v29  ;;  %v870_v59 = vadd.bf16 %v868_v11, %v4016_v39 }
  0xe8   : >> { %vm484_vm10 = vcmp.eq.bf16.partialorder %v398_v15, 0  ;;  %v380_v43 = vadd.bf16 %v378_v21, %v376_v28  ;;  %v353_v60 = vadd.bf16 %v351_v10, %v3928_v44  ;;  %v917_v14 = vmul.bf16 %v4003_v24, %v3962_v61 }
  0xe9   : >> { %v4039_v2 = vpop.permute.xlu0 %852  ;;  %v4041_v3 = vpop.permute.xlu1 %858  ;;  %v888_v63 = vadd.bf16 %v886_v17, %v884_v25  ;;  %v890_v15 = vmul.bf16 %v4016_v39, %v3954_v58  ;;  %v3242_v21 = vcombine.high %v4062_v57, %v4062_v57  ;;  %v4086_v22 = vadd.bf16 %v870_v59, %v3954_v58 }
  0xea   : >> { %v887_v10 = vmul.bf16 %v4039_v2, %v4003_v24  ;;  %v891_v25 = vmul.bf16 %v4039_v2, %v3962_v61 }
  0xeb   : >> { %v892_v28 = vadd.bf16 %v890_v15, %v888_v63  ;;  %v874_v49 = vadd.bf16 %v4086_v22, %v4041_v3  ;;  %v7099_v22 = vmov 0 }
  0xed   : >> { %v4055_v33 = vpop.permute.xlu0 %340  ;;  %v322_v34 = vpop.permute.xlu1 %321 }
  0xee   : >> { %v358_v37 = vadd.bf16 %v356_v35, %v322_v34  ;;  %v382_v50 = vmul.bf16 %v322_v34, %v305_v40  ;;  %v386_v52 = vmul.bf16 %v322_v34, %v3920_v42  ;;  %v4070_v40 = vsel %vm484_vm10, 65537, %v6903_v29 }
  0xef   : >> { %v869_v42 = vadd.bf16 %v867_v23, %v4003_v24  ;;  %v3195_v17 = vcombine.low %v4070_v40, %v4070_v40  ;;  %v3196_v35 = vcombine.high %v4070_v40, %v4070_v40  ;;  %v355_v36 = vadd.bf16 %v353_v60, %v4055_v33 }
  0xf0   : >> { %v384_v19 = vadd.bf16 %v382_v50, %v380_v43  ;;  %vm404_vm12 = vcmp.ge.bf16.partialorder %v358_v37, 1073758208  ;;  %vm424_vm13 = vcmp.le.bf16.partialorder %v358_v37, 1086341312  ;;  %v889_v43 = vadd.bf16 %v887_v10, %v885_v16 }
  0xf1   : >> { %v4067_v1 = vpop.permute.xlu0 %306  ;;  %v406_v6 = vsel %vm404_vm12, 65537, %v6903_v29  ;;  %v4075_v13 = vpop.permute.xlu1 %860  ;;  %v426_v23 = vsel %vm424_vm13, 65537, %v6903_v29  ;;  %v871_v39 = vadd.bf16 %v869_v42, %v4039_v2  ;;  %v375_v50 = vmul.bf16 %v4055_v33, %v3928_v44 }
  0xf2   : >> { %v388_v20 = vadd.bf16 %v386_v52, %v384_v19  ;;  %v3179_v46 = vcombine.low %v406_v6, %v406_v6  ;;  %v3180_v11 = vcombine.high %v406_v6, %v406_v6  ;;  %v3183_v52 = vcombine.low %v426_v23, %v426_v23 }
  0xf3   : >> { %v357_v2 = vadd.bf16 %v355_v36, %v4067_v1  ;;  %v894_v60 = vmul.bf16 %v4041_v3, %v3954_v58  ;;  %v379_v6 = vmul.bf16 %v4055_v33, %v4067_v1  ;;  %v873_v15 = vadd.bf16 %v871_v39, %v3962_v61 }
  0xf4   : >> { %v390_v27 = vsub.bf16 %v358_v37, %v388_v20  ;;  %vm4101_vm3 = vcmp.ne.s16.totalorder %v3179_v46, 0  ;;  %v3184_v37 = vcombine.high %v426_v23, %v426_v23  ;;  %vm4121_vm7 = vcmp.ne.s16.totalorder %v3180_v11, 0 }
  0xf5   : >> { %v4092_v34 = vpop.permute.xlu0 %824  ;;  %v4106_v19 = vpop.permute.xlu1 %826  ;;  %v895_v46 = vmul.bf16 %v4075_v13, %v3962_v61  ;;  %v377_v36 = vadd.bf16 %v375_v50, %v373_v56  ;;  %vm4133_vm8 = vmand %vm400_vm11, %vm4101_vm3  ;;  %vm4137_vm9 = vcmp.ne.s16.totalorder %v3183_v52, 0  ;;  %vm4145_vm12 = vcmp.ne.s16.totalorder %v3192_v54, 0 }
  0xf6   : >> { %vm444_vm15 = vcmp.eq.bf16.partialorder %v390_v27, 1065369472  ;;  %v893_v27 = vadd.bf16 %v891_v25, %v889_v43  ;;  %vm4149_vm13 = vcmp.ne.s16.totalorder %v3195_v17, 0  ;;  %vm4153_vm11 = vcmp.ne.s16.totalorder %v3184_v37, 0  ;;  %vm4169_vm0 = vmand %vm401_vm14, %vm4121_vm7 }
  0xf7   : >> { %v446_v63 = vsel %vm444_vm15, 65537, %v6903_v29  ;;  %v875_v43 = vadd.bf16 %v873_v15, %v4075_v13  ;;  %v899_v32 = vmul.bf16 %v4075_v13, %v4106_v19  ;;  %v381_v17 = vadd.bf16 %v379_v6, %v377_v36  ;;  %vm440_vm10 = vmand %vm4133_vm8, %vm4137_vm9 }
  0xf8   : >> { %v3187_v40 = vcombine.low %v446_v63, %v446_v63  ;;  %v3188_v20 = vcombine.high %v446_v63, %v446_v63  ;;  %v896_v52 = vadd.bf16 %v894_v60, %v892_v28  ;;  %v897_v59 = vadd.bf16 %v895_v46, %v893_v27  ;;  %vm441_vm8 = vmand %vm4169_vm0, %vm4153_vm11 }
  0xf9   : >> { %v324_v16 = vpop.permute.xlu0 %323  ;;  %v844_v63 = vpop.permute.xlu1 %843  ;;  %vm4183_vm14 = vcmp.ne.s16.totalorder %v3196_v35, 0  ;;  %v877_v15 = vadd.bf16 %v875_v43, %v4106_v19  ;;  %v876_v13 = vadd.bf16 %v874_v49, %v4092_v34  ;;  %v7032_v28 = vmov 0 }
  0xfa   : >> { %v359_v23 = vadd.bf16 %v357_v2, %v324_v16  ;;  %vm4157_vm15 = vcmp.ne.s16.totalorder %v3187_v40, 0  ;;  %v383_v50 = vmul.bf16 %v324_v16, %v4067_v1  ;;  %vm4178_vm3 = vcmp.ne.s16.totalorder %v3188_v20, 0 }
  0xfb   : >> { %v387_v37 = vmul.bf16 %v324_v16, %v3916_v41  ;;  %vm4189_vm7 = vmand %vm440_vm10, %vm4157_vm15  ;;  %v898_v41 = vmul.bf16 %v4041_v3, %v4092_v34  ;;  %v879_v27 = vadd.bf16 %v877_v15, %v844_v63  ;;  %v901_v36 = vadd.bf16 %v899_v32, %v897_v59 }
  0xfc   : >> { %vm405_vm1 = vcmp.ge.bf16.partialorder %v359_v23, 1073758208  ;;  %vm425_vm2 = vcmp.le.bf16.partialorder %v359_v23, 1086341312  ;;  %v385_v60 = vadd.bf16 %v383_v50, %v381_v17  ;;  %v903_v33 = vmul.bf16 %v844_v63, %v4106_v19  ;;  %vm480_vm0 = vmand %vm4189_vm7, %vm4114_vm6 }
  0xfd   : >> { %v407_v40 = vsel %vm405_vm1, 65537, %v6903_v29  ;;  %v427_v6 = vsel %vm425_vm2, 65537, %v6903_v29  ;;  %vm4205_vm1 = vmand %vm441_vm8, %vm4178_vm3  ;;  %v907_v54 = vmul.bf16 %v844_v63, %v3942_v53  ;;  %vm925_vm3 = vcmp.ge.bf16.partialorder %v879_v27, 1073758208  ;;  %v842_v17 = vpop.permute.xlu0 %841 }
  0xfe   : >> { %v3181_v35 = vcombine.low %v407_v40, %v407_v40  ;;  %v3182_v16 = vcombine.high %v407_v40, %v407_v40  ;;  %v3185_v10 = vcombine.low %v427_v6, %v427_v6  ;;  %v389_v46 = vadd.bf16 %v387_v37, %v385_v60 }
  0xff   : >> { %v3186_v25 = vcombine.high %v427_v6, %v427_v6  ;;  %v905_v32 = vadd.bf16 %v903_v33, %v901_v36  ;;  %v927_v50 = vsel %vm925_vm3, 65537, %v6903_v29  ;;  %vm945_vm8 = vcmp.le.bf16.partialorder %v879_v27, 1086341312  ;;  %vm4241_vm3 = vmand %vm480_vm0, %vm4149_vm13 }
 0x100   : >> { %vm4215_vm10 = vcmp.ne.s16.totalorder %v3181_v35, 0  ;;  %vm4219_vm11 = vcmp.ne.s16.totalorder %v3182_v16, 0  ;;  %vm4223_vm15 = vcmp.ne.s16.totalorder %v3185_v10, 0  ;;  %v391_v43 = vsub.bf16 %v359_v23, %v389_v46 }
 0x101   : >> { %v900_v59 = vadd.bf16 %v898_v41, %v896_v52  ;;  %v909_v37 = vadd.bf16 %v907_v54, %v905_v32  ;;  %v3229_v60 = vcombine.low %v927_v50, %v927_v50  ;;  %v3230_v23 = vcombine.high %v927_v50, %v927_v50  ;;  %vm4249_vm2 = vmand %vm7029_vm5, %vm4215_vm10 }
 0x102   : >> { %vm445_vm9 = vcmp.eq.bf16.partialorder %v391_v43, 1065369472  ;;  %v7027_v53 = vmov 0  ;;  %v947_v56 = vsel %vm945_vm8, 65537, %v6903_v29  ;;  %v878_v63 = vadd.bf16 %v876_v13, %v842_v17 }
 0x103   : >> { %v7028_v53 = vsel %vm4241_vm3, 4294967295, %v7027_v53  ;;  %v447_v52 = vsel %vm445_vm9, 65537, %v6903_v29  ;;  %v902_v42 = vmul.bf16 %v842_v17, %v4092_v34  ;;  %vm4259_vm6 = vcmp.ne.s16.totalorder %v3194_v48, 0 }
 0x104   : >> { %v7033_v28 = vsel %vm4259_vm6, 4294967295, %v7032_v28  ;;  %vm7034_vm5 = vcmp.gt.bf16.partialorder %v3857_v5, 1056980736  ;;  %vm4271_vm7 = vcmp.ne.s16.totalorder %v3186_v25, 0  ;;  %v3189_v15 = vcombine.low %v447_v52, %v447_v52 }
 0x105   : >> { %vm4267_vm13 = vmand %vm7034_vm5, %vm4219_vm11  ;;  %v3190_v41 = vcombine.high %v447_v52, %v447_v52  ;;  %v911_v35 = vsub.bf16 %v879_v27, %v909_v37  ;;  %vm4276_vm0 = vcmp.ne.s16.totalorder %v3229_v60, 0  ;;  %v3233_v16 = vcombine.low %v947_v56, %v947_v56 }
 0x106   : >> { %v3234_v10 = vcombine.high %v947_v56, %v947_v56  ;;  %v904_v46 = vadd.bf16 %v902_v42, %v900_v59  ;;  %vm7041_vm11 = vmand %vm4205_vm1, %vm4145_vm12  ;;  %v7042_v27 = vmov 0  ;;  %v399_v36 = vmul.bf16 %v397_v45, %v4067_v1 }
 0x107   : >> { %vm4288_vm8 = vmand %vm7041_vm11, %vm4183_vm14  ;;  %vm939_vm10 = vcmp.ne.s16.totalorder %v3230_v23, 0  ;;  %vm965_vm9 = vcmp.eq.bf16.partialorder %v911_v35, 1065369472  ;;  %v906_v2 = vmul.bf16 %v842_v17, %v3939_v51  ;;  %vm4305_vm14 = vcmp.ne.s16.totalorder %v3189_v15, 0 }
 0x108   : >> { %v7043_v27 = vsel %vm4288_vm8, 4294967295, %v7042_v27  ;;  %vm459_vm1 = vcmp.ne.s16.totalorder %v3190_v41, 0  ;;  %v967_v44 = vsel %vm965_vm9, 65537, %v6903_v29  ;;  %vm924_vm11 = vcmp.ge.bf16.partialorder %v878_v63, 1073758208 }
 0x109   : >> { %vm7046_vm5 = vcmp.gt.bf16.partialorder %v3894_v26, 1056980736  ;;  %vm4318_vm6 = vcmp.ne.s16.totalorder %v3233_v16, 0  ;;  %v3238_v45 = vcombine.high %v967_v44, %v967_v44  ;;  %v908_v1 = vadd.bf16 %v906_v2, %v904_v46 }
 0x10a   : >> { %vm4314_vm4 = vmand %vm7046_vm5, %vm4276_vm0  ;;  %v926_v20 = vsel %vm924_vm11, 65537, %v6903_v29  ;;  %vm7051_vm12 = vcmp.gt.bf16.partialorder %v3887_v18, 1056980736  ;;  %vm4329_vm8 = vcmp.ne.s16.totalorder %v3234_v10, 0  ;;  %vm944_vm0 = vcmp.le.bf16.partialorder %v878_v63, 1086341312 }
 0x10b   : >> { %v7048_v62 = vsel %vm4314_vm4, 4294967295, %v7047_v62  ;;  %vm4325_vm9 = vmand %vm7051_vm12, %vm939_vm10  ;;  %v3227_v39 = vcombine.low %v926_v20, %v926_v20  ;;  %v3228_v25 = vcombine.high %v926_v20, %v926_v20  ;;  %v7057_v43 = vmov 0 }
 0x10c   : >> { %vm7056_vm5 = vmand %vm4267_vm13, %vm4271_vm7  ;;  %v3237_v32 = vcombine.low %v967_v44, %v967_v44  ;;  %v910_v54 = vsub.bf16 %v878_v63, %v908_v1  ;;  %v946_v17 = vsel %vm944_vm0, 65537, %v6903_v29  ;;  %v4346_v50 = vsel %vm4241_vm3, 0, %v3863_v7 }
 0x10d   : >> { %vm4338_vm4 = vmand %vm7056_vm5, %vm459_vm1  ;;  %v918_v13 = vmul.bf16 %v916_v47, %v4092_v34  ;;  %v7060_v59 = vmov 0  ;;  %vm4363_vm10 = vcmp.ne.s16.totalorder %v3238_v45, 0  ;;  %v3231_v7 = vcombine.low %v946_v17, %v946_v17 }
 0x10e   : >> { %v7058_v43 = vsel %vm4338_vm4, 4294967295, %v7057_v43  ;;  %vm7059_vm13 = vmand %vm4249_vm2, %vm4223_vm15  ;;  %v3232_v60 = vcombine.high %v946_v17, %v946_v17  ;;  %vm7064_vm1 = vnez %v7048_v62  ;;  %vm4371_vm0 = vcmp.ne.s16.totalorder %v3227_v39, 0 }
 0x10f   : >> { %vm4359_vm7 = vmand %vm7059_vm13, %vm4305_vm14  ;;  %vm964_vm2 = vcmp.eq.bf16.partialorder %v910_v54, 1065369472  ;;  %vm7067_vm15 = vnez %v7043_v27  ;;  %v919_v47 = vmul.bf16 %v917_v14, %v4106_v19  ;;  %vm937_vm11 = vcmp.ne.s16.totalorder %v3228_v25, 0 }
 0x110   : >> { %v7061_v59 = vsel %vm4359_vm7, 4294967295, %v7060_v59  ;;  %v4378_v0 = vsel %vm7067_vm15, 0, %v3865_v8  ;;  %vm963_vm13 = vmand %vm4325_vm9, %vm4329_vm8  ;;  %v966_v34 = vsel %vm964_vm2, 65537, %v6903_v29  ;;  %vm978_vm12 = vcmp.ne.s16.totalorder %v3237_v32, 0 }
 0x111   : >> { %v4395_v8 = vcombine.low %v4346_v50, %v4378_v0  ;;  %vm4399_vm3 = vmand %vm963_vm13, %vm4363_vm10  ;;  %vm4403_vm5 = vcmp.ne.s16.totalorder %v3231_v7, 0  ;;  %v3235_v14 = vcombine.low %v966_v34, %v966_v34  ;;  %v3236_v19 = vcombine.high %v966_v34, %v966_v34 }
 0x112   : >> { %vm7073_vm8 = vcmp.eq.bf16.partialorder %v399_v36, 0  ;;  %vm1004_vm9 = vcmp.eq.bf16.partialorder %v918_v13, 0  ;;  %vm7074_vm2 = vcmp.gt.bf16.partialorder %v3867_v9, 1056980736  ;;  %vm4417_vm10 = vcmp.ne.s16.totalorder %v3232_v60, 0 }
 0x113   : >> { %v487_v11 = vsel %vm7073_vm8, 65537, %v6903_v29  ;;  %vm4413_vm15 = vmand %vm7074_vm2, %vm4371_vm0  ;;  %556 = vrot.lane.b32.xlu0 %v4395_v8, %s3656_s20  ;;  %v3239_v52 = vcombine.low %v4031_v55, %v4031_v55  ;;  %vm7079_vm13 = vcmp.gt.bf16.partialorder %v3875_v12, 1056980736  ;;  %vm976_vm0 = vcmp.ne.s16.totalorder %v3235_v14, 0 }
 0x114   : >> { %vm4427_vm8 = vmand %vm7079_vm13, %vm937_vm11  ;;  %v3193_v63 = vcombine.low %v4007_v30, %v4007_v30  ;;  %vm977_vm13 = vcmp.ne.s16.totalorder %v3236_v19, 0  ;;  %v3197_v40 = vcombine.low %v487_v11, %v487_v11  ;;  %v1006_v6 = vsel %vm1004_vm9, 65537, %v6903_v29 }
 0x115   : >> { %vm7082_vm2 = vmand %vm7064_vm1, %vm4318_vm6  ;;  %vm1005_vm4 = vcmp.eq.bf16.partialorder %v919_v47, 0  ;;  %vm4450_vm7 = vcmp.ne.s16.totalorder %v3242_v21, 0  ;;  %v3198_v15 = vcombine.high %v487_v11, %v487_v11  ;;  %v3240_v21 = vcombine.high %v4031_v55, %v4031_v55 }
 0x116   : >> { %vm4438_vm14 = vmand %vm7082_vm2, %vm978_vm12  ;;  %v3243_v16 = vcombine.low %v1006_v6, %v1006_v6  ;;  %v1007_v10 = vsel %vm1005_vm4, 65537, %v6903_v29  ;;  %v3244_v46 = vcombine.high %v1006_v6, %v1006_v6  ;;  %v3241_v55 = vcombine.low %v4062_v57, %v4062_v57 }
 0x117   : >> { %vm960_vm11 = vmand %vm4413_vm15, %vm4403_vm5  ;;  %vm4468_vm15 = vcmp.ne.s16.totalorder %v3239_v52, 0  ;;  %v7094_v36 = vmov 0  ;;  %v3245_v2 = vcombine.low %v1007_v10, %v1007_v10  ;;  %vm7096_vm4 = vnez %v7058_v43 }
 0x118   : >> { %vm961_vm6 = vmand %vm4427_vm8, %vm4417_vm10  ;;  %vm478_vm10 = vcmp.ne.s16.totalorder %v3193_v63, 0  ;;  %vm498_vm8 = vcmp.ne.s16.totalorder %v3197_v40, 0  ;;  %v3246_v57 = vcombine.high %v1007_v10, %v1007_v10  ;;  %v7104_v51 = vmov 0 }
 0x119   : >> { %vm4462_vm1 = vmand %vm960_vm11, %vm976_vm0  ;;  %vm7093_vm0 = vnez %v7061_v59  ;;  %vm499_vm11 = vcmp.ne.s16.totalorder %v3198_v15, 0  ;;  %v7106_v20 = vmov 0  ;;  %v525_v25 = vshrl.u32 %v4395_v8, 16 }
 0x11a   : >> { %vm4472_vm5 = vmand %vm961_vm6, %vm977_vm13  ;;  %vm7097_vm6 = vnez %v7033_v28  ;;  %v528_v54 = vshll.u32 %v4395_v8, 16  ;;  %v3202_v58 = vcombine.low %v4346_v50, %v4346_v50 }
 0x11b   : >> { %vm482_vm2 = vmand %vm7093_vm0, %vm478_vm10  ;;  %vm997_vm10 = vcmp.ne.s16.totalorder %v3240_v21, 0 }
 0x11c   : >> { %vm4485_vm13 = vmand %vm482_vm2, %vm498_vm8  ;;  %vm1016_vm8 = vcmp.ne.s16.totalorder %v3243_v16, 0  ;;  %v542_v7 = vrot.slane %v528_v54, 1  ;;  %v551_v23 = vshll.u32 %v3202_v58, 16 }
 0x11d   : >> { %v7095_v36 = vsel %vm4485_vm13, 4294967295, %v7094_v36  ;;  %vm7098_vm12 = vmand %vm7096_vm4, %vm7097_vm6  ;;  %v4501_v44 = vsel %vm4485_vm13, 0, %v3855_v4  ;;  %v7102_v4 = vmov 0  ;;  %vm1018_vm6 = vcmp.ne.s16.totalorder %v3245_v2, 0 }
 0x11e   : >> { %vm4494_vm9 = vmand %vm7098_vm12, %vm499_vm11  ;;  %vm1017_vm12 = vcmp.ne.s16.totalorder %v3244_v46, 0  ;;  %v543_v11 = vor.u32 %v542_v7, %v525_v25  ;;  %v553_v41 = vrot.slane %v551_v23, 1 }
 0x11f   : >> { %v7100_v22 = vsel %vm4494_vm9, 4294967295, %v7099_v22  ;;  %v4506_v62 = vsel %vm4494_vm9, 0, %v3857_v5  ;;  %vm1001_vm0 = vmand %vm4472_vm5, %vm997_vm10  ;;  %vm998_vm5 = vcmp.ne.s16.totalorder %v3241_v55, 0 }
 0x120   : >> { %v3201_v28 = vcombine.low %v4501_v44, %v4506_v62  ;;  %vm7101_vm2 = vmand %vm4462_vm1, %vm4468_vm15  ;;  %vm1019_vm15 = vcmp.ne.s16.totalorder %v3246_v57, 0 }
 0x121   : >> { %vm4517_vm11 = vmand %vm7101_vm2, %vm1016_vm8 }
 0x122   : >> { %v7103_v4 = vsel %vm4517_vm11, 4294967295, %v7102_v4  ;;  %vm4521_vm4 = vmand %vm1001_vm0, %vm1017_vm12  ;;  %v4528_v5 = vsel %vm4517_vm11, 0, %v3867_v9  ;;  %558 = vrot.lane.b32.xlu0 %v3201_v28, %s3656_s20  ;;  %v3199_v9 = vcombine.low %v4506_v62, %v4506_v62  ;;  %v532_v32 = vshrl.u32 %v3201_v28, 16 }
 0x123   : >> { %v7105_v51 = vsel %vm4521_vm4, 4294967295, %v7104_v51  ;;  %v4534_v45 = vsel %vm4521_vm4, 0, %v3875_v12  ;;  %vm1002_vm1 = vmand %vm4438_vm14, %vm998_vm5  ;;  %v7109_v12 = vmov 0  ;;  %v535_v13 = vshll.u32 %v3201_v28, 16 }
 0x124   : >> { %v3248_v1 = vcombine.low %v4528_v5, %v4534_v45  ;;  %vm4540_vm10 = vmand %vm1002_vm1, %vm1018_vm6  ;;  %v512_v43 = vshrl.u32 %v3199_v9, 16  ;;  %v534_v59 = vrot.slane %v532_v32, 7  ;;  %v3250_v49 = vcombine.low %v4528_v5, %v4528_v5 }
 0x125   : >> { %v7107_v20 = vsel %vm4540_vm10, 4294967295, %v7106_v20  ;;  %vm7108_vm8 = vmand %vm4399_vm3, %vm4450_vm7  ;;  %v4558_v33 = vsel %vm4540_vm10, 0, %v3894_v26  ;;  %v527_v26 = vrot.slane %v525_v25, 7  ;;  %vm7112_vm3 = vnez %v6988_v31 }
 0x126   : >> { %vm4551_vm0 = vmand %vm7108_vm8, %vm1019_vm15  ;;  %1076 = vrot.lane.b32.xlu1 %v3248_v1, %s3656_s20  ;;  %v1045_v17 = vshrl.u32 %v3248_v1, 16  ;;  %v1048_v34 = vshll.u32 %v3248_v1, 16  ;;  %v537_v24 = vor.u32 %v535_v13, %v534_v59  ;;  %vm7113_vm7 = vsmask.f32 7424 }
 0x127   : >> { %v7110_v12 = vsel %vm4551_vm0, 4294967295, %v7109_v12  ;;  %v4564_v3 = vsel %vm4551_vm0, 0, %v3887_v18  ;;  %v514_v18 = vrot.slane %v512_v43, 3  ;;  %v530_v60 = vor.u32 %v528_v54, %v527_v26  ;;  %vm7116_vm2 = vmmov %vm7113_vm7 }
 0x128   : >> { %7111 = vst [vmem:[#allocation15_spill] sm:$0xff] %v7110_v12  ;;  %v3249_v39 = vcombine.low %v4558_v33, %v4564_v3  ;;  %v3247_v37 = vcombine.low %v4564_v3, %v4564_v3  ;;  %v1047_v47 = vrot.slane %v1045_v17, 7  ;;  %v1062_v42 = vrot.slane %v1048_v34, 1 }
 0x129   : >> { %v4582_v61 = vsel %vm7112_vm3, %v514_v18, %v530_v60  ;;  %vm7114_vm14 = vsmask.f32 256  ;;  %v1071_v16 = vshll.u32 %v3250_v49, 16  ;;  %vm7115_vm12 = vnez %v6991_v38 }
 0x12a   : >> { %1078 = vrot.lane.b32.xlu0 %v3249_v39, %s3656_s20  ;;  %564 = vrot.lane.b32.xlu1 %v4395_v8, %s3657_s17  ;;  %v544_v8 = vrot.slane %v535_v13, 1  ;;  %v1052_v14 = vshrl.u32 %v3249_v39, 16  ;;  %v1032_v19 = vshrl.u32 %v3247_v37, 16  ;;  %v1050_v56 = vor.u32 %v1048_v34, %v1047_v47  ;;  %vm7117_vm5 = vmmov %vm7114_vm14 }
 0x12b   : >> { %v1055_v63 = vshll.u32 %v3249_v39, 16  ;;  %v4594_v40 = vsel %vm7114_vm14, %v527_v26, %v537_v24  ;;  %v1063_v35 = vor.u32 %v1062_v42, %v1045_v17  ;;  %v1073_v57 = vrot.slane %v1071_v16, 1 }
 0x12c   : >> { %v4589_v52 = vsel %vm7113_vm7, %v543_v11, %v544_v8  ;;  %v546_v6 = vor.u32 %v544_v8, %v532_v32  ;;  %v1054_v30 = vrot.slane %v1052_v14, 7  ;;  %v1034_v15 = vrot.slane %v1032_v19, 3 }
 0x12d   : >> { %v1064_v48 = vrot.slane %v1055_v63, 1  ;;  %v656_v8 = vmul.bf16 %v4589_v52, %v4582_v61  ;;  %v7118_v12 = vmov 0  }
 0x12e   : >> { %566 = vrot.lane.b32.xlu0 %v3201_v28, %s3657_s17  ;;  %1086 = vrot.lane.b32.xlu1 %v3249_v39, %s3657_s17  ;;  %v4600_v21 = vsel %vm7112_vm3, %v1034_v15, %v1050_v56  ;;  %v4606_v10 = vsel %vm7115_vm12, %v546_v6, %v553_v41  ;;  %v1057_v46 = vor.u32 %v1055_v63, %v1054_v30 }
 0x12f   : >> { %v4611_v55 = vsel %vm7116_vm2, %v1063_v35, %v1064_v48  ;;  %v1066_v2 = vor.u32 %v1064_v48, %v1052_v14 }
 0x130   : >> { %v4616_v28 = vsel %vm7117_vm5, %v1047_v47, %v1057_v46  ;;  %v1176_v14 = vmul.bf16 %v4611_v55, %v4600_v21 }
 0x132   : >> { %1084 = vrot.lane.b32.xlu0 %v3248_v1, %s3657_s17  ;;  %573 = vrot.lane.b32.xlu1 %v4582_v61, %s3656_s20  ;;  %v4622_v1 = vsel %vm7115_vm12, %v1066_v2, %v1073_v57 }
 0x136   : >> { %590 = vrot.lane.b32.xlu0 %v4589_v52, %s3656_s20  ;;  %575 = vrot.lane.b32.xlu1 %v4594_v40, %s3656_s20 }
 0x13a   : >> { %1093 = vrot.lane.b32.xlu0 %v4600_v21, %s3656_s20  ;;  %592 = vrot.lane.b32.xlu1 %v4606_v10, %s3656_s20 }
 0x13e   : >> { %1110 = vrot.lane.b32.xlu0 %v4611_v55, %s3656_s20  ;;  %1095 = vrot.lane.b32.xlu1 %v4616_v28, %s3656_s20 }
 0x142   : >> { %1112 = vrot.lane.b32.xlu0 %v4622_v1, %s3656_s20  ;;  %598 = vrot.lane.b32.xlu1 %v4589_v52, %s3657_s17 }
 0x146   : >> { %600 = vrot.lane.b32.xlu0 %v4606_v10, %s3657_s17  ;;  %1118 = vrot.lane.b32.xlu1 %v4611_v55, %s3657_s17 }
 0x14a   : >> { %583 = vrot.lane.b32.xlu0 %v4594_v40, %s3657_s17  ;;  %581 = vrot.lane.b32.xlu1 %v4582_v61, %s3657_s17 }
 0x14e   : >> { %1101 = vrot.lane.b32.xlu0 %v4600_v21, %s3657_s17  ;;  %1120 = vrot.lane.b32.xlu1 %v4622_v1, %s3657_s17 }
 0x152   : >> { %1103 = vrot.lane.b32.xlu1 %v4616_v28, %s3657_s17 }
 0x185   : >> { %v557_v9 = vpop.permute.xlu0 %556 }
 0x186   : >> { %v652_v59 = vmul.bf16 %v557_v9, %v4582_v61 }
 0x194   : >> { %v559_v39 = vpop.permute.xlu0 %558 }
 0x195   : >> { %v653_v7 = vmul.bf16 %v559_v39, %v4594_v40 }
 0x198   : >> { %v1077_v25 = vpop.permute.xlu1 %1076 }
 0x199   : >> { %v1172_v11 = vmul.bf16 %v1077_v25, %v4600_v21 }
 0x19c   : >> { %v4642_v43 = vpop.permute.xlu0 %1078  ;;  %v4644_v32 = vpop.permute.xlu1 %564 }
 0x19d   : >> { %v654_v18 = vmul.bf16 %v652_v59, %v4644_v32  ;;  %v1173_v63 = vmul.bf16 %v4642_v43, %v4616_v28 }
 0x19f   : >> { %vm724_vm6 = vcmp.eq.bf16.partialorder %v654_v18, 0 }
 0x1a0   : >> { %v4646_v54 = vpop.permute.xlu0 %566  ;;  %v4648_v26 = vpop.permute.xlu1 %1086  ;;  %v4671_v42 = vsel %vm724_vm6, 65537, %v6903_v29 }
 0x1a1   : >> { %v655_v58 = vmul.bf16 %v653_v7, %v4646_v54 }
 0x1a3   : >> { %vm725_vm1 = vcmp.eq.bf16.partialorder %v655_v58, 0 }
 0x1a4   : >> { %v4650_v17 = vpop.permute.xlu0 %1084  ;;  %v574_v13 = vpop.permute.xlu1 %573 }
 0x1a5   : >> { %v620_v47 = vmul.bf16 %v574_v13, %v4582_v61  ;;  %v606_v23 = vadd.bf16 %v574_v13, %v4582_v61  ;;  %v622_v49 = vmul.bf16 %v574_v13, %v557_v9  ;;  %v4677_v16 = vmul.bf16 %v1172_v11, %v4650_v17 }
 0x1a6   : >> { %v4686_v11 = vmul.bf16 %v1173_v63, %v4648_v26 }
 0x1a7   : >> { %v624_v30 = vadd.bf16 %v622_v49, %v620_v47  ;;  %v608_v18 = vadd.bf16 %v606_v23, %v557_v9  ;;  %v4681_v47 = vmul.bf16 %v656_v8, %v4644_v32  ;;  %vm1244_vm15 = vcmp.eq.bf16.partialorder %v4677_v16, 0 }
 0x1a8   : >> { %v4654_v37 = vpop.permute.xlu0 %590  ;;  %v576_v60 = vpop.permute.xlu1 %575 }
 0x1a9   : >> { %v607_v41 = vadd.bf16 %v576_v60, %v4594_v40  ;;  %v621_v35 = vmul.bf16 %v576_v60, %v4594_v40  ;;  %v623_v46 = vmul.bf16 %v576_v60, %v559_v39  ;;  %v626_v59 = vmul.bf16 %v4654_v37, %v557_v9 }
 0x1aa   : >> { %v4692_v9 = vsel %vm725_vm1, 65537, %v7118_v12  ;;  %v630_v63 = vmul.bf16 %v4654_v37, %v4589_v52 }
 0x1ab   : >> { %v609_v7 = vadd.bf16 %v607_v41, %v559_v39  ;;  %v625_v29 = vadd.bf16 %v623_v46, %v621_v35  ;;  %v628_v60 = vadd.bf16 %v626_v59, %v624_v30  ;;  %v610_v30 = vadd.bf16 %v608_v18, %v4654_v37 }
 0x1ac   : >> { %v1094_v34 = vpop.permute.xlu0 %1093  ;;  %v593_v19 = vpop.permute.xlu1 %592 }
 0x1ad   : >> { %v1126_v56 = vadd.bf16 %v1094_v34, %v4600_v21  ;;  %v1140_v6 = vmul.bf16 %v1094_v34, %v4600_v21  ;;  %v1142_v15 = vmul.bf16 %v1094_v34, %v1077_v25  ;;  %v627_v24 = vmul.bf16 %v593_v19, %v559_v39 }
 0x1ae   : >> { %v4695_v39 = vmul.bf16 %v1176_v14, %v4650_v17  ;;  %v612_v18 = vadd.bf16 %v610_v30, %v4589_v52 }
 0x1af   : >> { %v1128_v2 = vadd.bf16 %v1126_v56, %v1077_v25  ;;  %v1144_v49 = vadd.bf16 %v1142_v15, %v1140_v6  ;;  %v629_v23 = vadd.bf16 %v627_v24, %v625_v29  ;;  %v631_v15 = vmul.bf16 %v593_v19, %v4606_v10 }
 0x1b0   : >> { %v1111_v48 = vpop.permute.xlu0 %1110  ;;  %v1096_v13 = vpop.permute.xlu1 %1095 }
 0x1b1   : >> { %v1146_v57 = vmul.bf16 %v1111_v48, %v1077_v25  ;;  %v1130_v56 = vadd.bf16 %v1128_v2, %v1111_v48  ;;  %v611_v25 = vadd.bf16 %v609_v7, %v593_v19  ;;  %v1150_v6 = vmul.bf16 %v1111_v48, %v4611_v55 }
 0x1b2   : >> { %v1127_v58 = vadd.bf16 %v1096_v13, %v4616_v28  ;;  %v1141_v29 = vmul.bf16 %v1096_v13, %v4616_v28  ;;  %v1143_v24 = vmul.bf16 %v1096_v13, %v4642_v43  ;;  %v632_v2 = vadd.bf16 %v630_v63, %v628_v60 }
 0x1b3   : >> { %v1148_v8 = vadd.bf16 %v1146_v57, %v1144_v49  ;;  %v613_v35 = vadd.bf16 %v611_v25, %v4606_v10  ;;  %v1132_v57 = vadd.bf16 %v1130_v56, %v4611_v55  ;;  %v633_v48 = vadd.bf16 %v631_v15, %v629_v23 }
 0x1b4   : >> { %v4688_v38 = vpop.permute.xlu0 %1112  ;;  %v599_v41 = vpop.permute.xlu1 %598 }
 0x1b5   : >> { %v634_v14 = vmul.bf16 %v599_v41, %v4589_v52  ;;  %v1152_v59 = vadd.bf16 %v1150_v6, %v1148_v8  ;;  %v1147_v31 = vmul.bf16 %v4688_v38, %v4642_v43  ;;  %v1129_v8 = vadd.bf16 %v1127_v58, %v4642_v43 }
 0x1b6   : >> { %v614_v23 = vadd.bf16 %v612_v18, %v599_v41  ;;  %v638_v63 = vmul.bf16 %v599_v41, %v4644_v32  ;;  %v1145_v52 = vadd.bf16 %v1143_v24, %v1141_v29 }
 0x1b7   : >> { %v636_v49 = vadd.bf16 %v634_v14, %v632_v2  ;;  %v1131_v18 = vadd.bf16 %v1129_v8, %v4688_v38 }
 0x1b8   : >> { %v601_v46 = vpop.permute.xlu0 %600  ;;  %v1119_v19 = vpop.permute.xlu1 %1118  ;;  %v616_v24 = vadd.bf16 %v614_v23, %v4644_v32 }
 0x1b9   : >> { %v615_v7 = vadd.bf16 %v613_v35, %v601_v46  ;;  %v635_v37 = vmul.bf16 %v601_v46, %v4606_v10  ;;  %v1134_v25 = vadd.bf16 %v1132_v57, %v1119_v19  ;;  %v1154_v34 = vmul.bf16 %v1119_v19, %v4611_v55 }
 0x1ba   : >> { %v639_v60 = vmul.bf16 %v601_v46, %v4646_v54  ;;  %v640_v2 = vadd.bf16 %v638_v63, %v636_v49  ;;  %v1158_v57 = vmul.bf16 %v1119_v19, %v4650_v17 }
 0x1bb   : >> { %v637_v13 = vadd.bf16 %v635_v37, %v633_v48  ;;  %v617_v56 = vadd.bf16 %v615_v7, %v4646_v54  ;;  %v1156_v15 = vadd.bf16 %v1154_v34, %v1152_v59  ;;  %v1136_v46 = vadd.bf16 %v1134_v25, %v4650_v17 }
 0x1bc   : >> { %v584_v6 = vpop.permute.xlu0 %583  ;;  %v582_v14 = vpop.permute.xlu1 %581  ;;  %v4726_v34 = vsel %vm1244_vm15, 65537, %v7118_v12  ;;  %v1149_v59 = vadd.bf16 %v1147_v31, %v1145_v52 }
 0x1bd   : >> { %v641_v30 = vadd.bf16 %v639_v60, %v637_v13  ;;  %v619_v35 = vadd.bf16 %v617_v56, %v584_v6  ;;  %v643_v55 = vmul.bf16 %v584_v6, %v4646_v54  ;;  %v642_v48 = vmul.bf16 %v582_v14, %v4644_v32 }
 0x1be   : >> { %v647_v43 = vmul.bf16 %v584_v6, %v4594_v40  ;;  %v1160_v58 = vadd.bf16 %v1158_v57, %v1156_v15  ;;  %v618_v60 = vadd.bf16 %v616_v24, %v582_v14  ;;  %v646_v6 = vmul.bf16 %v582_v14, %v4582_v61 }
 0x1bf   : >> { %v645_v7 = vadd.bf16 %v643_v55, %v641_v30  ;;  %vm665_vm8 = vcmp.ge.bf16.partialorder %v619_v35, 1073758208  ;;  %vm685_vm7 = vcmp.le.bf16.partialorder %v619_v35, 1086341312  ;;  %v644_v19 = vadd.bf16 %v642_v48, %v640_v2 }
 0x1c0   : >> { %v667_v41 = vsel %vm665_vm8, 65537, %v7118_v12  ;;  %v1102_v29 = vpop.permute.xlu0 %1101  ;;  %v687_v49 = vsel %vm685_vm7, 65537, %v7118_v12  ;;  %v3263_v52 = vcombine.low %v4726_v34, %v4726_v34  ;;  %v1151_v61 = vmul.bf16 %v4688_v38, %v4622_v1  ;;  %v1121_v14 = vpop.permute.xlu1 %1120 }
 0x1c1   : >> { %v649_v37 = vadd.bf16 %v647_v43, %v645_v7  ;;  %v1138_v25 = vadd.bf16 %v1136_v46, %v1102_v29  ;;  %v1162_v13 = vmul.bf16 %v1102_v29, %v4650_v17  ;;  %v3205_v56 = vcombine.low %v667_v41, %v667_v41 }
 0x1c2   : >> { %v3206_v63 = vcombine.high %v667_v41, %v667_v41  ;;  %v1166_v32 = vmul.bf16 %v1102_v29, %v4600_v21  ;;  %v3209_v8 = vcombine.low %v687_v49, %v687_v49  ;;  %v3210_v23 = vcombine.high %v687_v49, %v687_v49 }
 0x1c3   : >> { %v651_v16 = vsub.bf16 %v619_v35, %v649_v37  ;;  %v1164_v31 = vadd.bf16 %v1162_v13, %v1160_v58  ;;  %vm1184_vm5 = vcmp.ge.bf16.partialorder %v1138_v25, 1073758208  ;;  %vm1204_vm6 = vcmp.le.bf16.partialorder %v1138_v25, 1086341312 }
 0x1c4   : >> { %v1186_v17 = vsel %vm1184_vm5, 65537, %v7118_v12  ;;  %v648_v15 = vadd.bf16 %v646_v6, %v644_v19  ;;  %v1206_v35 = vsel %vm1204_vm6, 65537, %v7118_v12  ;;  %vm664_vm7 = vcmp.ge.bf16.partialorder %v618_v60, 1073758208 }
 0x1c5   : >> { %vm705_vm15 = vcmp.eq.bf16.partialorder %v651_v16, 1065369472  ;;  %v1168_v30 = vadd.bf16 %v1166_v32, %v1164_v31  ;;  %v3251_v21 = vcombine.low %v1186_v17, %v1186_v17  ;;  %v1133_v55 = vadd.bf16 %v1131_v18, %v4622_v1  ;;  %v1104_v32 = vpop.permute.xlu1 %1103 }
 0x1c6   : >> { %vm4746_vm1 = vcmp.ne.s16.totalorder %v3205_v56, 0  ;;  %vm4750_vm5 = vcmp.ne.s16.totalorder %v3206_v63, 0  ;;  %v1153_v46 = vadd.bf16 %v1151_v61, %v1149_v59  ;;  %vm4754_vm2 = vcmp.ne.s16.totalorder %v3209_v8, 0 }
 0x1c7   : >> { %v1170_v38 = vsub.bf16 %v1138_v25, %v1168_v30  ;;  %vm4758_vm8 = vcmp.ne.s16.totalorder %v3210_v23, 0  ;;  %v4763_v43 = vsel %vm705_vm15, 65537, %v7118_v12  ;;  %v3252_v41 = vcombine.high %v1186_v17, %v1186_v17 }
 0x1c8   : >> { %v650_v58 = vsub.bf16 %v618_v60, %v648_v15  ;;  %v3255_v29 = vcombine.low %v1206_v35, %v1206_v35  ;;  %v666_v24 = vsel %vm664_vm7, 65537, %v7118_v12  ;;  %vm684_vm12 = vcmp.le.bf16.partialorder %v618_v60, 1086341312 }
 0x1c9   : >> { %vm1224_vm6 = vcmp.eq.bf16.partialorder %v1170_v38, 1065369472  ;;  %vm4768_vm3 = vcmp.ne.s16.totalorder %v3251_v21, 0  ;;  %v686_v19 = vsel %vm684_vm12, 65537, %v7118_v12  ;;  %v1135_v18 = vadd.bf16 %v1133_v55, %v1121_v14 }
 0x1ca   : >> { %v1226_v37 = vsel %vm1224_vm6, 65537, %v7118_v12  ;;  %vm7129_vm15 = vcmp.gt.bf16.partialorder %v4506_v62, 1056980736  ;;  %v3214_v25 = vcombine.high %v4763_v43, %v4763_v43  ;;  %v3256_v13 = vcombine.high %v1206_v35, %v1206_v35 }
 0x1cb   : >> { %vm4778_vm10 = vmand %vm7129_vm15, %vm4750_vm5  ;;  %v3259_v60 = vcombine.low %v1226_v37, %v1226_v37  ;;  %v3203_v16 = vcombine.low %v666_v24, %v666_v24  ;;  %vm7132_vm7 = vcmp.gt.bf16.partialorder %v4501_v44, 1056980736  ;;  %vm4792_vm6 = vcmp.ne.s16.totalorder %v3252_v41, 0 }
 0x1cc   : >> { %vm4788_vm12 = vmand %vm7132_vm7, %vm4746_vm1  ;;  %v3204_v6 = vcombine.high %v666_v24, %v666_v24  ;;  %vm704_vm5 = vcmp.eq.bf16.partialorder %v650_v58, 1065369472  ;;  %v1155_v31 = vmul.bf16 %v1121_v14, %v4622_v1  ;;  %vm7137_vm15 = vcmp.gt.bf16.partialorder %v4528_v5, 1056980736 }
 0x1cd   : >> { %vm4801_vm0 = vmand %vm7137_vm15, %vm4768_vm3  ;;  %vm4805_vm1 = vcmp.ne.s16.totalorder %v3255_v29, 0  ;;  %v3260_v17 = vcombine.high %v1226_v37, %v1226_v37  ;;  %vm4809_vm7 = vcmp.ne.s16.totalorder %v3259_v60, 0  ;;  %v3207_v61 = vcombine.low %v686_v19, %v686_v19 }
 0x1ce   : >> { %v706_v30 = vsel %vm704_vm5, 65537, %v7118_v12  ;;  %v1157_v21 = vadd.bf16 %v1155_v31, %v1153_v46  ;;  %v1159_v35 = vmul.bf16 %v1121_v14, %v4648_v26  ;;  %v1137_v55 = vadd.bf16 %v1135_v18, %v4648_v26  ;;  %vm1220_vm11 = vmand %vm4801_vm0, %vm4805_vm1 }
 0x1cf   : >> { %vm4820_vm3 = vcmp.ne.s16.totalorder %v3214_v25, 0  ;;  %vm7146_vm15 = vcmp.gt.bf16.partialorder %v4534_v45, 1056980736  ;;  %v7147_v57 = vmov 0  ;;  %vm676_vm14 = vcmp.ne.s16.totalorder %v3203_v16, 0  ;;  %vm4852_vm5 = vmand %vm1220_vm11, %vm4809_vm7 }
 0x1d0   : >> { %vm4828_vm4 = vmand %vm7146_vm15, %vm4792_vm6  ;;  %v3208_v38 = vcombine.high %v686_v19, %v686_v19  ;;  %v1163_v46 = vmul.bf16 %v1104_v32, %v4648_v26  ;;  %vm4838_vm9 = vcmp.ne.s16.totalorder %v3204_v6, 0  ;;  %v3211_v41 = vcombine.low %v706_v30, %v706_v30 }
 0x1d1   : >> { %v7148_v57 = vsel %vm4828_vm4, 4294967295, %v7147_v57  ;;  %v1161_v58 = vadd.bf16 %v1159_v35, %v1157_v21  ;;  %v1139_v29 = vadd.bf16 %v1137_v55, %v1104_v32  ;;  %vm4842_vm6 = vcmp.ne.s16.totalorder %v3256_v13, 0 }
 0x1d2   : >> { %vm4846_vm15 = vcmp.ne.s16.totalorder %v3260_v17, 0  ;;  %v7153_v59 = vmov 0  ;;  %v7155_v37 = vmov 0  ;;  %vm4856_vm0 = vcmp.ne.s16.totalorder %v3207_v61, 0 }
 0x1d3   : >> { %v7154_v59 = vsel %vm4846_vm15, 4294967295, %v7153_v59  ;;  %v7156_v37 = vsel %vm4852_vm5, 4294967295, %v7155_v37  ;;  %v3212_v18 = vcombine.high %v706_v30, %v706_v30  ;;  %vm7159_vm1 = vcmp.gt.bf16.partialorder %v4346_v50, 1056980736 }
 0x1d4   : >> { %vm4862_vm13 = vmand %vm7159_vm1, %vm676_vm14  ;;  %v1165_v13 = vadd.bf16 %v1163_v46, %v1161_v58  ;;  %v1167_v60 = vmul.bf16 %v1104_v32, %v4616_v28  ;;  %vm1185_vm15 = vcmp.ge.bf16.partialorder %v1139_v29, 1073758208  ;;  %vm1205_vm4 = vcmp.le.bf16.partialorder %v1139_v29, 1086341312 }
 0x1d5   : >> { %vm7162_vm14 = vmand %vm4778_vm10, %vm4758_vm8  ;;  %v7163_v16 = vmov 0  ;;  %vm7165_vm11 = vcmp.gt.bf16.partialorder %v4378_v0, 1056980736  ;;  %vm4891_vm7 = vcmp.ne.s16.totalorder %v3208_v38, 0  ;;  %v1187_v49 = vsel %vm1185_vm15, 65537, %v7118_v12 }
 0x1d6   : >> { %vm4879_vm1 = vmand %vm7162_vm14, %vm4820_vm3  ;;  %v1207_v7 = vsel %vm1205_vm4, 65537, %v7118_v12  ;;  %vm7170_vm10 = vnez %v7148_v57  ;;  %vm4901_vm3 = vcmp.ne.s16.totalorder %v3211_v41, 0  ;;  %v1169_v32 = vadd.bf16 %v1167_v60, %v1165_v13 }
 0x1d7   : >> { %v7164_v16 = vsel %vm4879_vm1, 4294967295, %v7163_v16  ;;  %vm4887_vm5 = vmand %vm7165_vm11, %vm4838_vm9  ;;  %v3253_v8 = vcombine.low %v1187_v49, %v1187_v49  ;;  %v3254_v23 = vcombine.high %v1187_v49, %v1187_v49  ;;  %vm4908_vm9 = vcmp.ne.s16.totalorder %v3263_v52, 0 }
 0x1d8   : >> { %vm1221_vm8 = vmand %vm7170_vm10, %vm4842_vm6  ;;  %v7173_v17 = vmov 0  ;;  %v3213_v15 = vcombine.low %v4763_v43, %v4763_v43  ;;  %vm7175_vm4 = vnez %v7154_v59  ;;  %v7176_v61 = vmov 0 }
 0x1d9   : >> { %v7174_v17 = vsel %vm4908_vm9, 4294967295, %v7173_v17  ;;  %vm4916_vm6 = vmand %vm1221_vm8, %vm7175_vm4  ;;  %vm4924_vm11 = vcmp.ne.s16.totalorder %v3212_v18, 0  ;;  %v3257_v52 = vcombine.low %v1207_v7, %v1207_v7  ;;  %v1171_v43 = vsub.bf16 %v1139_v29, %v1169_v32 }
 0x1da   : >> { %v7177_v61 = vsel %vm4916_vm6, 4294967295, %v7176_v61  ;;  %vm700_vm15 = vmand %vm4862_vm13, %vm4856_vm0  ;;  %vm1198_vm6 = vcmp.ne.s16.totalorder %v3253_v8, 0  ;;  %v3258_v21 = vcombine.high %v1207_v7, %v1207_v7  ;;  %v1177_v35 = vmul.bf16 %v4622_v1, %v4616_v28 }
 0x1db   : >> { %vm701_vm4 = vmand %vm4887_vm5, %vm4891_vm7  ;;  %v7181_v55 = vmov 0  ;;  %vm1183_vm8 = vcmp.gt.bf16.partialorder %v4564_v3, 1056980736  ;;  %vm1199_vm14 = vcmp.ne.s16.totalorder %v3254_v23, 0  ;;  %v7183_v2 = vmul.bf16 %v4606_v10, %v4594_v40 }
 0x1dc   : >> { %vm4942_vm0 = vmand %vm700_vm15, %vm4901_vm3  ;;  %v3218_v38 = vcombine.high %v4692_v9, %v4692_v9  ;;  %vm7184_vm5 = vcmp.eq.bf16.partialorder %v4686_v11, 0  ;;  %vm1225_vm3 = vcmp.eq.bf16.partialorder %v1171_v43, 1065369472  ;;  %vm7187_vm15 = vcmp.eq.bf16.partialorder %v4695_v39, 0 }
 0x1dd   : >> { %v7182_v55 = vsel %vm4942_vm0, 4294967295, %v7181_v55  ;;  %v659_v57 = vmul.bf16 %v7183_v2, %v4646_v54  ;;  %v4956_v28 = vsel %vm7184_vm5, 65537, %v7118_v12  ;;  %vm4960_vm7 = vmand %vm701_vm4, %vm4924_vm11  ;;  %v1266_v40 = vsel %vm7187_vm15, 65537, %v7118_v12 }
 0x1de   : >> { %vm4967_vm13 = vcmp.ne.s16.totalorder %v3213_v15, 0  ;;  %vm7190_vm9 = vcmp.gt.bf16.partialorder %v4558_v33, 1056980736  ;;  %vm4977_vm5 = vcmp.ne.s16.totalorder %v3257_v52, 0  ;;  %v1227_v46 = vsel %vm1225_vm3, 65537, %v7118_v12  ;;  %vm4989_vm4 = vmand %vm1183_vm8, %vm1199_vm14 }
 0x1df   : >> { %vm4973_vm10 = vmand %vm7190_vm9, %vm1198_vm6  ;;  %v7195_v39 = vcombine.low %v4671_v42, %v4671_v42  ;;  %v7196_v14 = vmov 0  ;;  %vm4993_vm9 = vcmp.ne.s16.totalorder %v3258_v21, 0  ;;  %v3261_v29 = vcombine.low %v1227_v46, %v1227_v46 }
 0x1e0   : >> { %v3262_v24 = vcombine.high %v1227_v46, %v1227_v46  ;;  %vm7202_vm6 = vcmp.eq.bf16.partialorder %v4681_v47, 0  ;;  %v1179_v19 = vmul.bf16 %v1177_v35, %v4648_v26  ;;  %v3264_v18 = vcombine.high %v4726_v34, %v4726_v34  ;;  %vm7203_vm8 = vmand %vm4788_vm12, %vm4754_vm2 }
 0x1e1   : >> { %vm4985_vm11 = vcmp.ne.s16.totalorder %v7195_v39, 0  ;;  %v746_v59 = vsel %vm7202_vm6, 65537, %v7118_v12  ;;  %v3266_v25 = vcombine.high %v4956_v28, %v4956_v28  ;;  %v3267_v13 = vcombine.low %v1266_v40, %v1266_v40  ;;  %vm5016_vm3 = vmand %vm7203_vm8, %vm4967_vm13 }
 0x1e2   : >> { %v7197_v14 = vsel %vm4985_vm11, 4294967295, %v7196_v14  ;;  %vm1222_vm15 = vmand %vm4973_vm10, %vm4977_vm5  ;;  %vm1238_vm6 = vcmp.ne.s16.totalorder %v3261_v29, 0  ;;  %vm1239_vm14 = vcmp.ne.s16.totalorder %v3262_v24, 0  ;;  %vm5024_vm11 = vcmp.ne.s16.totalorder %v3218_v38, 0  ;;  %v7265_v24 = vld [vmem:[#allocation13_spill] sm:$0xff] }
 0x1e3   : >> { %v7206_v47 = vmov 0  ;;  %vm745_vm0 = vcmp.eq.bf16.partialorder %v659_v57, 0  ;;  %v3268_v34 = vcombine.high %v1266_v40, %v1266_v40  ;;  %vm1223_vm2 = vmand %vm4989_vm4, %vm4993_vm9  ;;  %v3216_v48 = vcombine.high %v4671_v42, %v4671_v42  ;;  %v7275_v42 = vld [vmem:[#allocation14_spill] sm:$0xff] }
 0x1e4   : >> { %v7207_v47 = vsel %vm5024_vm11, 4294967295, %v7206_v47  ;;  %vm5038_vm10 = vmand %vm1223_vm2, %vm1239_vm14  ;;  %v3219_v60 = vcombine.low %v746_v59, %v746_v59  ;;  %v3220_v63 = vcombine.high %v746_v59, %v746_v59  ;;  %vm1257_vm13 = vcmp.ne.s16.totalorder %v3264_v18, 0 }
 0x1e5   : >> { %vm5042_vm5 = vmand %vm1222_vm15, %vm1238_vm6  ;;  %v7210_v6 = vmov 0  ;;  %v747_v49 = vsel %vm745_vm0, 65537, %v7118_v12  ;;  %vm5047_vm4 = vcmp.ne.s16.totalorder %v3266_v25, 0  ;;  %vm1265_vm9 = vcmp.eq.bf16.partialorder %v1179_v19, 0 }
 0x1e6   : >> { %v7211_v6 = vsel %vm5042_vm5, 4294967295, %v7210_v6  ;;  %vm1276_vm8 = vcmp.ne.s16.totalorder %v3267_v13, 0  ;;  %vm7214_vm14 = vnez %v7177_v61  ;;  %vm1277_vm12 = vcmp.ne.s16.totalorder %v3268_v34, 0 }
 0x1e7   : >> { %vm1261_vm2 = vmand %vm7214_vm14, %vm1257_vm13  ;;  %vm7215_vm6 = vnez %v7156_v37  ;;  %vm7216_vm5 = vnez %v7174_v17  ;;  %v7218_v7 = vmov 0  ;;  %vm5066_vm1 = vcmp.ne.s16.totalorder %v3216_v48, 0 }
 0x1e8   : >> { %vm7217_vm0 = vmand %vm7215_vm6, %vm7216_vm5  ;;  %v3217_v32 = vcombine.low %v4692_v9, %v4692_v9  ;;  %v7223_v8 = vmov 0  ;;  %vm756_vm5 = vcmp.ne.s16.totalorder %v3219_v60, 0  ;;  %v3221_v23 = vcombine.low %v747_v49, %v747_v49 }
 0x1e9   : >> { %vm5062_vm11 = vmand %vm7217_vm0, %vm1276_vm8  ;;  %v1267_v17 = vsel %vm1265_vm9, 65537, %v7118_v12  ;;  %vm757_vm8 = vcmp.ne.s16.totalorder %v3220_v63, 0  ;;  %v3222_v9 = vcombine.high %v747_v49, %v747_v49  ;;  %vm7226_vm14 = vnez %v7182_v55 }
 0x1ea   : >> { %v7219_v7 = vsel %vm5062_vm11, 4294967295, %v7218_v7  ;;  %vm5072_vm13 = vmand %vm1261_vm2, %vm1277_vm12  ;;  %v5079_v37 = vsel %vm5062_vm11, 0, %v4528_v5  ;;  %vm7227_vm9 = vnez %v7197_v14  ;;  %v3269_v43 = vcombine.low %v1267_v17, %v1267_v17 }
 0x1eb   : >> { %7220 = vst [vmem:[#allocation16_spill] sm:$0xff] %v7219_v7  ;;  %v7224_v8 = vsel %vm5072_vm13, 4294967295, %v7223_v8  ;;  %v5085_v15 = vsel %vm5072_vm13, 0, %v4534_v45  ;;  %vm741_vm12 = vmand %vm4960_vm7, %vm5066_vm1  ;;  %v3265_v45 = vcombine.low %v4956_v28, %v4956_v28  ;;  %vm738_vm1 = vcmp.ne.s16.totalorder %v3217_v32, 0 }
 0x1ec   : >> { %7225 = vst [vmem:[#allocation17_spill] sm:$0xff] %v7224_v8  ;;  %v5093_v5 = vcombine.low %v5079_v37, %v5085_v15  ;;  %vm7228_vm2 = vmand %vm7226_vm14, %vm7227_vm9  ;;  %vm7233_vm7 = vnez %v7043_v27  ;;  %v3270_v35 = vcombine.high %v1267_v17, %v1267_v17  ;;  %vm759_vm14 = vcmp.ne.s16.totalorder %v3222_v9, 0  ;;  %v7267_v27 = vld [vmem:[#allocation15_spill] sm:$0xff] }
 0x1ed   : >> { %vm5100_vm6 = vmand %vm7228_vm2, %vm756_vm5  ;;  %vm1258_vm2 = vcmp.ne.s16.totalorder %v3265_v45, 0  ;;  %vm7236_vm15 = vnez %v7164_v16  ;;  %vm7237_vm5 = vnez %v7207_v47  ;;  %v7242_v28 = vmov 0 }
 0x1ee   : >> { %vm5106_vm0 = vmand %vm741_vm12, %vm757_vm8  ;;  %v5113_v52 = vsel %vm5100_vm6, 0, %v4346_v50  ;;  %1868 = vrot.lane.b32.xlu1 %v5093_v5, %s3656_s20  ;;  %vm758_vm12 = vcmp.ne.s16.totalorder %v3221_v23, 0  ;;  %v7269_v59 = vmov 0  ;;  %v1837_v13 = vshrl.u32 %v5093_v5, 16 }
 0x1ef   : >> { %v5120_v21 = vsel %vm5106_vm0, 0, %v4378_v0  ;;  %vm742_vm8 = vmand %vm5016_vm3, %vm738_vm1  ;;  %vm1278_vm3 = vcmp.ne.s16.totalorder %v3269_v43, 0  ;;  %vm7241_vm1 = vnez %v7211_v6  ;;  %v1840_v49 = vshll.u32 %v5093_v5, 16 }
 0x1f0   : >> { %v3272_v50 = vcombine.low %v5113_v52, %v5120_v21  ;;  %vm5130_vm9 = vmand %vm742_vm8, %vm758_vm12  ;;  %v1839_v6 = vrot.slane %v1837_v13, 7  ;;  %v3322_v9 = vcombine.low %v5079_v37, %v5079_v37 }
 0x1f1   : >> { %vm7238_vm13 = vmand %vm7236_vm15, %vm7237_vm5  ;;  %v5147_v57 = vsel %vm5130_vm9, 0, %v4501_v44 }
 0x1f2   : >> { %1348 = vrot.lane.b32.xlu0 %v3272_v50, %s3656_s20  ;;  %v1317_v0 = vshrl.u32 %v3272_v50, 16  ;;  %vm5140_vm11 = vmand %vm7238_vm13, %vm759_vm14  ;;  %1356 = vrot.lane.b32.xlu1 %v3272_v50, %s3657_s17  ;;  %vm1279_vm13 = vcmp.ne.s16.totalorder %v3270_v35, 0  ;;  %v1320_v46 = vshll.u32 %v3272_v50, 16  ;;  %vm7250_vm14 = vnez %v7095_v36 }
 0x1f3   : >> { %v5153_v38 = vsel %vm5140_vm11, 0, %v4506_v62  ;;  %vm1262_vm15 = vmand %vm7241_vm1, %vm1258_vm2  ;;  %v7246_v62 = vmov 0  ;;  %v1842_v61 = vor.u32 %v1840_v49, %v1839_v6  ;;  %v1863_v35 = vshll.u32 %v3322_v9, 16 }
 0x1f4   : >> { %v3273_v16 = vcombine.low %v5147_v57, %v5153_v38  ;;  %vm5159_vm5 = vmand %vm1262_vm15, %vm1278_vm3  ;;  %v3271_v44 = vcombine.low %v5153_v38, %v5153_v38  ;;  %v1319_v1 = vrot.slane %v1317_v0, 7  ;;  %vm7251_vm3 = vnez %v7100_v22 }
 0x1f5   : >> { %v7243_v28 = vsel %vm5159_vm5, 4294967295, %v7242_v28  ;;  %vm7245_vm12 = vmand %vm5038_vm10, %vm5047_vm4  ;;  %v5177_v40 = vsel %vm5159_vm5, 0, %v4558_v33  ;;  %vm7249_vm10 = vnez %v7028_v53  ;;  %v3274_v33 = vcombine.low %v5113_v52, %v5113_v52 }
 0x1f6   : >> { %7244 = vst [vmem:[#allocation18_spill] sm:$0xff] %v7243_v28  ;;  %vm5170_vm8 = vmand %vm7245_vm12, %vm1279_vm13  ;;  %v1324_v10 = vshrl.u32 %v3273_v16, 16  ;;  %1350 = vrot.lane.b32.xlu0 %v3273_v16, %s3656_s20  ;;  %v1304_v11 = vshrl.u32 %v3271_v44, 16  ;;  %v7253_v53 = vmov 0  ;;  %v1327_v41 = vshll.u32 %v3273_v16, 16 }
 0x1f7   : >> { %v7247_v62 = vsel %vm5170_vm8, 4294967295, %v7246_v62  ;;  %v5183_v54 = vsel %vm5170_vm8, 0, %v4564_v3  ;;  %vm1288_vm4 = vmor %vm7249_vm10, %vm5100_vm6  ;;  %v1322_v3 = vor.u32 %v1320_v46, %v1319_v1  ;;  %vm7252_vm6 = vnez %v7103_v4 }
 0x1f8   : >> { %7248 = vst [vmem:[#allocation19_spill] sm:$0xff] %v7247_v62  ;;  %v3321_v39 = vcombine.low %v5177_v40, %v5183_v54  ;;  %vm1290_vm2 = vmor %vm7250_vm14, %vm5130_vm9  ;;  %v1306_v36 = vrot.slane %v1304_v11, 3  ;;  %v1326_v14 = vrot.slane %v1324_v10, 7  ;;  %vm7256_vm9 = vnez %v7105_v51 }
 0x1f9   : >> { %vm1291_vm1 = vmor %vm7251_vm3, %vm5140_vm11  ;;  %v7258_v22 = vmov 0  ;;  %vm7261_vm12 = vnez %v7107_v20  ;;  %v7262_v4 = vmov 0  ;;  %v1343_v58 = vshll.u32 %v3274_v33, 16 }
 0x1fa   : >> { %1878 = vrot.lane.b32.xlu1 %v3321_v39, %s3657_s17  ;;  %vm5204_vm15 = vmor %vm1288_vm4, %vm7252_vm6  ;;  %1870 = vrot.lane.b32.xlu0 %v3321_v39, %s3656_s20  ;;  %v1844_v29 = vshrl.u32 %v3321_v39, 16  ;;  %vm7266_vm4 = vnez %v7265_v24  ;;  %vm7268_vm14 = vnez %v7267_v27  ;;  %v1334_v19 = vrot.slane %v1320_v46, 1 }
 0x1fb   : >> { %v7254_v53 = vsel %vm5204_vm15, 4294967295, %v7253_v53  ;;  %vm7257_vm11 = vmor %vm7233_vm7, %vm5106_vm0  ;;  %v5228_v51 = vsel %vm7266_vm4, %v1306_v36, %v1322_v3  ;;  %v3319_v20 = vcombine.low %v5183_v54, %v5183_v54  ;;  %v1329_v18 = vor.u32 %v1327_v41, %v1326_v14 }
 0x1fc   : >> { %7255 = vst [vmem:[#allocation20_spill] sm:$0xff] %v7254_v53  ;;  %vm5216_vm13 = vmor %vm7257_vm11, %vm7256_vm9  ;;  %v1336_v25 = vrot.slane %v1327_v41, 1  ;;  %vm7274_vm9 = vsmask.f32 256  ;;  %v1345_v47 = vrot.slane %v1343_v58, 1  ;;  %v1846_v34 = vrot.slane %v1844_v29, 7 }
 0x1fd   : >> { %v7259_v22 = vsel %vm5216_vm13, 4294967295, %v7258_v22  ;;  %vm5222_vm10 = vmor %vm1290_vm2, %vm7261_vm12  ;;  %v5255_v26 = vsel %vm7274_vm9, %v1319_v1, %v1329_v18  ;;  %v1335_v48 = vor.u32 %v1334_v19, %v1317_v0  ;;  %v1824_v56 = vshrl.u32 %v3319_v20, 16 }
 0x1fe   : >> { %7260 = vst [vmem:[#allocation21_spill] sm:$0xff] %v7259_v22  ;;  %v7263_v4 = vsel %vm5222_vm10, 4294967295, %v7262_v4  ;;  %vm5232_vm3 = vmor %vm1291_vm1, %vm7268_vm14  ;;  %1365 = vrot.lane.b32.xlu1 %v5228_v51, %s3656_s20  ;;  %1358 = vrot.lane.b32.xlu0 %v3273_v16, %s3657_s17  ;;  %v1338_v60 = vor.u32 %v1336_v25, %v1324_v10  ;;  %v1847_v63 = vshll.u32 %v3321_v39, 16  ;;  %vm7276_vm12 = vnez %v7275_v42 }
 0x1ff   : >> { %7264 = vst [vmem:[#allocation22_spill] sm:$0xff] %v7263_v4  ;;  %v7270_v59 = vsel %vm5232_vm3, 4294967295, %v7269_v59  ;;  %vm7277_vm14 = vsmask.f32 7424  ;;  %v1826_v17 = vrot.slane %v1824_v56, 3  ;;  %v1865_v2 = vrot.slane %v1863_v35, 1 }
 0x200   : >> { %7271 = vst [vmem:[#allocation15_spill] sm:$0xff] %v7270_v59  ;;  %v5268_v31 = vsel %vm7276_vm12, %v1338_v60, %v1345_v47  ;;  %v1849_v32 = vor.u32 %v1847_v63, %v1846_v34  ;;  %v5271_v23 = vsel %vm7277_vm14, %v1335_v48, %v1336_v25  ;;  %v1856_v43 = vrot.slane %v1847_v63, 1 }
 0x201   : >> { %v5284_v30 = vsel %vm7266_vm4, %v1826_v17, %v1842_v61  ;;  %vm7291_vm10 = vcmp.gt.bf16.partialorder %v5120_v21, 1056980736 }
 0x202   : >> { %1367 = vrot.lane.b32.xlu1 %v5255_v26, %s3656_s20  ;;  %1876 = vrot.lane.b32.xlu0 %v5093_v5, %s3657_s17  ;;  %v1854_v5 = vrot.slane %v1840_v49, 1  ;;  %v5280_v45 = vsel %vm7274_vm9, %v1839_v6, %v1849_v32  ;;  %v1858_v0 = vor.u32 %v1856_v43, %v1844_v29 }
 0x204   : >> { %v1855_v50 = vor.u32 %v1854_v5, %v1837_v13  ;;  %v5299_v16 = vsel %vm7276_vm12, %v1858_v0, %v1865_v2  ;;  %vm7306_vm12 = vcmp.gt.bf16.partialorder %v5153_v38, 1056980736 }
 0x206   : >> { %1384 = vrot.lane.b32.xlu1 %v5268_v31, %s3656_s20  ;;  %1382 = vrot.lane.b32.xlu0 %v5271_v23, %s3656_s20  ;;  %v5291_v55 = vsel %vm7277_vm14, %v1855_v50, %v1856_v43 }
 0x20a   : >> { %1887 = vrot.lane.b32.xlu1 %v5280_v45, %s3656_s20  ;;  %1885 = vrot.lane.b32.xlu0 %v5284_v30, %s3656_s20 }
 0x20e   : >> { %1390 = vrot.lane.b32.xlu1 %v5271_v23, %s3657_s17  ;;  %1902 = vrot.lane.b32.xlu0 %v5291_v55, %s3656_s20 }
 0x212   : >> { %1910 = vrot.lane.b32.xlu1 %v5291_v55, %s3657_s17  ;;  %1904 = vrot.lane.b32.xlu0 %v5299_v16, %s3656_s20 }
 0x216   : >> { %1373 = vrot.lane.b32.xlu1 %v5228_v51, %s3657_s17  ;;  %1392 = vrot.lane.b32.xlu0 %v5268_v31, %s3657_s17 }
 0x21a   : >> { %1912 = vrot.lane.b32.xlu1 %v5299_v16, %s3657_s17  ;;  %1375 = vrot.lane.b32.xlu0 %v5255_v26, %s3657_s17 }
 0x21e   : >> { %1895 = vrot.lane.b32.xlu1 %v5280_v45, %s3657_s17  ;;  %1893 = vrot.lane.b32.xlu0 %v5284_v30, %s3657_s17 }
 0x260   : >> { %v5317_v44 = vpop.permute.xlu1 %1868 }
 0x261   : >> { %v1964_v33 = vmul.bf16 %v5317_v44, %v5284_v30 }
 0x263   : >> { %v1966_v41 = vmul.bf16 %v1964_v33, %v5291_v55 }
 0x264   : >> { %v1349_v1 = vpop.permute.xlu0 %1348  ;;  %v5319_v10 = vpop.permute.xlu1 %1356 }
 0x265   : >> { %v1444_v36 = vmul.bf16 %v1349_v1, %v5228_v51  ;;  %vm2036_vm9 = vcmp.eq.bf16.partialorder %v1966_v41, 0  ;;  %v1448_v47 = vmul.bf16 %v1349_v1, %v5271_v23 }
 0x266   : >> { %v5346_v60 = vsel %vm2036_vm9, 65537, %v7118_v12 }
 0x267   : >> { %v1446_v29 = vmul.bf16 %v1444_v36, %v5271_v23  ;;  %v5349_v6 = vmul.bf16 %v1448_v47, %v5319_v10 }
 0x268   : >> { %v5321_v11 = vpop.permute.xlu0 %1350 }
 0x269   : >> { %v1445_v27 = vmul.bf16 %v5321_v11, %v5255_v26  ;;  %vm1516_vm14 = vcmp.eq.bf16.partialorder %v1446_v29, 0 }
 0x26a   : >> { %v5354_v17 = vsel %vm1516_vm14, 65537, %v7118_v12 }
 0x26b   : >> { %v1447_v34 = vmul.bf16 %v1445_v27, %v5268_v31 }
 0x26c   : >> { %v5323_v46 = vpop.permute.xlu1 %1878  ;;  %v5325_v39 = vpop.permute.xlu0 %1870 }
 0x26d   : >> { %vm1517_vm9 = vcmp.eq.bf16.partialorder %v1447_v34, 0 }
 0x270   : >> { %v1366_v3 = vpop.permute.xlu1 %1365  ;;  %v5330_v14 = vpop.permute.xlu0 %1358 }
 0x271   : >> { %v1398_v20 = vadd.bf16 %v1366_v3, %v5228_v51  ;;  %v1412_v18 = vmul.bf16 %v1366_v3, %v5228_v51  ;;  %v1414_v25 = vmul.bf16 %v1366_v3, %v1349_v1 }
 0x273   : >> { %v1400_v32 = vadd.bf16 %v1398_v20, %v1349_v1  ;;  %v1416_v9 = vadd.bf16 %v1414_v25, %v1412_v18  ;;  %v5373_v20 = vsel %vm1517_vm9, 65537, %v7118_v12 }
 0x274   : >> { %v1368_v58 = vpop.permute.xlu1 %1367  ;;  %v5336_v19 = vpop.permute.xlu0 %1876 }
 0x275   : >> { %v1399_v48 = vadd.bf16 %v1368_v58, %v5255_v26  ;;  %v1413_v61 = vmul.bf16 %v1368_v58, %v5255_v26  ;;  %v1415_v5 = vmul.bf16 %v1368_v58, %v5321_v11  ;;  %v1965_v58 = vmul.bf16 %v5325_v39, %v5280_v45 }
 0x277   : >> { %v1401_v0 = vadd.bf16 %v1399_v48, %v5321_v11  ;;  %v1417_v18 = vadd.bf16 %v1415_v5, %v1413_v61 }
 0x278   : >> { %v5340_v13 = vpop.permute.xlu1 %1384  ;;  %v1383_v56 = vpop.permute.xlu0 %1382 }
 0x279   : >> { %v1418_v63 = vmul.bf16 %v1383_v56, %v1349_v1  ;;  %v1402_v50 = vadd.bf16 %v1400_v32, %v1383_v56  ;;  %v1419_v27 = vmul.bf16 %v5340_v13, %v5321_v11  ;;  %v1422_v25 = vmul.bf16 %v1383_v56, %v5271_v23 }
 0x27a   : >> { %v1403_v48 = vadd.bf16 %v1401_v0, %v5340_v13  ;;  %v5385_v0 = vmul.bf16 %v1965_v58, %v5299_v16 }
 0x27b   : >> { %v1420_v33 = vadd.bf16 %v1418_v63, %v1416_v9  ;;  %v1404_v9 = vadd.bf16 %v1402_v50, %v5271_v23  ;;  %v1421_v61 = vadd.bf16 %v1419_v27, %v1417_v18 }
 0x27c   : >> { %v1888_v43 = vpop.permute.xlu1 %1887  ;;  %v1886_v2 = vpop.permute.xlu0 %1885 }
 0x27d   : >> { %v1918_v1 = vadd.bf16 %v1886_v2, %v5284_v30  ;;  %v1932_v3 = vmul.bf16 %v1886_v2, %v5284_v30  ;;  %v1934_v36 = vmul.bf16 %v1886_v2, %v5317_v44  ;;  %v1919_v63 = vadd.bf16 %v1888_v43, %v5280_v45 }
 0x27e   : >> { %v1424_v35 = vadd.bf16 %v1422_v25, %v1420_v33  ;;  %v1933_v56 = vmul.bf16 %v1888_v43, %v5280_v45  ;;  %v1935_v5 = vmul.bf16 %v1888_v43, %v5325_v39  ;;  %v1423_v33 = vmul.bf16 %v5340_v13, %v5268_v31 }
 0x27f   : >> { %v1920_v47 = vadd.bf16 %v1918_v1, %v5317_v44  ;;  %v1936_v49 = vadd.bf16 %v1934_v36, %v1932_v3  ;;  %v1921_v36 = vadd.bf16 %v1919_v63, %v5325_v39  ;;  %v1405_v25 = vadd.bf16 %v1403_v48, %v5268_v31 }
 0x280   : >> { %v1391_v34 = vpop.permute.xlu1 %1390  ;;  %v1903_v32 = vpop.permute.xlu0 %1902  ;;  %v1937_v18 = vadd.bf16 %v1935_v5, %v1933_v56 }
 0x281   : >> { %v1426_v2 = vmul.bf16 %v1391_v34, %v5271_v23  ;;  %v1922_v29 = vadd.bf16 %v1920_v47, %v1903_v32  ;;  %v1938_v41 = vmul.bf16 %v1903_v32, %v5317_v44  ;;  %v1406_v1 = vadd.bf16 %v1404_v9, %v1391_v34 }
 0x282   : >> { %v1942_v59 = vmul.bf16 %v1903_v32, %v5291_v55  ;;  %v1430_v58 = vmul.bf16 %v1391_v34, %v5319_v10 }
 0x283   : >> { %v1940_v62 = vadd.bf16 %v1938_v41, %v1936_v49  ;;  %v1428_v50 = vadd.bf16 %v1426_v2, %v1424_v35  ;;  %v1924_v43 = vadd.bf16 %v1922_v29, %v5291_v55  ;;  %v1425_v35 = vadd.bf16 %v1423_v33, %v1421_v61 }
 0x284   : >> { %v1911_v28 = vpop.permute.xlu1 %1910  ;;  %v1905_v3 = vpop.permute.xlu0 %1904  ;;  %v1408_v47 = vadd.bf16 %v1406_v1, %v5319_v10 }
 0x285   : >> { %v1944_v27 = vadd.bf16 %v1942_v59, %v1940_v62  ;;  %v1939_v49 = vmul.bf16 %v1905_v3, %v5325_v39  ;;  %v1946_v41 = vmul.bf16 %v1911_v28, %v5291_v55  ;;  %v1432_v32 = vadd.bf16 %v1430_v58, %v1428_v50 }
 0x286   : >> { %v1923_v13 = vadd.bf16 %v1921_v36, %v1905_v3  ;;  %v1943_v9 = vmul.bf16 %v1905_v3, %v5299_v16  ;;  %v1950_v63 = vmul.bf16 %v1911_v28, %v5336_v19  ;;  %v1926_v59 = vadd.bf16 %v1924_v43, %v1911_v28 }
 0x287   : >> { %v1941_v62 = vadd.bf16 %v1939_v49, %v1937_v18  ;;  %v1948_v4 = vadd.bf16 %v1946_v41, %v1944_v27 }
 0x288   : >> { %v1374_v29 = vpop.permute.xlu1 %1373  ;;  %v1393_v34 = vpop.permute.xlu0 %1392  ;;  %v1925_v27 = vadd.bf16 %v1923_v13, %v5299_v16 }
 0x289   : >> { %v1410_v2 = vadd.bf16 %v1408_v47, %v1374_v29  ;;  %v1434_v23 = vmul.bf16 %v1374_v29, %v5319_v10  ;;  %v1407_v61 = vadd.bf16 %v1405_v25, %v1393_v34  ;;  %v1427_v56 = vmul.bf16 %v1393_v34, %v5268_v31 }
 0x28a   : >> { %v1438_v48 = vmul.bf16 %v1374_v29, %v5228_v51  ;;  %v1431_v5 = vmul.bf16 %v1393_v34, %v5330_v14  ;;  %v1928_v51 = vadd.bf16 %v1926_v59, %v5336_v19 }
 0x28b   : >> { %v1436_v1 = vadd.bf16 %v1434_v23, %v1432_v32  ;;  %vm1456_vm14 = vcmp.ge.bf16.partialorder %v1410_v2, 1073758208  ;;  %vm1476_vm9 = vcmp.le.bf16.partialorder %v1410_v2, 1086341312  ;;  %v1429_v50 = vadd.bf16 %v1427_v56, %v1425_v35 }
 0x28c   : >> { %v1458_v33 = vsel %vm1456_vm14, 65537, %v7118_v12  ;;  %v1478_v28 = vsel %vm1476_vm9, 65537, %v7118_v12  ;;  %v1409_v3 = vadd.bf16 %v1407_v61, %v5330_v14  ;;  %v1376_v43 = vpop.permute.xlu0 %1375  ;;  %v1945_v23 = vadd.bf16 %v1943_v9, %v1941_v62  ;;  %v1913_v61 = vpop.permute.xlu1 %1912 }
 0x28d   : >> { %v1440_v10 = vadd.bf16 %v1438_v48, %v1436_v1  ;;  %v3275_v36 = vcombine.low %v1458_v33, %v1458_v33  ;;  %v1433_v58 = vadd.bf16 %v1431_v5, %v1429_v50  ;;  %v1435_v41 = vmul.bf16 %v1376_v43, %v5330_v14 }
 0x28e   : >> { %v1411_v49 = vadd.bf16 %v1409_v3, %v1376_v43  ;;  %v1952_v35 = vadd.bf16 %v1950_v63, %v1948_v4  ;;  %v3276_v25 = vcombine.high %v1458_v33, %v1458_v33  ;;  %v3279_v47 = vcombine.low %v1478_v28, %v1478_v28 }
 0x28f   : >> { %v1442_v18 = vsub.bf16 %v1410_v2, %v1440_v10  ;;  %v3280_v32 = vcombine.high %v1478_v28, %v1478_v28  ;;  %v1437_v29 = vadd.bf16 %v1435_v41, %v1433_v58  ;;  %v1439_v34 = vmul.bf16 %v1376_v43, %v5255_v26 }
 0x290   : >> { %vm1457_vm14 = vcmp.ge.bf16.partialorder %v1411_v49, 1073758208  ;;  %vm5414_vm9 = vcmp.ne.s16.totalorder %v3275_v36, 0  ;;  %vm1477_vm7 = vcmp.le.bf16.partialorder %v1411_v49, 1086341312  ;;  %v1947_v48 = vmul.bf16 %v1913_v61, %v5299_v16  ;;  %v1894_v5 = vpop.permute.xlu0 %1893 }
 0x291   : >> { %vm1496_vm1 = vcmp.eq.bf16.partialorder %v1442_v18, 1065369472  ;;  %v1459_v9 = vsel %vm1457_vm14, 65537, %v7118_v12  ;;  %v1441_v63 = vadd.bf16 %v1439_v34, %v1437_v29  ;;  %v1479_v26 = vsel %vm1477_vm7, 65537, %v7118_v12  ;;  %v1896_v34 = vpop.permute.xlu1 %1895 }
 0x292   : >> { %v1498_v4 = vsel %vm1496_vm1, 65537, %v7118_v12  ;;  %v3277_v62 = vcombine.low %v1459_v9, %v1459_v9  ;;  %v3278_v59 = vcombine.high %v1459_v9, %v1459_v9  ;;  %vm1469_vm8 = vcmp.ne.s16.totalorder %v3276_v25, 0 }
 0x293   : >> { %v3283_v2 = vcombine.low %v1498_v4, %v1498_v4  ;;  %v3284_v56 = vcombine.high %v1498_v4, %v1498_v4  ;;  %vm5424_vm3 = vcmp.ne.s16.totalorder %v3279_v47, 0  ;;  %vm5428_vm14 = vcmp.ne.s16.totalorder %v3280_v32, 0  ;;  %vm5451_vm2 = vmand %vm7291_vm10, %vm1469_vm8 }
 0x294   : >> { %v7282_v50 = vmov 0  ;;  %v1443_v33 = vsub.bf16 %v1411_v49, %v1441_v63  ;;  %vm5432_vm1 = vcmp.ne.s16.totalorder %v3277_v62, 0  ;;  %vm5436_vm11 = vcmp.ne.s16.totalorder %v3278_v59, 0 }
 0x295   : >> { %v7283_v50 = vsel %vm5428_vm14, 4294967295, %v7282_v50  ;;  %v1927_v10 = vadd.bf16 %v1925_v27, %v1913_v61  ;;  %v1949_v36 = vadd.bf16 %v1947_v48, %v1945_v23  ;;  %vm7288_vm7 = vcmp.gt.bf16.partialorder %v5113_v52, 1056980736  ;;  %vm5505_vm4 = vmand %vm7306_vm12, %vm5436_vm11 }
 0x296   : >> { %vm5444_vm6 = vmand %vm7288_vm7, %vm5414_vm9  ;;  %v3281_v58 = vcombine.low %v1479_v26, %v1479_v26  ;;  %vm1497_vm5 = vcmp.eq.bf16.partialorder %v1443_v33, 1065369472  ;;  %v1951_v49 = vmul.bf16 %v1913_v61, %v5323_v46  ;;  %v1930_v41 = vadd.bf16 %v1928_v51, %v1894_v5 }
 0x297   : >> { %vm5455_vm13 = vcmp.ne.s16.totalorder %v3283_v2, 0  ;;  %vm5459_vm0 = vcmp.ne.s16.totalorder %v3284_v56, 0  ;;  %v1499_v25 = vsel %vm1497_vm5, 65537, %v7118_v12  ;;  %v1954_v51 = vmul.bf16 %v1894_v5, %v5336_v19  ;;  %vm7313_vm11 = vmand %vm5444_vm6, %vm5424_vm3 }
 0x298   : >> { %v3282_v47 = vcombine.high %v1479_v26, %v1479_v26  ;;  %v1953_v32 = vadd.bf16 %v1951_v49, %v1949_v36  ;;  %v1958_v29 = vmul.bf16 %v1894_v5, %v5284_v30  ;;  %vm1976_vm8 = vcmp.ge.bf16.partialorder %v1930_v41, 1073758208  ;;  %vm5524_vm12 = vmand %vm7313_vm11, %vm5455_vm13 }
 0x299   : >> { %v1956_v61 = vadd.bf16 %v1954_v51, %v1952_v35  ;;  %v1978_v13 = vsel %vm1976_vm8, 65537, %v7118_v12  ;;  %vm1996_vm5 = vcmp.le.bf16.partialorder %v1930_v41, 1086341312  ;;  %v1929_v9 = vadd.bf16 %v1927_v10, %v5323_v46 }
 0x29a   : >> { %v7298_v30 = vcombine.low %v5354_v17, %v5354_v17  ;;  %v7299_v4 = vmov 0  ;;  %vm5486_vm9 = vcmp.ne.s16.totalorder %v3281_v58, 0  ;;  %v7301_v63 = vmov 0 }
 0x29b   : >> { %v7302_v63 = vsel %vm5486_vm9, 4294967295, %v7301_v63  ;;  %v3286_v35 = vcombine.high %v1499_v25, %v1499_v25  ;;  %v3323_v62 = vcombine.low %v1978_v13, %v1978_v13  ;;  %v3324_v59 = vcombine.high %v1978_v13, %v1978_v13 }
 0x29c   : >> { %vm5482_vm10 = vcmp.ne.s16.totalorder %v7298_v30, 0  ;;  %vm7303_vm8 = vcmp.gt.bf16.partialorder %v5147_v57, 1056980736  ;;  %v7304_v2 = vmov 0  ;;  %v1960_v56 = vadd.bf16 %v1958_v29, %v1956_v61 }
 0x29d   : >> { %v7300_v4 = vsel %vm5482_vm10, 4294967295, %v7299_v4  ;;  %vm5494_vm15 = vmand %vm7303_vm8, %vm5432_vm1  ;;  %v1998_v26 = vsel %vm1996_vm5, 65537, %v7118_v12  ;;  %v1931_v48 = vadd.bf16 %v1929_v9, %v1896_v34  ;;  %v1955_v5 = vmul.bf16 %v1896_v34, %v5323_v46 }
 0x29e   : >> { %v7305_v2 = vsel %vm5494_vm15, 4294967295, %v7304_v2  ;;  %vm5509_vm1 = vcmp.ne.s16.totalorder %v3282_v47, 0  ;;  %vm5513_vm8 = vcmp.ne.s16.totalorder %v3323_v62, 0  ;;  %v3327_v36 = vcombine.low %v1998_v26, %v1998_v26 }
 0x29f   : >> { %v3328_v58 = vcombine.high %v1998_v26, %v1998_v26  ;;  %v7314_v3 = vmov 0  ;;  %v1962_v49 = vsub.bf16 %v1930_v41, %v1960_v56  ;;  %v1957_v51 = vadd.bf16 %v1955_v5, %v1953_v32 }
 0x2a0   : >> { %v7315_v3 = vsel %vm5524_vm12, 4294967295, %v7314_v3  ;;  %v1959_v47 = vmul.bf16 %v1896_v34, %v5280_v45  ;;  %vm1977_vm5 = vcmp.ge.bf16.partialorder %v1931_v48, 1073758208  ;;  %v3285_v27 = vcombine.low %v1499_v25, %v1499_v25 }
 0x2a1   : >> { %vm1989_vm10 = vcmp.ne.s16.totalorder %v3324_v59, 0  ;;  %v1979_v1 = vsel %vm1977_vm5, 65537, %v7118_v12  ;;  %vm1997_vm13 = vcmp.le.bf16.partialorder %v1931_v48, 1086341312  ;;  %vm5539_vm6 = vcmp.ne.s16.totalorder %v3286_v35, 0 }
 0x2a2   : >> { %vm2016_vm11 = vcmp.eq.bf16.partialorder %v1962_v49, 1065369472  ;;  %v1961_v43 = vadd.bf16 %v1959_v47, %v1957_v51  ;;  %v3325_v41 = vcombine.low %v1979_v1, %v1979_v1  ;;  %vm7318_vm7 = vcmp.gt.bf16.partialorder %v5079_v37, 1056980736 }
 0x2a3   : >> { %vm5547_vm14 = vmand %vm7318_vm7, %vm5513_vm8  ;;  %vm5551_vm5 = vcmp.ne.s16.totalorder %v3327_v36, 0  ;;  %v2018_v29 = vsel %vm2016_vm11, 65537, %v7118_v12  ;;  %v3326_v34 = vcombine.high %v1979_v1, %v1979_v1  ;;  %v1999_v61 = vsel %vm1997_vm13, 65537, %v7118_v12 }
 0x2a4   : >> { %vm7323_vm3 = vcmp.gt.bf16.partialorder %v5085_v15, 1056980736  ;;  %vm5563_vm15 = vcmp.ne.s16.totalorder %v3328_v58, 0  ;;  %v3331_v30 = vcombine.low %v2018_v29, %v2018_v29  ;;  %v3332_v35 = vcombine.high %v2018_v29, %v2018_v29 }
 0x2a5   : >> { %vm5559_vm9 = vmand %vm7323_vm3, %vm1989_vm10  ;;  %v1963_v62 = vsub.bf16 %v1931_v48, %v1961_v43  ;;  %v7328_v59 = vmul.bf16 %v5321_v11, %v5268_v31  ;;  %vm7329_vm7 = vnez %v7283_v50  ;;  %v7331_v26 = vmov 0 }
 0x2a6   : >> { %vm7330_vm10 = vmand %vm5451_vm2, %vm7329_vm7  ;;  %vm5582_vm13 = vcmp.ne.s16.totalorder %v3285_v27, 0  ;;  %v7336_v31 = vmov 0  ;;  %vm5597_vm2 = vcmp.ne.s16.totalorder %v3325_v41, 0  ;;  %v3330_v18 = vcombine.high %v1999_v61, %v1999_v61 }
 0x2a7   : >> { %v1451_v56 = vmul.bf16 %v7328_v59, %v5330_v14  ;;  %vm5578_vm8 = vmand %vm7330_vm10, %vm5459_vm0  ;;  %v3329_v14 = vcombine.low %v1999_v61, %v1999_v61  ;;  %v1969_v23 = vmul.bf16 %v5325_v39, %v5299_v16  ;;  %v7346_v16 = vmul.bf16 %v5317_v44, %v5291_v55 }
 0x2a8   : >> { %v7332_v26 = vsel %vm5578_vm8, 4294967295, %v7331_v26  ;;  %vm7335_vm3 = vmand %vm5505_vm4, %vm5509_vm1  ;;  %vm5610_vm1 = vcmp.ne.s16.totalorder %v3331_v30, 0  ;;  %vm5625_vm4 = vcmp.ne.s16.totalorder %v3326_v34, 0  ;;  %vm7348_vm0 = vnez %v7302_v63 }
 0x2a9   : >> { %vm5593_vm11 = vmand %vm7335_vm3, %vm5539_vm6  ;;  %vm2017_vm6 = vcmp.eq.bf16.partialorder %v1963_v62, 1065369472  ;;  %vm7343_vm3 = vcmp.eq.bf16.partialorder %v5385_v0, 0  ;;  %v1970_v39 = vmul.bf16 %v7346_v16, %v5336_v19  ;;  %v7350_v0 = vmov 0 }
 0x2aa   : >> { %v7337_v31 = vsel %vm5593_vm11, 4294967295, %v7336_v31  ;;  %v5619_v48 = vsel %vm7343_vm3, 65537, %v7118_v12  ;;  %v2019_v28 = vsel %vm2017_vm6, 65537, %v7118_v12  ;;  %vm7347_vm3 = vnez %v7305_v2 }
 0x2ab   : >> { %vm7349_vm7 = vmand %vm7347_vm3, %vm7348_vm0  ;;  %vm5645_vm10 = vcmp.ne.s16.totalorder %v3332_v35, 0  ;;  %vm7354_vm6 = vcmp.gt.bf16.partialorder %v5177_v40, 1056980736  ;;  %v3333_v44 = vcombine.low %v2019_v28, %v2019_v28  ;;  %v3334_v19 = vcombine.high %v2019_v28, %v2019_v28 }
 0x2ac   : >> { %vm5641_vm12 = vmand %vm7349_vm7, %vm5582_vm13  ;;  %vm7357_vm13 = vcmp.eq.bf16.partialorder %v5349_v6, 0  ;;  %vm1537_vm0 = vcmp.eq.bf16.partialorder %v1451_v56, 0  ;;  %v7358_v2 = vcombine.high %v5373_v20, %v5373_v20  ;;  %v7359_v36 = vmov 0 }
 0x2ad   : >> { %v7351_v0 = vsel %vm5641_vm12, 4294967295, %v7350_v0  ;;  %vm5653_vm8 = vmand %vm7354_vm6, %vm5597_vm2  ;;  %v1538_v63 = vsel %vm7357_vm13, 65537, %v7118_v12  ;;  %vm5678_vm6 = vcmp.ne.s16.totalorder %v3329_v14, 0  ;;  %v3288_v49 = vcombine.high %v5354_v17, %v5354_v17 }
 0x2ae   : >> { %vm5663_vm7 = vcmp.ne.s16.totalorder %v7358_v2, 0  ;;  %vm7361_vm2 = vmand %vm5547_vm14, %vm5551_vm5  ;;  %vm7366_vm14 = vcmp.gt.bf16.partialorder %v5183_v54, 1056980736  ;;  %v1971_v27 = vmul.bf16 %v1969_v23, %v5323_v46  ;;  %v3338_v17 = vcombine.high %v5619_v48, %v5619_v48 }
 0x2af   : >> { %v7360_v36 = vsel %vm5663_vm7, 4294967295, %v7359_v36  ;;  %vm5674_vm3 = vmand %vm7361_vm2, %vm5610_vm1  ;;  %vm5696_vm1 = vcmp.ne.s16.totalorder %v3330_v18, 0  ;;  %v7371_v1 = vcombine.low %v5346_v60, %v5346_v60  ;;  %vm2031_vm13 = vcmp.ne.s16.totalorder %v3334_v19, 0 }
 0x2b0   : >> { %vm5692_vm5 = vmand %vm7366_vm14, %vm5625_vm4  ;;  %v3291_v46 = vcombine.low %v1538_v63, %v1538_v63  ;;  %v1539_v41 = vsel %vm1537_vm0, 65537, %v7118_v12  ;;  %vm2056_vm7 = vcmp.eq.bf16.partialorder %v1970_v39, 0  ;;  %v3292_v25 = vcombine.high %v1538_v63, %v1538_v63 }
 0x2b1   : >> { %vm5706_vm2 = vcmp.ne.s16.totalorder %v7371_v1, 0  ;;  %vm7374_vm4 = vmand %vm5559_vm9, %vm5563_vm15  ;;  %vm2030_vm15 = vcmp.ne.s16.totalorder %v3333_v44, 0  ;;  %v3289_v32 = vcombine.low %v5373_v20, %v5373_v20  ;;  %vm5740_vm0 = vcmp.ne.s16.totalorder %v3288_v49, 0 }
 0x2b2   : >> { %vm5717_vm14 = vmand %vm7374_vm4, %vm5645_vm10  ;;  %vm2057_vm4 = vcmp.eq.bf16.partialorder %v1971_v27, 0  ;;  %v3293_v61 = vcombine.low %v1539_v41, %v1539_v41  ;;  %v2058_v13 = vsel %vm2056_vm7, 65537, %v7118_v12  ;;  %v7383_v30 = vmov 0 }
 0x2b3   : >> { %vm2014_vm12 = vmand %vm5653_vm8, %vm5678_vm6  ;;  %vm5745_vm8 = vcmp.ne.s16.totalorder %v3338_v17, 0  ;;  %v3294_v20 = vcombine.high %v1539_v41, %v1539_v41  ;;  %v3336_v35 = vcombine.high %v5346_v60, %v5346_v60  ;;  %v7389_v62 = vmov 0 }
 0x2b4   : >> { %vm2015_vm9 = vmand %vm5692_vm5, %vm5696_vm1  ;;  %vm7385_vm1 = vnez %v7332_v26  ;;  %v2059_v59 = vsel %vm2057_vm4, 65537, %v7118_v12  ;;  %v3339_v56 = vcombine.low %v2058_v13, %v2058_v13  ;;  %v7391_v5 = vmov 0 }
 0x2b5   : >> { %vm5736_vm10 = vmand %vm2015_vm9, %vm2031_vm13  ;;  %vm1548_vm13 = vcmp.ne.s16.totalorder %v3291_v46, 0  ;;  %vm1549_vm9 = vcmp.ne.s16.totalorder %v3292_v25, 0  ;;  %v3337_v26 = vcombine.low %v5619_v48, %v5619_v48  ;;  %v3341_v50 = vcombine.low %v2059_v59, %v2059_v59 }
 0x2b6   : >> { %vm5749_vm6 = vmand %vm2014_vm12, %vm2030_vm15  ;;  %vm7386_vm12 = vnez %v7315_v3  ;;  %vm7387_vm15 = vnez %v7300_v4  ;;  %v3340_v4 = vcombine.high %v2058_v13, %v2058_v13  ;;  %v3342_v18 = vcombine.high %v2059_v59, %v2059_v59 }
 0x2b7   : >> { %v7384_v30 = vsel %vm5749_vm6, 4294967295, %v7383_v30  ;;  %vm1533_vm7 = vmand %vm7385_vm1, %vm5740_vm0  ;;  %vm1530_vm0 = vcmp.ne.s16.totalorder %v3289_v32, 0  ;;  %vm1550_vm1 = vcmp.ne.s16.totalorder %v3293_v61, 0  ;;  %v7404_v48 = vmov 0 }
 0x2b8   : >> { %vm7388_vm11 = vmand %vm7386_vm12, %vm7387_vm15  ;;  %vm7397_vm12 = vnez %v7360_v36  ;;  %v7407_v16 = vmov 0 }
 0x2b9   : >> { %vm5768_vm6 = vmand %vm7388_vm11, %vm1548_vm13  ;;  %vm7393_vm11 = vnez %v7351_v0  ;;  %vm1551_vm13 = vcmp.ne.s16.totalorder %v3294_v20, 0 }
 0x2ba   : >> { %v7390_v62 = vsel %vm5768_vm6, 4294967295, %v7389_v62  ;;  %vm5773_vm5 = vmand %vm1533_vm7, %vm1549_vm9  ;;  %v5780_v60 = vsel %vm5768_vm6, 0, %v5113_v52  ;;  %v7394_v52 = vmov 0  ;;  %vm7396_vm9 = vnez %v7337_v31 }
 0x2bb   : >> { %v7392_v5 = vsel %vm5773_vm5, 4294967295, %v7391_v5  ;;  %v5785_v3 = vsel %vm5773_vm5, 0, %v5120_v21  ;;  %vm1534_vm4 = vmand %vm7393_vm11, %vm1530_vm0  ;;  %v7399_v21 = vmov 0  ;;  %vm2049_vm0 = vcmp.ne.s16.totalorder %v3336_v35, 0 }
 0x2bc   : >> { %v3296_v11 = vcombine.low %v5780_v60, %v5785_v3  ;;  %vm5793_vm7 = vmand %vm1534_vm4, %vm1550_vm1  ;;  %vm2068_vm1 = vcmp.ne.s16.totalorder %v3339_v56, 0  ;;  %vm2069_vm4 = vcmp.ne.s16.totalorder %v3340_v4, 0  ;;  %v3298_v47 = vcombine.low %v5780_v60, %v5780_v60 }
 0x2bd   : >> { %v7395_v52 = vsel %vm5793_vm7, 4294967295, %v7394_v52  ;;  %vm7398_vm15 = vmand %vm7396_vm9, %vm7397_vm12  ;;  %v5809_v14 = vsel %vm5793_vm7, 0, %v5147_v57  ;;  %v7402_v57 = vmov 0 }
 0x2be   : >> { %vm5802_vm5 = vmand %vm7398_vm15, %vm1551_vm13  ;;  %1608 = vrot.lane.b32.xlu0 %v3296_v11, %s3656_s20  ;;  %vm2070_vm15 = vcmp.ne.s16.totalorder %v3341_v50, 0  ;;  %v1577_v55 = vshrl.u32 %v3296_v11, 16  ;;  %v1580_v63 = vshll.u32 %v3296_v11, 16  ;;  %v1603_v32 = vshll.u32 %v3298_v47, 16 }
 0x2bf   : >> { %v7400_v21 = vsel %vm5802_vm5, 4294967295, %v7399_v21  ;;  %v5815_v31 = vsel %vm5802_vm5, 0, %v5153_v38  ;;  %vm2053_vm11 = vmand %vm5717_vm14, %vm2049_vm0  ;;  %vm2050_vm14 = vcmp.ne.s16.totalorder %v3337_v26, 0  ;;  %vm2071_vm0 = vcmp.ne.s16.totalorder %v3342_v18, 0 }
 0x2c0   : >> { %v3297_v23 = vcombine.low %v5809_v14, %v5815_v31  ;;  %vm7401_vm13 = vmand %vm5674_vm3, %vm5706_vm2  ;;  %vm7406_vm3 = vnez %v7384_v30  ;;  %v1594_v49 = vrot.slane %v1580_v63, 1  ;;  %v1605_v56 = vrot.slane %v1603_v32, 1 }
 0x2c1   : >> { %vm5826_vm9 = vmand %vm7401_vm13, %vm2068_vm1  ;;  %vm7415_vm13 = vsmask.f32 256 }
 0x2c2   : >> { %v7403_v57 = vsel %vm5826_vm9, 4294967295, %v7402_v57  ;;  %vm5830_vm12 = vmand %vm2053_vm11, %vm2069_vm4  ;;  %v5837_v38 = vsel %vm5826_vm9, 0, %v5079_v37  ;;  %1610 = vrot.lane.b32.xlu0 %v3297_v23, %s3656_s20  ;;  %v3295_v37 = vcombine.low %v5815_v31, %v5815_v31  ;;  %v1584_v19 = vshrl.u32 %v3297_v23, 16 }
 0x2c3   : >> { %v7405_v48 = vsel %vm5830_vm12, 4294967295, %v7404_v48  ;;  %v5842_v33 = vsel %vm5830_vm12, 0, %v5085_v15  ;;  %vm2054_vm2 = vmand %vm7406_vm3, %vm2050_vm14  ;;  %v7410_v15 = vmov 0  ;;  %v1587_v36 = vshll.u32 %v3297_v23, 16 }
 0x2c4   : >> { %v3344_v28 = vcombine.low %v5837_v38, %v5842_v33  ;;  %vm5849_vm1 = vmand %vm2054_vm2, %vm2070_vm15  ;;  %v1564_v44 = vshrl.u32 %v3295_v37, 16  ;;  %v1586_v58 = vrot.slane %v1584_v19, 7  ;;  %v1595_v25 = vor.u32 %v1594_v49, %v1577_v55 }
 0x2c5   : >> { %v7408_v16 = vsel %vm5849_vm1, 4294967295, %v7407_v16  ;;  %vm7409_vm11 = vmand %vm5736_vm10, %vm5745_vm8  ;;  %v5867_v39 = vsel %vm5849_vm1, 0, %v5177_v40  ;;  %v1579_v40 = vrot.slane %v1577_v55, 7  ;;  %v1596_v1 = vrot.slane %v1587_v36, 1 }
 0x2c6   : >> { %vm5860_vm4 = vmand %vm7409_vm11, %vm2071_vm0  ;;  %2128 = vrot.lane.b32.xlu1 %v3344_v28, %s3656_s20  ;;  %v2097_v2 = vshrl.u32 %v3344_v28, 16  ;;  %v1566_v6 = vrot.slane %v1564_v44, 3  ;;  %v2100_v17 = vshll.u32 %v3344_v28, 16  ;;  %vm7413_vm10 = vnez %v7265_v24 }
 0x2c7   : >> { %v7411_v15 = vsel %vm5860_vm4, 4294967295, %v7410_v15  ;;  %v5873_v0 = vsel %vm5860_vm4, 0, %v5183_v54  ;;  %v1582_v51 = vor.u32 %v1580_v63, %v1579_v40  ;;  %v1589_v43 = vor.u32 %v1587_v36, %v1586_v58  ;;  %vm7418_vm2 = vmmov %vm7415_vm13 }
 0x2c8   : >> { %7412 = vst [vmem:[#allocation23_spill] sm:$0xff] %v7411_v15  ;;  %v3345_v10 = vcombine.low %v5867_v39, %v5873_v0  ;;  %v3343_v54 = vcombine.low %v5873_v0, %v5873_v0  ;;  %v2099_v27 = vrot.slane %v2097_v2, 7  ;;  %vm7414_vm8 = vsmask.f32 7424 }
 0x2c9   : >> { %v5888_v45 = vsel %vm7413_vm10, %v1566_v6, %v1582_v51  ;;  %v5893_v29 = vsel %vm7414_vm8, %v1595_v25, %v1596_v1  ;;  %v2114_v13 = vrot.slane %v2100_v17, 1  ;;  %v5898_v9 = vsel %vm7415_vm13, %v1579_v40, %v1589_v43  ;;  %vm7417_vm3 = vmmov %vm7414_vm8 }
 0x2ca   : >> { %2130 = vrot.lane.b32.xlu0 %v3345_v10, %s3656_s20  ;;  %1616 = vrot.lane.b32.xlu1 %v3296_v11, %s3657_s17  ;;  %v2104_v46 = vshrl.u32 %v3345_v10, 16  ;;  %v2084_v41 = vshrl.u32 %v3343_v54, 16  ;;  %v2102_v34 = vor.u32 %v2100_v17, %v2099_v27  ;;  %v2107_v61 = vshll.u32 %v3345_v10, 16 }
 0x2cb   : >> { %v1598_v30 = vor.u32 %v1596_v1, %v1584_v19  ;;  %v3346_v59 = vcombine.low %v5837_v38, %v5837_v38  ;;  %v2115_v26 = vor.u32 %v2114_v13, %v2097_v2  ;;  %vm7416_vm14 = vnez %v7275_v42 }
 0x2cc   : >> { %v2106_v20 = vrot.slane %v2104_v46, 7  ;;  %v2086_v35 = vrot.slane %v2084_v41, 3  ;;  %v2116_v11 = vrot.slane %v2107_v61, 1  ;;  %v1708_v51 = vmul.bf16 %v5893_v29, %v5888_v45 }
 0x2cd   : >> { %v5912_v50 = vsel %vm7416_vm14, %v1598_v30, %v1605_v56  ;;  %vm1714_vm8 = vcmp.gt.bf16.partialorder %v5809_v14, 1056980736  ;;  %vm7433_vm1 = vcmp.gt.bf16.partialorder %v5815_v31, 1056980736  ;;  %vm7445_vm5 = vcmp.gt.bf16.partialorder %v5842_v33, 1056980736 }
 0x2ce   : >> { %1618 = vrot.lane.b32.xlu0 %v3297_v23, %s3657_s17  ;;  %2138 = vrot.lane.b32.xlu1 %v3345_v10, %s3657_s17  ;;  %v5906_v4 = vsel %vm7413_vm10, %v2086_v35, %v2102_v34  ;;  %v2109_v18 = vor.u32 %v2107_v61, %v2106_v20  ;;  %v2123_v23 = vshll.u32 %v3346_v59, 16  ;;  %v2118_v24 = vor.u32 %v2116_v11, %v2104_v46 }
 0x2cf   : >> { %v1709_v32 = vmul.bf16 %v5912_v50, %v5898_v9 }
 0x2d0   : >> { %v5922_v37 = vsel %vm7418_vm2, %v2099_v27, %v2109_v18  ;;  %v2125_v10 = vrot.slane %v2123_v23, 1 }
 0x2d2   : >> { %2136 = vrot.lane.b32.xlu0 %v3344_v28, %s3657_s17  ;;  %1625 = vrot.lane.b32.xlu1 %v5888_v45, %s3656_s20  ;;  %v5917_v28 = vsel %vm7417_vm3, %v2115_v26, %v2116_v11  ;;  %v5928_v55 = vsel %vm7416_vm14, %v2118_v24, %v2125_v10 }
 0x2d6   : >> { %1642 = vrot.lane.b32.xlu0 %v5893_v29, %s3656_s20  ;;  %1627 = vrot.lane.b32.xlu1 %v5898_v9, %s3656_s20 }
 0x2da   : >> { %2145 = vrot.lane.b32.xlu0 %v5906_v4, %s3656_s20  ;;  %1644 = vrot.lane.b32.xlu1 %v5912_v50, %s3656_s20 }
 0x2de   : >> { %2162 = vrot.lane.b32.xlu0 %v5917_v28, %s3656_s20  ;;  %2147 = vrot.lane.b32.xlu1 %v5922_v37, %s3656_s20 }
 0x2e2   : >> { %2164 = vrot.lane.b32.xlu0 %v5928_v55, %s3656_s20  ;;  %1650 = vrot.lane.b32.xlu1 %v5893_v29, %s3657_s17 }
 0x2e6   : >> { %1652 = vrot.lane.b32.xlu0 %v5912_v50, %s3657_s17  ;;  %2170 = vrot.lane.b32.xlu1 %v5917_v28, %s3657_s17 }
 0x2ea   : >> { %1635 = vrot.lane.b32.xlu0 %v5898_v9, %s3657_s17  ;;  %1633 = vrot.lane.b32.xlu1 %v5888_v45, %s3657_s17 }
 0x2ee   : >> { %2153 = vrot.lane.b32.xlu0 %v5906_v4, %s3657_s17  ;;  %2172 = vrot.lane.b32.xlu1 %v5928_v55, %s3657_s17 }
 0x2f2   : >> { %2155 = vrot.lane.b32.xlu1 %v5922_v37, %s3657_s17 }
 0x330   : >> { %v1609_v42 = vpop.permute.xlu0 %1608 }
 0x331   : >> { %v1704_v54 = vmul.bf16 %v1609_v42, %v5888_v45 }
 0x334   : >> { %v1611_v44 = vpop.permute.xlu0 %1610 }
 0x335   : >> { %v1705_v24 = vmul.bf16 %v1611_v44, %v5898_v9 }
 0x338   : >> { %v5948_v19 = vpop.permute.xlu1 %2128 }
 0x33c   : >> { %v5950_v63 = vpop.permute.xlu0 %2130  ;;  %v5952_v40 = vpop.permute.xlu1 %1616 }
 0x33d   : >> { %v1706_v27 = vmul.bf16 %v1704_v54, %v5952_v40  ;;  %v1710_v17 = vmul.bf16 %v1708_v51, %v5952_v40 }
 0x33f   : >> { %vm1776_vm15 = vcmp.eq.bf16.partialorder %v1706_v27, 0  ;;  %vm1796_vm0 = vcmp.eq.bf16.partialorder %v1710_v17, 0 }
 0x340   : >> { %v5954_v2 = vpop.permute.xlu0 %1618  ;;  %v5956_v36 = vpop.permute.xlu1 %2138 }
 0x344   : >> { %v5958_v58 = vpop.permute.xlu0 %2136  ;;  %v1626_v6 = vpop.permute.xlu1 %1625 }
 0x345   : >> { %v1658_v1 = vadd.bf16 %v1626_v6, %v5888_v45  ;;  %v1672_v43 = vmul.bf16 %v1626_v6, %v5888_v45  ;;  %v1674_v46 = vmul.bf16 %v1626_v6, %v1609_v42 }
 0x347   : >> { %v1660_v20 = vadd.bf16 %v1658_v1, %v1609_v42  ;;  %v1676_v35 = vadd.bf16 %v1674_v46, %v1672_v43  ;;  %v5984_v1 = vsel %vm1776_vm15, 65537, %v7118_v12 }
 0x348   : >> { %v1643_v49 = vpop.permute.xlu0 %1642  ;;  %v1628_v47 = vpop.permute.xlu1 %1627 }
 0x349   : >> { %v1659_v25 = vadd.bf16 %v1628_v47, %v5898_v9  ;;  %v1673_v13 = vmul.bf16 %v1628_v47, %v5898_v9  ;;  %v1675_v30 = vmul.bf16 %v1628_v47, %v1611_v44  ;;  %v1678_v54 = vmul.bf16 %v1643_v49, %v1609_v42 }
 0x34a   : >> { %v1662_v27 = vadd.bf16 %v1660_v20, %v1643_v49  ;;  %v1682_v8 = vmul.bf16 %v1643_v49, %v5893_v29 }
 0x34b   : >> { %v1661_v59 = vadd.bf16 %v1659_v25, %v1611_v44  ;;  %v1677_v43 = vadd.bf16 %v1675_v30, %v1673_v13  ;;  %v1680_v25 = vadd.bf16 %v1678_v54, %v1676_v35 }
 0x34c   : >> { %v2146_v41 = vpop.permute.xlu0 %2145  ;;  %v1645_v34 = vpop.permute.xlu1 %1644 }
 0x34d   : >> { %v2178_v61 = vadd.bf16 %v2146_v41, %v5906_v4  ;;  %v2192_v56 = vmul.bf16 %v2146_v41, %v5906_v4  ;;  %v2194_v26 = vmul.bf16 %v2146_v41, %v5948_v19  ;;  %v1679_v23 = vmul.bf16 %v1645_v34, %v1611_v44 }
 0x34e   : >> { %v5989_v44 = vsel %vm1796_vm0, 65537, %v7118_v12  ;;  %v5992_v41 = vmul.bf16 %v1705_v24, %v5954_v2  ;;  %v1663_v42 = vadd.bf16 %v1661_v59, %v1645_v34  ;;  %v6001_v24 = vmul.bf16 %v1709_v32, %v5954_v2 }
 0x34f   : >> { %v2180_v11 = vadd.bf16 %v2178_v61, %v5948_v19  ;;  %v2196_v61 = vadd.bf16 %v2194_v26, %v2192_v56  ;;  %v1681_v10 = vadd.bf16 %v1679_v23, %v1677_v43  ;;  %v1683_v59 = vmul.bf16 %v1645_v34, %v5912_v50 }
 0x350   : >> { %v2163_v18 = vpop.permute.xlu0 %2162  ;;  %v2148_v51 = vpop.permute.xlu1 %2147  ;;  %v1665_v26 = vadd.bf16 %v1663_v42, %v5912_v50  ;;  %v1664_v32 = vadd.bf16 %v1662_v27, %v5893_v29 }
 0x351   : >> { %v2198_v46 = vmul.bf16 %v2163_v18, %v5948_v19  ;;  %v2182_v6 = vadd.bf16 %v2180_v11, %v2163_v18  ;;  %v2179_v13 = vadd.bf16 %v2148_v51, %v5922_v37  ;;  %v2193_v30 = vmul.bf16 %v2148_v51, %v5922_v37 }
 0x352   : >> { %v2195_v17 = vmul.bf16 %v2148_v51, %v5950_v63  ;;  %v1684_v11 = vadd.bf16 %v1682_v8, %v1680_v25  ;;  %v2202_v23 = vmul.bf16 %v2163_v18, %v5917_v28  ;;  %v1685_v54 = vadd.bf16 %v1683_v59, %v1681_v10 }
 0x353   : >> { %v2200_v35 = vadd.bf16 %v2198_v46, %v2196_v61  ;;  %v2184_v43 = vadd.bf16 %v2182_v6, %v5917_v28  ;;  %v2181_v34 = vadd.bf16 %v2179_v13, %v5950_v63 }
 0x354   : >> { %v5994_v47 = vpop.permute.xlu0 %2164  ;;  %v1651_v22 = vpop.permute.xlu1 %1650  ;;  %v2197_v46 = vadd.bf16 %v2195_v17, %v2193_v30 }
 0x355   : >> { %v1686_v56 = vmul.bf16 %v1651_v22, %v5893_v29  ;;  %v2204_v53 = vadd.bf16 %v2202_v23, %v2200_v35  ;;  %v2199_v18 = vmul.bf16 %v5994_v47, %v5950_v63  ;;  %v2203_v25 = vmul.bf16 %v5994_v47, %v5928_v55 }
 0x356   : >> { %v1666_v42 = vadd.bf16 %v1664_v32, %v1651_v22 }
 0x357   : >> { %v1688_v49 = vadd.bf16 %v1686_v56, %v1684_v11  ;;  %v2183_v56 = vadd.bf16 %v2181_v34, %v5994_v47 }
 0x358   : >> { %v1653_v51 = vpop.permute.xlu0 %1652  ;;  %v2171_v7 = vpop.permute.xlu1 %2170  ;;  %v1668_v47 = vadd.bf16 %v1666_v42, %v5952_v40 }
 0x359   : >> { %v1667_v61 = vadd.bf16 %v1665_v26, %v1653_v51  ;;  %v1687_v20 = vmul.bf16 %v1653_v51, %v5912_v50  ;;  %v2186_v15 = vadd.bf16 %v2184_v43, %v2171_v7  ;;  %v2206_v8 = vmul.bf16 %v2171_v7, %v5917_v28 }
 0x35a   : >> { %v1691_v29 = vmul.bf16 %v1653_v51, %v5954_v2  ;;  %v1690_v50 = vmul.bf16 %v1651_v22, %v5952_v40  ;;  %v2210_v26 = vmul.bf16 %v2171_v7, %v5958_v58 }
 0x35b   : >> { %v1689_v10 = vadd.bf16 %v1687_v20, %v1685_v54  ;;  %v1669_v6 = vadd.bf16 %v1667_v61, %v5954_v2  ;;  %v2208_v13 = vadd.bf16 %v2206_v8, %v2204_v53  ;;  %v2188_v11 = vadd.bf16 %v2186_v15, %v5958_v58 }
 0x35c   : >> { %v1636_v27 = vpop.permute.xlu0 %1635  ;;  %v1634_v59 = vpop.permute.xlu1 %1633  ;;  %v1692_v20 = vadd.bf16 %v1690_v50, %v1688_v49  ;;  %v2201_v49 = vadd.bf16 %v2199_v18, %v2197_v46  ;;  %v6033_v15 = vadd.bf16 %v2183_v56, %v5928_v55 }
 0x35d   : >> { %v1693_v30 = vadd.bf16 %v1691_v29, %v1689_v10  ;;  %v1671_v17 = vadd.bf16 %v1669_v6, %v1636_v27  ;;  %v1695_v35 = vmul.bf16 %v1636_v27, %v5954_v2  ;;  %v1694_v23 = vmul.bf16 %v1634_v59, %v5952_v40 }
 0x35e   : >> { %v1699_v51 = vmul.bf16 %v1636_v27, %v5898_v9  ;;  %v2212_v2 = vadd.bf16 %v2210_v26, %v2208_v13  ;;  %v1670_v61 = vadd.bf16 %v1668_v47, %v1634_v59  ;;  %v1698_v8 = vmul.bf16 %v1634_v59, %v5888_v45 }
 0x35f   : >> { %v1697_v54 = vadd.bf16 %v1695_v35, %v1693_v30  ;;  %vm1717_vm11 = vcmp.ge.bf16.partialorder %v1671_v17, 1073758208  ;;  %vm1737_vm10 = vcmp.le.bf16.partialorder %v1671_v17, 1086341312  ;;  %v1696_v7 = vadd.bf16 %v1694_v23, %v1692_v20 }
 0x360   : >> { %v1719_v53 = vsel %vm1717_vm11, 65537, %v7118_v12  ;;  %v1739_v22 = vsel %vm1737_vm10, 65537, %v7118_v12  ;;  %v2154_v32 = vpop.permute.xlu0 %2153  ;;  %vm1716_vm15 = vcmp.ge.bf16.partialorder %v1670_v61, 1073758208  ;;  %v2205_v56 = vadd.bf16 %v2203_v25, %v2201_v49  ;;  %v2173_v20 = vpop.permute.xlu1 %2172 }
 0x361   : >> { %v1701_v43 = vadd.bf16 %v1699_v51, %v1697_v54  ;;  %v2190_v34 = vadd.bf16 %v2188_v11, %v2154_v32  ;;  %v2214_v9 = vmul.bf16 %v2154_v32, %v5958_v58  ;;  %v3301_v29 = vcombine.low %v1719_v53, %v1719_v53 }
 0x362   : >> { %v3302_v6 = vcombine.high %v1719_v53, %v1719_v53  ;;  %v3305_v40 = vcombine.low %v1739_v22, %v1739_v22  ;;  %v2218_v18 = vmul.bf16 %v2154_v32, %v5906_v4  ;;  %v1700_v50 = vadd.bf16 %v1698_v8, %v1696_v7 }
 0x363   : >> { %v1703_v10 = vsub.bf16 %v1671_v17, %v1701_v43  ;;  %v2216_v46 = vadd.bf16 %v2214_v9, %v2212_v2  ;;  %vm2236_vm3 = vcmp.ge.bf16.partialorder %v2190_v34, 1073758208  ;;  %vm2256_vm2 = vcmp.le.bf16.partialorder %v2190_v34, 1086341312 }
 0x364   : >> { %v2238_v42 = vsel %vm2236_vm3, 65537, %v7118_v12  ;;  %v2258_v45 = vsel %vm2256_vm2, 65537, %v7118_v12  ;;  %vm6049_vm14 = vcmp.ne.s16.totalorder %v3301_v29, 0  ;;  %v3306_v59 = vcombine.high %v1739_v22, %v1739_v22 }
 0x365   : >> { %vm1757_vm0 = vcmp.eq.bf16.partialorder %v1703_v10, 1065369472  ;;  %v2220_v13 = vadd.bf16 %v2218_v18, %v2216_v46  ;;  %v3347_v30 = vcombine.low %v2238_v42, %v2238_v42  ;;  %v3348_v17 = vcombine.high %v2238_v42, %v2238_v42  ;;  %vm6081_vm4 = vmand %vm1714_vm8, %vm6049_vm14  ;;  %v2156_v18 = vpop.permute.xlu1 %2155 }
 0x366   : >> { %v6045_v27 = vsel %vm1757_vm0, 65537, %v7118_v12  ;;  %vm6054_vm2 = vcmp.ne.s16.totalorder %v3302_v6, 0  ;;  %vm6058_vm0 = vcmp.ne.s16.totalorder %v3305_v40, 0  ;;  %v3351_v25 = vcombine.low %v2258_v45, %v2258_v45 }
 0x367   : >> { %v3309_v23 = vcombine.low %v6045_v27, %v6045_v27  ;;  %v2222_v54 = vsub.bf16 %v2190_v34, %v2220_v13  ;;  %vm6064_vm10 = vcmp.ne.s16.totalorder %v3347_v30, 0  ;;  %v3352_v53 = vcombine.high %v2258_v45, %v2258_v45 }
 0x368   : >> { %v1702_v22 = vsub.bf16 %v1670_v61, %v1700_v50  ;;  %vm6068_vm3 = vcmp.ne.s16.totalorder %v3348_v17, 0  ;;  %v1718_v47 = vsel %vm1716_vm15, 65537, %v7118_v12  ;;  %vm1736_vm13 = vcmp.le.bf16.partialorder %v1670_v61, 1086341312  ;;  %vm6091_vm15 = vmand %vm7433_vm1, %vm6054_vm2 }
 0x369   : >> { %vm6072_vm11 = vcmp.eq.bf16.partialorder %v2222_v54, 1065369472  ;;  %v3299_v43 = vcombine.low %v1718_v47, %v1718_v47  ;;  %v3300_v7 = vcombine.high %v1718_v47, %v1718_v47  ;;  %v1738_v34 = vsel %vm1736_vm13, 65537, %v7118_v12  ;;  %vm6120_vm7 = vmand %vm7445_vm5, %vm6068_vm3 }
 0x36a   : >> { %v2187_v9 = vadd.bf16 %v6033_v15, %v2173_v20  ;;  %v7434_v61 = vmov 0  ;;  %vm6095_vm12 = vcmp.ne.s16.totalorder %v3306_v59, 0  ;;  %v7436_v8 = vmov 0 }
 0x36b   : >> { %v7435_v61 = vsel %vm6091_vm15, 4294967295, %v7434_v61  ;;  %v7437_v8 = vsel %vm6095_vm12, 4294967295, %v7436_v8  ;;  %vm6099_vm8 = vcmp.ne.s16.totalorder %v3309_v23, 0  ;;  %v3303_v29 = vcombine.low %v1738_v34, %v1738_v34  ;;  %vm1754_vm15 = vmand %vm6081_vm4, %vm6058_vm0 }
 0x36c   : >> { %v3304_v6 = vcombine.high %v1738_v34, %v1738_v34  ;;  %vm7440_vm13 = vcmp.gt.bf16.partialorder %v5837_v38, 1056980736  ;;  %vm6111_vm1 = vcmp.ne.s16.totalorder %v3351_v25, 0  ;;  %v7443_v40 = vmov 0 }
 0x36d   : >> { %vm6107_vm14 = vmand %vm7440_vm13, %vm6064_vm10  ;;  %v7444_v40 = vsel %vm6111_vm1, 4294967295, %v7443_v40  ;;  %vm1728_vm2 = vcmp.ne.s16.totalorder %v3299_v43, 0  ;;  %vm1756_vm9 = vcmp.eq.bf16.partialorder %v1702_v22, 1065369472  ;;  %v2207_v46 = vmul.bf16 %v2173_v20, %v5928_v55 }
 0x36e   : >> { %vm6124_vm10 = vcmp.ne.s16.totalorder %v3352_v53, 0  ;;  %v7448_v45 = vmov 0  ;;  %v2278_v50 = vsel %vm6072_vm11, 65537, %v7118_v12  ;;  %vm6131_vm13 = vcmp.ne.s16.totalorder %v3300_v7, 0 }
 0x36f   : >> { %v7449_v45 = vsel %vm6124_vm10, 4294967295, %v7448_v45  ;;  %vm6135_vm6 = vcmp.ne.s16.totalorder %v3303_v29, 0  ;;  %vm7454_vm5 = vcmp.gt.bf16.partialorder %v5780_v60, 1056980736  ;;  %v1758_v35 = vsel %vm1756_vm9, 65537, %v7118_v12 }
 0x370   : >> { %vm6141_vm3 = vmand %vm7454_vm5, %vm1728_vm2  ;;  %v2209_v59 = vadd.bf16 %v2207_v46, %v2205_v56  ;;  %v2211_v26 = vmul.bf16 %v2173_v20, %v5956_v36  ;;  %v2189_v23 = vadd.bf16 %v2187_v9, %v5956_v36  ;;  %vm6153_vm12 = vcmp.ne.s16.totalorder %v3304_v6, 0 }
 0x371   : >> { %v3307_v51 = vcombine.low %v1758_v35, %v1758_v35  ;;  %v3308_v25 = vcombine.high %v1758_v35, %v1758_v35  ;;  %v2215_v56 = vmul.bf16 %v2156_v18, %v5956_v36  ;;  %v7459_v20 = vcombine.low %v5984_v1, %v5984_v1  ;;  %vm6186_vm5 = vmand %vm1754_vm15, %vm6099_vm8 }
 0x372   : >> { %v7460_v53 = vmov 0  ;;  %vm7462_vm0 = vcmp.gt.bf16.partialorder %v5785_v3, 1056980736  ;;  %v2213_v22 = vadd.bf16 %v2211_v26, %v2209_v59  ;;  %v2191_v2 = vadd.bf16 %v2189_v23, %v2156_v18 }
 0x373   : >> { %vm6162_vm2 = vcmp.ne.s16.totalorder %v7459_v20, 0  ;;  %vm6175_vm9 = vmand %vm7462_vm0, %vm6131_vm13  ;;  %vm7465_vm11 = vcmp.eq.bf16.partialorder %v5992_v41, 0  ;;  %v7466_v47 = vmov 0  ;;  %v3355_v49 = vcombine.low %v2278_v50, %v2278_v50 }
 0x374   : >> { %v7461_v53 = vsel %vm6162_vm2, 4294967295, %v7460_v53  ;;  %v6182_v32 = vsel %vm7465_vm11, 65537, %v7118_v12  ;;  %v7467_v47 = vsel %vm6186_vm5, 4294967295, %v7466_v47  ;;  %vm1752_vm0 = vmand %vm6141_vm3, %vm6135_vm6  ;;  %vm1768_vm4 = vcmp.ne.s16.totalorder %v3307_v51, 0 }
 0x375   : >> { %vm1769_vm11 = vcmp.ne.s16.totalorder %v3308_v25, 0  ;;  %vm7469_vm15 = vnez %v7435_v61  ;;  %vm1753_vm5 = vmand %vm6175_vm9, %vm6153_vm12  ;;  %v2217_v41 = vadd.bf16 %v2215_v56, %v2213_v22  ;;  %v2219_v43 = vmul.bf16 %v2156_v18, %v5922_v37  ;;  %v7590_v22 = vld [vmem:[#allocation15_spill] sm:$0xff] }
 0x376   : >> { %vm2237_vm13 = vcmp.ge.bf16.partialorder %v2191_v2, 1073758208  ;;  %vm2257_vm10 = vcmp.le.bf16.partialorder %v2191_v2, 1086341312  ;;  %v3310_v7 = vcombine.high %v6045_v27, %v6045_v27  ;;  %v3356_v34 = vcombine.high %v2278_v50, %v2278_v50  ;;  %vm6209_vm6 = vmand %vm1752_vm0, %vm1768_vm4 }
 0x377   : >> { %v7470_v9 = vmov 0  ;;  %v2239_v10 = vsel %vm2237_vm13, 65537, %v7118_v12  ;;  %v2259_v29 = vsel %vm2257_vm10, 65537, %v7118_v12  ;;  %vm6215_vm3 = vmand %vm1753_vm5, %vm1769_vm11  ;;  %v7472_v6 = vmov 0 }
 0x378   : >> { %v7471_v9 = vsel %vm6209_vm6, 4294967295, %v7470_v9  ;;  %v7473_v6 = vsel %vm6215_vm3, 4294967295, %v7472_v6  ;;  %v2221_v46 = vadd.bf16 %v2219_v43, %v2217_v41  ;;  %v3349_v18 = vcombine.low %v2239_v10, %v2239_v10 }
 0x379   : >> { %v3350_v13 = vcombine.high %v2239_v10, %v2239_v10  ;;  %v3353_v30 = vcombine.low %v2259_v29, %v2259_v29  ;;  %v7474_v27 = vcombine.high %v5984_v1, %v5984_v1  ;;  %v7475_v50 = vmov 0 }
 0x37a   : >> { %v7477_v17 = vmul.bf16 %v5948_v19, %v5906_v4  ;;  %vm6230_vm10 = vcmp.ne.s16.totalorder %v3355_v49, 0  ;;  %v3354_v26 = vcombine.high %v2259_v29, %v2259_v29  ;;  %v2223_v1 = vsub.bf16 %v2191_v2, %v2221_v46 }
 0x37b   : >> { %vm6222_vm12 = vcmp.ne.s16.totalorder %v7474_v27, 0  ;;  %vm2250_vm4 = vcmp.ne.s16.totalorder %v3349_v18, 0  ;;  %vm2251_vm13 = vcmp.ne.s16.totalorder %v3350_v13, 0  ;;  %vm6242_vm0 = vcmp.ne.s16.totalorder %v3353_v30, 0 }
 0x37c   : >> { %v7476_v50 = vsel %vm6222_vm12, 4294967295, %v7475_v50  ;;  %v2226_v35 = vmul.bf16 %v7477_v17, %v5958_v58  ;;  %v3313_v23 = vcombine.low %v6182_v32, %v6182_v32  ;;  %v7482_v54 = vmul.bf16 %v5950_v63, %v5922_v37 }
 0x37d   : >> { %vm6252_vm11 = vcmp.ne.s16.totalorder %v3356_v34, 0  ;;  %vm7485_vm5 = vcmp.gt.bf16.partialorder %v5867_v39, 1056980736  ;;  %vm6262_vm8 = vcmp.ne.s16.totalorder %v3354_v26, 0  ;;  %v7488_v20 = vmov 0 }
 0x37e   : >> { %v2227_v51 = vmul.bf16 %v7482_v54, %v5956_v36  ;;  %vm6258_vm9 = vmand %vm7485_vm5, %vm2250_vm4  ;;  %v7489_v20 = vsel %vm6262_vm8, 4294967295, %v7488_v20  ;;  %vm7490_vm12 = vcmp.eq.bf16.partialorder %v6001_v24, 0  ;;  %v2229_v63 = vmul.bf16 %v5928_v55, %v5922_v37 }
 0x37f   : >> { %v1799_v11 = vsel %vm7490_vm12, 65537, %v7118_v12  ;;  %vm6271_vm3 = vcmp.ne.s16.totalorder %v3310_v7, 0  ;;  %vm7493_vm5 = vcmp.gt.bf16.partialorder %v5873_v0, 1056980736  ;;  %v7494_v2 = vmov 0  ;;  %vm7512_vm8 = vmand %vm6258_vm9, %vm6242_vm0 }
 0x380   : >> { %vm6277_vm4 = vmand %vm7493_vm5, %vm2251_vm13  ;;  %vm2277_vm2 = vcmp.eq.bf16.partialorder %v2223_v1, 1065369472  ;;  %v3314_v49 = vcombine.high %v6182_v32, %v6182_v32  ;;  %v7496_v24 = vmul.bf16 %v5917_v28, %v5906_v4  ;;  %vm2296_vm12 = vcmp.eq.bf16.partialorder %v2226_v35, 0 }
 0x381   : >> { %v7495_v2 = vsel %vm6277_vm4, 4294967295, %v7494_v2  ;;  %vm7497_vm6 = vnez %v7444_v40  ;;  %v7499_v37 = vmov 0  ;;  %v2279_v4 = vsel %vm2277_vm2, 65537, %v7118_v12 }
 0x382   : >> { %v2230_v41 = vmul.bf16 %v7496_v24, %v5958_v58  ;;  %vm7498_vm13 = vmand %vm6107_vm14, %vm7497_vm6  ;;  %v3315_v28 = vcombine.low %v5989_v44, %v5989_v44  ;;  %v3316_v55 = vcombine.high %v5989_v44, %v5989_v44  ;;  %vm7501_vm14 = vnez %v7449_v45 }
 0x383   : >> { %vm6294_vm5 = vmand %vm7498_vm13, %vm6230_vm10  ;;  %v7503_v58 = vmov 0  ;;  %v3357_v15 = vcombine.low %v2279_v4, %v2279_v4  ;;  %vm6322_vm13 = vcmp.ne.s16.totalorder %v3313_v23, 0  ;;  %v3317_v44 = vcombine.low %v1799_v11, %v1799_v11 }
 0x384   : >> { %v7500_v37 = vsel %vm6294_vm5, 4294967295, %v7499_v37  ;;  %vm7502_vm6 = vmand %vm6120_vm7, %vm7501_vm14  ;;  %v2231_v42 = vmul.bf16 %v2229_v63, %v5956_v36  ;;  %vm2297_vm1 = vcmp.eq.bf16.partialorder %v2227_v51, 0  ;;  %vm7507_vm7 = vnez %v7437_v8 }
 0x385   : >> { %vm6314_vm10 = vmand %vm7502_vm6, %vm6252_vm11  ;;  %v2298_v32 = vsel %vm2296_vm12, 65537, %v7118_v12  ;;  %v3358_v43 = vcombine.high %v2279_v4, %v2279_v4  ;;  %vm2290_vm6 = vcmp.ne.s16.totalorder %v3357_v15, 0  ;;  %vm7511_vm2 = vnez %v7467_v47 }
 0x386   : >> { %v7504_v58 = vsel %vm6314_vm10, 4294967295, %v7503_v58  ;;  %vm7508_vm11 = vmand %vm7469_vm15, %vm7507_vm7  ;;  %vm2316_vm5 = vcmp.eq.bf16.partialorder %v2230_v41, 0  ;;  %v7513_v36 = vmov 0  ;;  %v7515_v61 = vmov 0 }
 0x387   : >> { %vm6334_vm14 = vmand %vm7508_vm11, %vm6271_vm3  ;;  %vm6352_vm3 = vcmp.ne.s16.totalorder %v3314_v49, 0  ;;  %v3318_v8 = vcombine.high %v1799_v11, %v1799_v11  ;;  %vm1808_vm12 = vcmp.ne.s16.totalorder %v3315_v28, 0  ;;  %v2299_v7 = vsel %vm2297_vm1, 65537, %v7118_v12 }
 0x388   : >> { %vm6348_vm15 = vmand %vm7512_vm8, %vm2290_vm6  ;;  %v7516_v61 = vsel %vm6352_vm3, 4294967295, %v7515_v61  ;;  %vm1809_vm11 = vcmp.ne.s16.totalorder %v3316_v55, 0  ;;  %vm1810_vm10 = vcmp.ne.s16.totalorder %v3317_v44, 0  ;;  %v3359_v34 = vcombine.low %v2298_v32, %v2298_v32 }
 0x389   : >> { %v7514_v36 = vsel %vm6348_vm15, 4294967295, %v7513_v36  ;;  %vm7517_vm8 = vnez %v7471_v9  ;;  %vm7518_vm0 = vnez %v7461_v53  ;;  %v3360_v29 = vcombine.high %v2298_v32, %v2298_v32 }
 0x38a   : >> { %vm7519_vm6 = vmand %vm7517_vm8, %vm7518_vm0  ;;  %v2318_v46 = vsel %vm2316_vm5, 65537, %v7118_v12  ;;  %vm6371_vm1 = vcmp.ne.s16.totalorder %v3358_v43, 0  ;;  %vm7524_vm7 = vnez %v7473_v6  ;;  %vm7525_vm9 = vnez %v7476_v50 }
 0x38b   : >> { %vm6366_vm15 = vmand %vm7519_vm6, %vm1808_vm12  ;;  %v3361_v13 = vcombine.low %v2299_v7, %v2299_v7  ;;  %vm1811_vm12 = vcmp.ne.s16.totalorder %v3318_v8, 0  ;;  %v3362_v27 = vcombine.high %v2299_v7, %v2299_v7  ;;  %v3363_v17 = vcombine.low %v2318_v46, %v2318_v46 }
 0x38c   : >> { %vm7526_vm4 = vmand %vm7524_vm7, %vm7525_vm9  ;;  %v1816_v53 = vsel %vm6366_vm15, 0, %v5780_v60  ;;  %v7534_v60 = vmov 0  ;;  %vm6431_vm6 = vcmp.ne.s16.totalorder %v3360_v29, 0  ;;  %v3364_v26 = vcombine.high %v2318_v46, %v2318_v46 }
 0x38d   : >> { %vm6380_vm3 = vmand %vm7526_vm4, %vm1809_vm11  ;;  %2352 = vst [vmem:[#allocation2] sm:$0xf] %v1816_v53  ;;  %vm7532_vm4 = vnez %v7516_v61  ;;  %v7553_v54 = vmov 0  ;;  %v7555_v51 = vmov 0  ;;  %v7557_v56 = vmov 0 }
 0x38e   : >> { %vm7529_vm5 = vmand %vm7511_vm2, %vm6322_vm13  ;;  %v1817_v30 = vsel %vm6380_vm3, 0, %v5785_v3  ;;  %vm6413_vm2 = vcmp.ne.s16.totalorder %v3359_v34, 0  ;;  %vm7539_vm13 = vnez %v7495_v2  ;;  %v7559_v11 = vmov 0  ;;  %v7592_v2 = vld [vmem:[#allocation19_spill] sm:$0xff] }
 0x38f   : >> { %vm6392_vm8 = vmand %vm7529_vm5, %vm1810_vm10  ;;  %vm7536_vm10 = vcmp.eq.bf16.partialorder %v2231_v42, 0  ;;  %2353 = vst [vmem:[#allocation2 + $0x4] sm:$0xf] %v1817_v30  ;;  %v3659_v28 = vmov 0.0  }
 0x390   : >> { %vm7533_vm7 = vmand %vm6334_vm14, %vm7532_vm4  ;;  %v1818_v47 = vsel %vm6392_vm8, 0, %v5809_v14  ;;  %v2319_v50 = vsel %vm7536_vm10, 65537, %v7118_v12  ;;  %vm7540_vm14 = vnez %v7489_v20  ;;  %vm6439_vm4 = vcmp.ne.s16.totalorder %v3361_v13, 0 }
 0x391   : >> { %vm6404_vm11 = vmand %vm7533_vm7, %vm1811_vm12  ;;  %2354 = vst [vmem:[#allocation2 + $0x8] sm:$0xf] %v1818_v47  ;;  %vm7546_vm12 = vnez %v7500_v37  ;;  %v3365_v1 = vcombine.low %v2319_v50, %v2319_v50  ;;  %vm6447_vm10 = vcmp.ne.s16.totalorder %v3362_v27, 0  ;;  %v3366_v23 = vcombine.high %v2319_v50, %v2319_v50 }
 0x392   : >> { %v7535_v60 = vsel %vm6404_vm11, 4294967295, %v7534_v60  ;;  %v1819_v35 = vsel %vm6404_vm11, 0, %v5815_v31  ;;  %vm7541_vm9 = vmand %vm7539_vm13, %vm7540_vm14  ;;  %vm7552_vm13 = vnez %v7514_v36  ;;  %vm2328_vm14 = vcmp.ne.s16.totalorder %v3363_v17, 0 }
 0x393   : >> { %vm6427_vm0 = vmand %vm7541_vm9, %vm6371_vm1  ;;  %2355 = vst [vmem:[#allocation2 + $0xc] sm:$0xf] %v1819_v35  ;;  %vm7549_vm1 = vnez %v7504_v58 }
 0x394   : >> { %vm2312_vm5 = vmand %vm7546_vm12, %vm6413_vm2  ;;  %vm2329_vm12 = vcmp.ne.s16.totalorder %v3364_v26, 0 }
 0x395   : >> { %vm2313_vm7 = vmand %vm7549_vm1, %vm6431_vm6  ;;  %vm2330_vm6 = vcmp.ne.s16.totalorder %v3365_v1, 0 }
 0x396   : >> { %vm2314_vm2 = vmand %vm7552_vm13, %vm6439_vm4  ;;  %vm2331_vm4 = vcmp.ne.s16.totalorder %v3366_v23, 0 }
 0x397   : >> { %vm2315_vm9 = vmand %vm6427_vm0, %vm6447_vm10  ;;  %vm7562_vm10 = vnez %v7392_v5  ;;  %v7575_v5 = vld [vmem:[#allocation20_spill] sm:$0xff] }
 0x398   : >> { %vm6459_vm11 = vmand %vm2312_vm5, %vm2328_vm14  ;;  %vm7561_vm5 = vnez %v7390_v62  ;;  %vm7563_vm14 = vnez %v7395_v52  ;;  %v7569_v62 = vld [vmem:[#allocation23_spill] sm:$0xff]  ;;  %v7577_v52 = vld [vmem:[#allocation16_spill] sm:$0xff] }
 0x399   : >> { %v7554_v54 = vsel %vm6459_vm11, 4294967295, %v7553_v54  ;;  %vm6463_vm1 = vmand %vm2313_vm7, %vm2329_vm12  ;;  %v2336_v25 = vsel %vm6459_vm11, 0, %v5837_v38  ;;  %vm7564_vm12 = vnez %v7535_v60 }
 0x39a   : >> { %v7556_v51 = vsel %vm6463_vm1, 4294967295, %v7555_v51  ;;  %vm6470_vm13 = vmand %vm2314_vm2, %vm2330_vm6  ;;  %v2337_v20 = vsel %vm6463_vm1, 0, %v5842_v33  ;;  %2356 = vst [vmem:[#allocation3] sm:$0xf] %v2336_v25  ;;  %vm7565_vm6 = vnez %v7400_v21  ;;  %vm7568_vm1 = vnez %v7408_v16  ;;  %v7580_v21 = vld [vmem:[#allocation21_spill] sm:$0xff]  ;;  %v7585_v33 = vld [vmem:[#allocation22_spill] sm:$0xff] }
 0x39b   : >> { %v7558_v56 = vsel %vm6470_vm13, 4294967295, %v7557_v56  ;;  %vm6477_vm0 = vmand %vm2315_vm9, %vm2331_vm4  ;;  %v2338_v63 = vsel %vm6470_vm13, 0, %v5867_v39  ;;  %2357 = vst [vmem:[#allocation3 + $0x4] sm:$0xf] %v2337_v20  ;;  %v7587_v16 = vld [vmem:[#allocation18_spill] sm:$0xff] }
 0x39c   : >> { %v7560_v11 = vsel %vm6477_vm0, 4294967295, %v7559_v11  ;;  %v2339_v38 = vsel %vm6477_vm0, 0, %v5873_v0  ;;  %vm2340_vm7 = vmor %vm7561_vm5, %vm6366_vm15  ;;  %2358 = vst [vmem:[#allocation3 + $0x8] sm:$0xf] %v2338_v63  ;;  %vm7566_vm0 = vnez %v7403_v57  ;;  %vm7567_vm5 = vnez %v7405_v48  ;;  %v7582_v57 = vld [vmem:[#allocation17_spill] sm:$0xff] }
 0x39d   : >> { %vm2341_vm2 = vmor %vm7562_vm10, %vm6380_vm3  ;;  %2359 = vst [vmem:[#allocation3 + $0xc] sm:$0xf] %v2339_v38  ;;  %vm7570_vm10 = vnez %v7569_v62 }
 0x39e   : >> { %vm2342_vm9 = vmor %vm7563_vm14, %vm6392_vm8  ;;  %vm7571_vm8 = vnez %v7554_v54 }
 0x39f   : >> { %vm2343_vm4 = vmor %vm7565_vm6, %vm7564_vm12  ;;  %vm7572_vm6 = vnez %v7556_v51 }
 0x3a0   : >> { %vm2344_vm15 = vmor %vm2340_vm7, %vm7566_vm0  ;;  %vm7573_vm0 = vnez %v7558_v56 }
 0x3a1   : >> { %vm2345_vm13 = vmor %vm2341_vm2, %vm7567_vm5  ;;  %vm7574_vm2 = vnez %v7560_v11 }
 0x3a2   : >> { %vm2346_vm3 = vmor %vm2342_vm9, %vm7568_vm1  ;;  %vm7576_vm1 = vnez %v7575_v5  ;;  %vm7578_vm9 = vnez %v7577_v52 }
 0x3a3   : >> { %vm2347_vm11 = vmor %vm2343_vm4, %vm7570_vm10 }
 0x3a4   : >> { %vm2348_vm14 = vmor %vm2344_vm15, %vm7571_vm8  ;;  %vm7581_vm8 = vnez %v7580_v21  ;;  %vm7583_vm15 = vnez %v7582_v57 }
 0x3a5   : >> { %vm2349_vm12 = vmor %vm2345_vm13, %vm7572_vm6 }
 0x3a6   : >> { %vm2350_vm7 = vmor %vm2346_vm3, %vm7573_vm0  ;;  %vm7586_vm0 = vnez %v7585_v33  ;;  %vm7588_vm3 = vnez %v7587_v16 }
 0x3a7   : >> { %vm2351_vm5 = vmor %vm2347_vm11, %vm7574_vm2 }
 0x3a8   : >> { %vm7579_vm4 = vmor %vm7576_vm1, %vm7578_vm9  ;;  %vm7591_vm1 = vnez %v7590_v22 }
 0x3a9   : >> { %vm2360_vm10 = vmor %vm7579_vm4, %vm2348_vm14  ;;  %vm7593_vm14 = vnez %v7592_v2 }
 0x3aa   : >> { %vm7584_vm6 = vmor %vm7581_vm8, %vm7583_vm15  ;;  %v2364_v48 = vsel %vm2360_vm10, 65537, %v7118_v12 }
 0x3ab   : >> { %vm2361_vm13 = vmor %vm7584_vm6, %vm2349_vm12  ;;  %v2368_v0 = vunpack.c.l.b16 %v2364_v48 }
 0x3ac   : >> { %vm7589_vm2 = vmor %vm7586_vm0, %vm7588_vm3  ;;  %v2365_v39 = vsel %vm2361_vm13, 65537, %v7118_v12 }
 0x3ad   : >> { %vm2362_vm11 = vmor %vm7589_vm2, %vm2350_vm7  ;;  %v2369_v24 = vunpack.c.l.b16 %v2365_v39  ;;  %vm2372_vm12 = vcmp.ne.s32.totalorder %v2368_v0, 0 }
 0x3ae   : >> { %vm7594_vm9 = vmor %vm7591_vm1, %vm7593_vm14  ;;  %v2366_v49 = vsel %vm2362_vm11, 65537, %v7118_v12  ;;  %v3367_v55 = vsel %vm2372_vm12, 1.0, %v3659_v28 }
 0x3af   : >> { %vm2363_vm4 = vmor %vm7594_vm9, %vm2351_vm5  ;;  %v2370_v37 = vunpack.c.l.b16 %v2366_v49  ;;  %vm2373_vm10 = vcmp.ne.s32.totalorder %v2369_v24, 0 }
 0x3b0   : >> { %v2367_v41 = vsel %vm2363_vm4, 65537, %v7118_v12  ;;  %v3368_v58 = vsel %vm2373_vm10, 1.0, %v3659_v28 }
 0x3b1   : >> { %v2371_v4 = vunpack.c.l.b16 %v2367_v41  ;;  %vm2374_vm7 = vcmp.ne.s32.totalorder %v2370_v37, 0  ;;  %v2384_v40 = vadd.f32 %v3368_v58, %v3367_v55 }
 0x3b2   : >> { %v3369_v15 = vsel %vm2374_vm7, 1.0, %v3659_v28 }
 0x3b3   : >> { %vm2375_vm8 = vcmp.ne.s32.totalorder %v2371_v4, 0  ;;  %v2385_v44 = vadd.f32 %v3369_v15, %v2384_v40 }
 0x3b4   : >> { %v3370_v42 = vsel %vm2375_vm8, 1.0, %v3659_v28 }
 0x3b5   : >> { %v2386_v45 = vadd.f32 %v3370_v42, %v2385_v44 }
 0x3b7   : >> { %2387 = vadd.xlane.f32.xlu0 %v2386_v45 }
 0x440   : >> { %v2388_v32 = vpop.xlane.xlu0 %2387 }
 0x441   : >> { %v2389_v43 = vrot.slane %v2388_v32, 4 }
 0x443   : >> { %v2390_v12 = vadd.f32 %v2389_v43, %v2388_v32 }
 0x445   : >> { %v2391_v36 = vrot.slane %v2390_v12, 2 }
 0x447   : >> { %v2392_v61 = vadd.f32 %v2391_v36, %v2390_v12 }
 0x449   : >> { %v2393_v8 = vrot.slane %v2392_v61, 1 }
 0x44b   : >> { %v2394_v7 = vadd.f32 %v2393_v8, %v2392_v61 }
 0x44d   : >> { %3425 = vpush %v2394_v7 }
 0x47e   : >> { %s3426_s28 = spop %3425 }
 0x47f   : >> { %p2397_p13 = scmp.gt.f32.partialorder %s3426_s28, 0.5 }
 0x481   : >> { %p230_p12 = pnand %p2397_p13, %p228_p1 }
 0x482   : > { %v6546_v34 = vld [vmem:[#allocation3] sm:$0xf] (%p230_p12)  ;;  %v6548_v10 = vld [vmem:[#allocation3 + $0x4] sm:$0xf] (%p230_p12)  ;;  %v6554_v46 = vld [vmem:[#allocation2] sm:$0xf] (%p230_p12) }
 0x483   : > { %233 = sbr.rel (!%p230_p12) target bundleno = 83 (0x53), region = 93  ;;  %v6552_v29 = vcombine.low (%p230_p12), %v6546_v34, %v6548_v10  ;;  %v6556_v18 = vld [vmem:[#allocation2 + $0x4] sm:$0xf] (%p230_p12)  ;;  %s3660_s24 = smov (%p230_p12), 1   ;;  %v6566_v53 = vld [vmem:[#allocation3 + $0x8] sm:$0xf] (%p230_p12)  ;;  %v3374_v15 = vcombine.low (%p230_p12), %v6546_v34, %v6546_v34  ;;  %v3398_v40 = vcombine.low (%p230_p12), %v6554_v46, %v6554_v46 }
 0x484   : > { %v6560_v9 = vcombine.low (%p230_p12), %v6554_v46, %v6556_v18  ;;  %v6568_v13 = vld [vmem:[#allocation3 + $0xc] sm:$0xf] (%p230_p12)  ;;  %s3661_s26 = smov (%p230_p12), 127   ;;  %v6578_v30 = vld [vmem:[#allocation2 + $0x8] sm:$0xf] (%p230_p12)  ;;  %vm2479_vm15 = vcmask (%p230_p12), 1041408  }
 0x485   : > { %2507 = vrot.lane.b32.xlu0 (%p230_p12), %v6552_v29, %s3660_s24  ;;  %v6574_v6 = vcombine.low (%p230_p12), %v6566_v53, %v6568_v13  ;;  %v6580_v60 = vld [vmem:[#allocation2 + $0xc] sm:$0xf] (%p230_p12)  ;;  %v3371_v49 = vcombine.low (%p230_p12), %v6568_v13, %v6568_v13  ;;  %v2461_v37 = vshrl.u32 (%p230_p12), %v6552_v29, 16  ;;  %v2464_v4 = vshll.u32 (%p230_p12), %v6552_v29, 16  ;;  %s3420_s4 = sshll.u32 (%p230_p12), %s3699_s13, 7  ;;  %s3061_s19 = sshll.u32 (%p230_p12), %s3848_s6, 4  ;;  %s3062_s19 = int_to_ptr.vmem [resolvable:$true] %s3061_s19 }
 0x486   : > { %2803 = vrot.lane.b32.xlu1 (%p230_p12), %v6560_v9, %s3660_s24  ;;  %v6586_v47 = vcombine.low (%p230_p12), %v6578_v30, %v6580_v60  ;;  %v3397_v28 = vcombine.low (%p230_p12), %v6580_v60, %v6580_v60  ;;  %v2762_v7 = vshrl.u32 (%p230_p12), %v6560_v9, 16  ;;  %vm2459_vm5 = vsmask.f32 (%p230_p12), 1280  ;;  %s6846_s5 = scalar_lea.hbm (%p230_p12), %s6886_s2, %s3420_s4  ;;  %s3048_s14 = scalar_lea.sflag (%p230_p12), [#allocation6], %s3834_s16 }
 0x487   : > { %v2443_v24 = vshrl.u32 (%p230_p12), %v3371_v49, 16  ;;  %v2446_v41 = vshll.u32 (%p230_p12), %v3371_v49, 16  ;;  %v2463_v44 = vrot.slane (%p230_p12), %v2461_v37, 6  ;;  %v2466_v42 = vrot.slane (%p230_p12), %v2464_v4, 7  ;;  %vm6658_vm0 = vmand (%p230_p12), %vm2479_vm15, %vm2459_vm5  ;;  %s3574_s20 = scalar_lea.vmem (%p230_p12), %s3062_s19, 128  ;;  %p7614_p10 = scmp.ne.s32.totalorder (%p230_p12), %s6982_s21, 0 }
 0x488   : > { %v2753_v45 = vshrl.u32 %v3397_v28, 16  ;;  %v2756_v32 = vshll.u32 %v3397_v28, 16  ;;  %v2469_v43 = vshrl.u32 %v6574_v6, 16  ;;  %v2472_v12 = vshll.u32 %v6574_v6, 16  ;;  %p3575_p7 = scmp.ne.s32.totalorder %s3062_s19, %s3574_s20  ;;  %s3662_s13 = smov [#allocation9]  }
 0x489   : > { %2515 = vrot.lane.b32.xlu0 %v6552_v29, %s3661_s26  ;;  %v6640_v55 = vrot.slane %v2443_v24, 2  ;;  %v6642_v58 = vrot.slane %v2446_v41, 3  ;;  %v2483_v36 = vrot.slane %v2461_v37, 1  ;;  %v2770_v61 = vshrl.u32 %v6586_v47, 16  ;;  %s3578_s17 = sshll.u32 %s3662_s13, 4  ;;  %s3579_s17 = int_to_ptr.vmem [resolvable:$false] %s3578_s17 }
 0x48a   : > { %2811 = vrot.lane.b32.xlu1 %v6560_v9, %s3661_s26  ;;  %v2773_v8 = vshll.u32 %v6586_v47, 16  ;;  %vm2482_vm6 = vsmask.f32 6400  ;;  %vm2502_vm13 = vcmask 1046528   ;;  %v2792_v49 = vshrl.u32 %v3398_v40, 16  ;;  %p3576_p0 = pnand %p3575_p7, %p7614_p10  ;;  %s3580_s28 = scalar_lea.vmem %s3579_s17, 256 }
 0x48b   : > { %v2795_v24 = vshll.u32 %v3398_v40, 16  ;;  %vm6670_vm3 = vmand %vm2502_vm13, %vm2482_vm6  ;;  %vm7599_vm2 = vcmask 1040384   ;;  %vm7602_vm1 = vsmask.f32 7424  ;;  %vm7611_vm7 = vsmask.f32 256  ;;  %p3581_p4 = scmp.lt.s32.totalorder %s3062_s19, %s3579_s17  ;;  %p3582_p9 = scmp.lt.s32.totalorder %s3580_s28, %s3574_s20 }
 0x48c   : > { %vm7603_vm14 = vmmov %vm7599_vm2  ;;  %p3577_p2 = pneg %p3576_p0 }
 0x48d   : > { %2509 = vrot.lane.b32.xlu0 %v6574_v6, %s3660_s24  ;;  %vm7604_vm9 = vmmov %vm7602_vm1  ;;  %p3583_p11 = por %p3582_p9, %p3581_p4 }
 0x48e   : > { %2517 = vrot.lane.b32.xlu1 %v6574_v6, %s3661_s26  ;;  %vm7609_vm12 = vmmov %vm7599_vm2 }
 0x48f   : > { %vm7610_vm10 = vmmov %vm7599_vm2  ;;  %p3584_p3 = pnand %p3583_p11, %p3577_p2 }
 0x490   : > { %vm7613_vm8 = vmmov %vm7611_vm7 }
 0x491   : > { %2805 = vrot.lane.b32.xlu0 %v6586_v47, %s3660_s24 }
 0x492   : > { %2813 = vrot.lane.b32.xlu1 %v6586_v47, %s3661_s26 }
 0x4f7   : > { %v2508_v27 = vpop.permute.xlu0 %2507 }
 0x4f8   : > { %v2804_v50 = vpop.permute.xlu1 %2803 }
 0x4fb   : > { %v2516_v3 = vpop.permute.xlu0 %2515 }
 0x4fc   : > { %v2523_v17 = vmax.bf16 %v2516_v3, %v2508_v27  ;;  %v2812_v35 = vpop.permute.xlu1 %2811  ;;  %v2449_v27 = vor.u32 %v6642_v58, %v6640_v55  ;;  %v2765_v3 = vshll.u32 %v6560_v9, 16 }
 0x4fd   : > { %v2819_v14 = vmax.bf16 %v2812_v35, %v2804_v50  ;;  %v2484_v50 = vrot.slane %v2464_v4, 2  ;;  %v2494_v35 = vshrl.u32 %v3374_v15, 16 }
 0x4fe   : > { %v3375_v59 = vcombine.low %v2523_v17, %v2523_v17  ;;  %v3376_v26 = vcombine.high %v2523_v17, %v2523_v17  ;;  %v2467_v17 = vor.u32 %v2466_v42, %v2463_v44 }
 0x4ff   : > { %v3399_v31 = vcombine.low %v2819_v14, %v2819_v14  ;;  %v3400_v1 = vcombine.high %v2819_v14, %v2819_v14  ;;  %v2510_v19 = vpop.permute.xlu0 %2509  ;;  %v2497_v14 = vshll.u32 %v3374_v15, 16 }
 0x500   : > { %v6595_v23 = vmax.bf16 %v3375_v59, %v6546_v34  ;;  %v6598_v54 = vmax.bf16 %v3376_v26, %v6548_v10  ;;  %v2518_v51 = vpop.permute.xlu1 %2517  ;;  %v2486_v59 = vrot.slane %v2469_v43, 1  ;;  %v2487_v26 = vrot.slane %v2472_v12, 2 }
 0x501   : > { %v2524_v25 = vmax.bf16 %v2518_v51, %v2510_v19  ;;  %v6601_v56 = vmax.bf16 %v3399_v31, %v6554_v46  ;;  %v6604_v20 = vmax.bf16 %v3400_v1, %v6556_v18  ;;  %v2755_v31 = vrot.slane %v2753_v45, 2 }
 0x502   : > { %v3379_v11 = vcombine.low %v6595_v23, %v6598_v54  ;;  %v2758_v1 = vrot.slane %v2756_v32, 3  ;;  %v2784_v19 = vrot.slane %v2770_v61, 1  ;;  %v2785_v51 = vrot.slane %v2773_v8, 2 }
 0x503   : > { %v3377_v63 = vcombine.low %v2524_v25, %v2524_v25  ;;  %v3378_v38 = vcombine.high %v2524_v25, %v2524_v25  ;;  %v2806_v62 = vpop.permute.xlu0 %2805  ;;  %v3403_v48 = vcombine.low %v6601_v56, %v6604_v20  ;;  %v2764_v25 = vrot.slane %v2762_v7, 6 }
 0x504   : > { %2553 = vrot.lane.b32.xlu0 %v3379_v11, %s3660_s24  ;;  %2561 = vrot.lane.b32.xlu1 %v3379_v11, %s3661_s26  ;;  %v2814_v5 = vpop.permute.xlu1 %2813  ;;  %v2471_v11 = vrot.slane %v2469_v43, 6  ;;  %v2488_v4 = vor.u32 %v2487_v26, %v2486_v59  ;;  %v2759_v28 = vor.u32 %v2758_v1, %v2755_v31  ;;  %v2786_v44 = vor.u32 %v2785_v51, %v2784_v19 }
 0x505   : > { %v6611_v52 = vmax.bf16 %v3377_v63, %v6566_v53  ;;  %v6614_v21 = vmax.bf16 %v3378_v38, %v6568_v13  ;;  %v2820_v57 = vmax.bf16 %v2814_v5, %v2806_v62  ;;  %v2767_v62 = vrot.slane %v2765_v3, 7 }
 0x506   : > { %v2781_v5 = vrot.slane %v2762_v7, 1 }
 0x507   : > { %v3401_v33 = vcombine.low %v2820_v57, %v2820_v57  ;;  %v3402_v16 = vcombine.high %v2820_v57, %v2820_v57  ;;  %v3380_v39 = vcombine.low %v6611_v52, %v6614_v21  ;;  %v2782_v57 = vrot.slane %v2765_v3, 2 }
 0x508   : > { %2857 = vrot.lane.b32.xlu1 %v3403_v48, %s3661_s26  ;;  %2849 = vrot.lane.b32.xlu0 %v3403_v48, %s3660_s24  ;;  %v2474_v48 = vrot.slane %v2472_v12, 7  ;;  %v2768_v42 = vor.u32 %v2767_v62, %v2764_v25  ;;  %v2775_v3 = vrot.slane %v2773_v8, 7 }
 0x509   : > { %v6623_v0 = vmax.bf16 %v3401_v33, %v6578_v30  ;;  %v6626_v22 = vmax.bf16 %v3402_v16, %v6580_v60  ;;  %v2496_v16 = vrot.slane %v2494_v35, 1  ;;  %v2783_v45 = vor.u32 %v2782_v57, %v2781_v5 }
 0x50a   : > { %v2475_v32 = vor.u32 %v2474_v48, %v2471_v11  ;;  %v2794_v35 = vrot.slane %v2792_v49, 1 }
 0x50b   : > { %v3404_v2 = vcombine.low %v6623_v0, %v6626_v22  ;;  %v6690_v8 = vsel %vm2482_vm6, %v2783_v45, %v2786_v44 }
 0x50c   : > { %2563 = vrot.lane.b32.xlu1 %v3380_v39, %s3661_s26  ;;  %2555 = vrot.lane.b32.xlu0 %v3380_v39, %s3660_s24  ;;  %v2499_v39 = vrot.slane %v2497_v14, 2  ;;  %v2797_v14 = vrot.slane %v2795_v24, 2  ;;  %v6693_v51 = vsel %vm2459_vm5, %v2467_v17, %v2475_v32 }
 0x50e   : > { %v2798_v62 = vor.u32 %v2797_v14, %v2794_v35 }
 0x510   : > { %2859 = vrot.lane.b32.xlu1 %v3404_v2, %s3661_s26  ;;  %2851 = vrot.lane.b32.xlu0 %v3404_v2, %s3660_s24  ;;  %v2485_v2 = vor.u32 %v2484_v50, %v2483_v36  ;;  %v2500_v36 = vor.u32 %v2499_v39, %v2496_v16  ;;  %v2772_v50 = vrot.slane %v2770_v61, 6  ;;  %v6687_v61 = vsel %vm6658_vm0, %v2759_v28, %v2768_v42 }
 0x512   : > { %v6683_v19 = vsel %vm2482_vm6, %v2485_v2, %v2488_v4  ;;  %v6707_v11 = vsel %vm6670_vm3, %v2488_v4, %v2500_v36 }
 0x576   : > { %v2554_v63 = vpop.permute.xlu0 %2553  ;;  %v2562_v38 = vpop.permute.xlu1 %2561 }
 0x577   : > { %v2569_v33 = vmax.bf16 %v2562_v38, %v2554_v63  ;;  %v2776_v38 = vor.u32 %v2775_v3, %v2772_v50 }
 0x579   : > { %v3381_v41 = vcombine.low %v2569_v33, %v2569_v33  ;;  %v3382_v37 = vcombine.high %v2569_v33, %v2569_v33  ;;  %v6739_v28 = vsel %vm2459_vm5, %v2768_v42, %v2776_v38 }
 0x57a   : > { %v2850_v55 = vpop.permute.xlu0 %2849  ;;  %v2858_v58 = vpop.permute.xlu1 %2857 }
 0x57b   : > { %v6663_v43 = vmax.bf16 %v3381_v41, %v6595_v23  ;;  %v6666_v40 = vmax.bf16 %v3382_v37, %v6598_v54  ;;  %v2865_v12 = vmax.bf16 %v2858_v58, %v2850_v55  ;;  %v6680_v54 = vsel %vm6658_vm0, %v2449_v27, %v2467_v17 }
 0x57c   : > { %v2505_v39 = vmax.bf16 %v6683_v19, %v6680_v54  ;;  %v6743_v55 = vsel %vm6670_vm3, %v2786_v44, %v2798_v62 }
 0x57d   : > { %v6676_v59 = vcombine.low %v6663_v43, %v6666_v40  ;;  %v3405_v23 = vcombine.low %v2865_v12, %v2865_v12  ;;  %v3406_v26 = vcombine.high %v2865_v12, %v2865_v12 }
 0x57e   : > { %v2556_v31 = vpop.permute.xlu0 %2555  ;;  %v2564_v1 = vpop.permute.xlu1 %2563 }
 0x57f   : > { %v6696_v25 = vmax.bf16 %v3405_v23, %v6601_v56  ;;  %v6699_v27 = vmax.bf16 %v3406_v26, %v6604_v20  ;;  %2679 = vrot.lane.b32.xlu1 %v6676_v59, %s3661_s26  ;;  %2671 = vrot.lane.b32.xlu0 %v6676_v59, %s3660_s24  ;;  %v2607_v63 = vshrl.u32 %v6676_v59, 16  ;;  %v2570_v17 = vmax.bf16 %v2564_v1, %v2556_v31 }
 0x580   : > { %v6712_v56 = vcombine.low %v6663_v43, %v6663_v43  ;;  %v2610_v5 = vshll.u32 %v6676_v59, 16  ;;  %v6979_v12 = vrot.slane %v6676_v59, 7  ;;  %v2657_v42 = vrot.slane %v6676_v59, 1 }
 0x581   : > { %v6716_v20 = vcombine.low %v6696_v25, %v6699_v27  ;;  %v3383_v57 = vcombine.low %v2570_v17, %v2570_v17  ;;  %v3384_v48 = vcombine.high %v2570_v17, %v2570_v17  ;;  %v6721_v2 = vrot.slane %v2607_v63, 7 }
 0x582   : > { %v2852_v33 = vpop.permute.xlu0 %2851  ;;  %v2860_v16 = vpop.permute.xlu1 %2859  ;;  %v2636_v58 = vshll.u32 %v6712_v56, 16  ;;  %v2627_v32 = vrot.slane %v2610_v5, 1 }
 0x583   : > { %v2902_v49 = vshrl.u32 %v6716_v20, 16  ;;  %2967 = vrot.lane.b32.xlu1 %v6716_v20, %s3661_s26  ;;  %2959 = vrot.lane.b32.xlu0 %v6716_v20, %s3660_s24  ;;  %v6733_v37 = vmax.bf16 %v3383_v57, %v6611_v52  ;;  %v6736_v4 = vmax.bf16 %v3384_v48, %v6614_v21  ;;  %v2905_v15 = vshll.u32 %v6716_v20, 16  ;;  %v7600_v48 = vld [vmem:[#allocation13_spill] sm:$0xff] }
 0x584   : > { %v2866_v45 = vmax.bf16 %v2860_v16, %v2852_v33  ;;  %v2612_v44 = vor.u32 %v2610_v5, %v6721_v2  ;;  %v2628_v31 = vor.u32 %v2627_v32, %v2607_v63  ;;  %v2661_v5 = vrot.slane %v6712_v56, 1 }
 0x585   : > { %v3385_v52 = vcombine.low %v6736_v4, %v6736_v4  ;;  %v6752_v21 = vcombine.low %v6733_v37, %v6736_v4  ;;  %v6756_v36 = vrot.slane %v2902_v49, 7  ;;  %v2919_v1 = vrot.slane %v2905_v15, 1 }
 0x586   : > { %v3407_v7 = vcombine.low %v2866_v45, %v2866_v45  ;;  %v3408_v50 = vcombine.high %v2866_v45, %v2866_v45  ;;  %v3412_v63 = vcombine.low %v6696_v25, %v6696_v25  ;;  %vm7601_vm11 = vnez %v7600_v48 }
 0x587   : > { %v2593_v3 = vshrl.u32 %v3385_v52, 16  ;;  %v2647_v35 = vrot.slane %v3385_v52, 3  ;;  %2681 = vrot.lane.b32.xlu1 %v6752_v21, %s3661_s26  ;;  %2673 = vrot.lane.b32.xlu0 %v6752_v21, %s3660_s24  ;;  %v2617_v14 = vshll.u32 %v6752_v21, 16  ;;  %v2658_v23 = vrot.slane %v6752_v21, 1 }
 0x588   : > { %v6765_v26 = vmax.bf16 %v3407_v7, %v6623_v0  ;;  %v6768_v54 = vmax.bf16 %v3408_v50, %v6626_v22  ;;  %v2938_v16 = vrot.slane %v6716_v20, 7  ;;  %v2907_v7 = vor.u32 %v2905_v15, %v6756_v36 }
 0x589   : > { %v2595_v19 = vrot.slane %v2593_v3, 3  ;;  %v2655_v17 = vsel %vm7599_vm2, %v2647_v35, %v6979_v12  ;;  %v2629_v38 = vrot.slane %v2617_v14, 1  ;;  %v2659_v62 = vsel %vm2502_vm13, %v2657_v42, %v2658_v23 }
 0x58a   : > { %v3409_v57 = vcombine.low %v6768_v54, %v6768_v54  ;;  %v3411_v0 = vcombine.low %v6765_v26, %v6768_v54  ;;  %v2667_v22 = vmax.bf16 %v2659_v62, %v2655_v17  ;;  %v2920_v50 = vor.u32 %v2919_v1, %v2902_v49 }
 0x58b   : > { %v2625_v33 = vsel %vm7601_vm11, %v2595_v19, %v2612_v44  ;;  %v2630_v45 = vsel %vm7602_vm1, %v2628_v31, %v2629_v38  ;;  %v2946_v3 = vrot.slane %v6716_v20, 1  ;;  %v2638_v31 = vrot.slane %v2636_v58, 1 }
 0x58c   : > { %v2889_v32 = vshrl.u32 %v3409_v57, 16  ;;  %v2937_v52 = vrot.slane %v3409_v57, 3  ;;  %2969 = vrot.lane.b32.xlu1 %v3411_v0, %s3661_s26  ;;  %2961 = vrot.lane.b32.xlu0 %v3411_v0, %s3660_s24  ;;  %v2643_v56 = vmax.bf16 %v2630_v45, %v2625_v33  ;;  %v2912_v42 = vshll.u32 %v3411_v0, 16 }
 0x58d   : > { %v2947_v35 = vrot.slane %v3411_v0, 1  ;;  %v2928_v41 = vshll.u32 %v3412_v63, 16  ;;  %v2614_v12 = vshrl.u32 %v6752_v21, 16  ;;  %v2950_v15 = vrot.slane %v3412_v63, 1 }
 0x58e   : > { %v2891_v17 = vrot.slane %v2889_v32, 3  ;;  %v2944_v44 = vsel %vm7603_vm14, %v2937_v52, %v2938_v16  ;;  %v2645_v19 = vmax.bf16 %v2643_v56, %v2505_v39  ;;  %v2921_v62 = vrot.slane %v2912_v42, 1 }
 0x58f   : > { %v2948_v57 = vsel %vm2502_vm13, %v2946_v3, %v2947_v35  ;;  %v2616_v32 = vrot.slane %v2614_v12, 7  ;;  %v2631_v52 = vor.u32 %v2629_v38, %v2614_v12  ;;  %v2649_v39 = vrot.slane %v6752_v21, 7 }
 0x590   : > { %v2918_v33 = vsel %vm7601_vm11, %v2891_v17, %v2907_v7  ;;  %v6794_v45 = vmax.bf16 %v2667_v22, %v2645_v19  ;;  %v2922_v49 = vsel %vm7604_vm9, %v2920_v50, %v2921_v62  ;;  %v2955_v20 = vmax.bf16 %v2948_v57, %v2944_v44  ;;  %v7606_v17 = vld [vmem:[#allocation14_spill] sm:$0xff] }
 0x591   : > { %v2933_v1 = vmax.bf16 %v2922_v49, %v2918_v33  ;;  %v2665_v58 = vsel %vm2502_vm13, %v2658_v23, %v2661_v5  ;;  %v2909_v56 = vshrl.u32 %v3411_v0, 16  ;;  %v2939_v3 = vrot.slane %v3411_v0, 7 }
 0x592   : > { %v2930_v24 = vrot.slane %v2928_v41, 1  ;;  %v7605_v48 = vmax.bf16 %v6690_v8, %v6687_v61  ;;  %v2619_v22 = vor.u32 %v2617_v14, %v2616_v32  ;;  %vm7607_vm4 = vnez %v7606_v17 }
 0x593   : > { %v2642_v50 = vsel %vm7607_vm4, %v2631_v52, %v2638_v31  ;;  %v7608_v63 = vrot.slane %v6676_v59, 7  ;;  %v2911_v12 = vrot.slane %v2909_v56, 7  ;;  %v2923_v38 = vor.u32 %v2921_v62, %v2909_v56 }
 0x594   : > { %v2935_v7 = vmax.bf16 %v2933_v1, %v7605_v48  ;;  %v2940_v21 = vsel %vm7610_vm10, %v2938_v16, %v2939_v3  ;;  %v2620_v41 = vsel %vm7611_vm7, %v6721_v2, %v2619_v22  ;;  %v2953_v61 = vsel %vm2502_vm13, %v2947_v35, %v2950_v15 }
 0x595   : > { %v2650_v44 = vsel %vm7609_vm12, %v7608_v63, %v2649_v39  ;;  %v2644_v8 = vmax.bf16 %v2642_v50, %v2620_v41  ;;  %v2914_v14 = vor.u32 %v2912_v42, %v2911_v12  ;;  %v2932_v0 = vsel %vm7607_vm4, %v2923_v38, %v2930_v24 }
 0x596   : > { %v2957_v23 = vmax.bf16 %v2955_v20, %v2935_v7  ;;  %v2668_v5 = vmax.bf16 %v2665_v58, %v2650_v44  ;;  %v2956_v19 = vmax.bf16 %v2953_v61, %v2940_v21  ;;  %v2802_v59 = vmax.bf16 %v6743_v55, %v6739_v28 }
 0x597   : > { %v7612_v62 = vmax.bf16 %v6707_v11, %v6693_v51  ;;  %v2915_v31 = vsel %vm7613_vm8, %v6756_v36, %v2914_v14  ;;  %v2407_v35 = vunpack.c.l.bf16 %v6554_v46  ;;  %v2408_v42 = vunpack.c.l.bf16 %v6556_v18 }
 0x598   : > { %v2934_v2 = vmax.bf16 %v2932_v0, %v2915_v31  ;;  %v2409_v24 = vunpack.c.l.bf16 %v6578_v30  ;;  %v2423_v28 = vunpack.c.l.bf16 %v6546_v34  ;;  %v2424_v55 = vunpack.c.l.bf16 %v6548_v10 }
 0x599   : > { %v2646_v16 = vmax.bf16 %v2644_v8, %v7612_v62  ;;  %v2411_v20 = vadd.f32 %v2408_v42, %v2407_v35  ;;  %v2410_v51 = vunpack.c.l.bf16 %v6580_v60  ;;  %v2425_v36 = vunpack.c.l.bf16 %v6566_v53 }
 0x59a   : > { %v2936_v33 = vmax.bf16 %v2934_v2, %v2802_v59  ;;  %v2427_v15 = vadd.f32 %v2424_v55, %v2423_v28  ;;  %v2426_v46 = vunpack.c.l.bf16 %v6568_v13 }
 0x59b   : > { %v2670_v57 = vmax.bf16 %v2668_v5, %v2646_v16  ;;  %v2412_v11 = vadd.f32 %v2411_v20, %v2409_v24 }
 0x59c   : > { %v2958_v49 = vmax.bf16 %v2956_v19, %v2936_v33  ;;  %v2428_v32 = vadd.f32 %v2427_v15, %v2425_v36 }
 0x59d   : > { %v2413_v1 = vadd.f32 %v2412_v11, %v2410_v51 }
 0x59e   : > { %v2429_v18 = vadd.f32 %v2428_v32, %v2426_v46 }
 0x5ab   : > { %2414 = vadd.xlane.f32.xlu0 %v2413_v1 }
 0x5b0   : > { %2430 = vadd.xlane.f32.xlu1 %v2429_v18 }
 0x5f1   : > { %v2672_v52 = vpop.permute.xlu0 %2671  ;;  %v2680_v30 = vpop.permute.xlu1 %2679 }
 0x5f2   : > { %v2687_v39 = vmax.bf16 %v2680_v30, %v2672_v52 }
 0x5f4   : > { %v3389_v58 = vcombine.low %v2687_v39, %v2687_v39  ;;  %v3390_v34 = vcombine.high %v2687_v39, %v2687_v39 }
 0x5f5   : > { %v2960_v56 = vpop.permute.xlu0 %2959  ;;  %v2968_v10 = vpop.permute.xlu1 %2967 }
 0x5f6   : > { %v2703_v60 = vmax.bf16 %v3389_v58, %v6663_v43  ;;  %v2704_v3 = vmax.bf16 %v3390_v34, %v6666_v40  ;;  %v2975_v53 = vmax.bf16 %v2968_v10, %v2960_v56 }
 0x5f8   : > { %v3393_v48 = vcombine.low %v2703_v60, %v2704_v3  ;;  %v3413_v7 = vcombine.low %v2975_v53, %v2975_v53  ;;  %v3414_v22 = vcombine.high %v2975_v53, %v2975_v53 }
 0x5f9   : > { %v2674_v50 = vpop.permute.xlu0 %2673  ;;  %v2682_v63 = vpop.permute.xlu1 %2681 }
 0x5fa   : > { %v2991_v13 = vmax.bf16 %v3413_v7, %v6696_v25  ;;  %v2992_v17 = vmax.bf16 %v3414_v22, %v6699_v27  ;;  %v2719_v44 = vmax.bf16 %v3393_v48, %v6794_v45  ;;  %v2688_v12 = vmax.bf16 %v2682_v63, %v2674_v50 }
 0x5fc   : > { %v3417_v38 = vcombine.low %v2991_v13, %v2992_v17  ;;  %v3391_v21 = vcombine.low %v2688_v12, %v2688_v12  ;;  %v3392_v41 = vcombine.high %v2688_v12, %v2688_v12  ;;  %v2733_v8 = vmul.bf16 %v6560_v9, %v2719_v44 }
 0x5fd   : > { %v3031_v12 = vlaneseq }
 0x5fe   : > { %v2705_v43 = vmax.bf16 %v3391_v21, %v6733_v37  ;;  %v2706_v40 = vmax.bf16 %v3392_v41, %v6736_v4  ;;  %v2962_v5 = vpop.permute.xlu0 %2961  ;;  %v2970_v61 = vpop.permute.xlu1 %2969  ;;  %v3007_v14 = vmax.bf16 %v3417_v38, %v2957_v23  ;;  %v2735_v62 = vunpack.c.l.bf16 %v2733_v8 }
 0x5ff   : > { %v2976_v25 = vmax.bf16 %v2970_v61, %v2962_v5  ;;  %v2736_v45 = vunpack.c.h.bf16 %v2733_v8  ;;  %v3034_v38 = vand.u32 127, %v3031_v12  ;;  %v3032_v21 = vshrl.u32 %v3031_v12, 7 }
 0x600   : > { %v3394_v0 = vcombine.low %v2705_v43, %v2706_v40  ;;  %v3011_v37 = vmul.bf16 %v6552_v29, %v3007_v14 }
 0x601   : > { %v3415_v27 = vcombine.low %v2976_v25, %v2976_v25  ;;  %v3416_v19 = vcombine.high %v2976_v25, %v2976_v25  ;;  %v2739_v42 = vadd.f32 %v2736_v45, %v2735_v62  ;;  %vm3037_vm5 = vcmp.eq.s32.totalorder %v3034_v38, 2 }
 0x602   : > { %v2720_v59 = vmax.bf16 %v3394_v0, %v2670_v57  ;;  %v3013_v23 = vunpack.c.l.bf16 %v3011_v37  ;;  %v3014_v33 = vunpack.c.h.bf16 %v3011_v37  ;;  %vm3036_vm15 = vcmp.eq.s32.totalorder %v3034_v38, 1 }
 0x603   : > { %v2993_v16 = vmax.bf16 %v3415_v27, %v6765_v26  ;;  %v2994_v31 = vmax.bf16 %v3416_v19, %v6768_v54  ;;  %vm3035_vm6 = vcmp.eq.s32.totalorder %v3034_v38, 0  ;;  %vm3044_vm13 = vcmp.eq.s32.totalorder %v3032_v21, 0 }
 0x604   : > { %v2734_v4 = vmul.bf16 %v6586_v47, %v2720_v59  ;;  %v3017_v51 = vadd.f32 %v3014_v33, %v3013_v23 }
 0x605   : > { %v3418_v2 = vcombine.low %v2993_v16, %v2994_v31 }
 0x606   : > { %v2737_v35 = vunpack.c.l.bf16 %v2734_v4  ;;  %v2738_v24 = vunpack.c.h.bf16 %v2734_v4 }
 0x607   : > { %v3008_v9 = vmax.bf16 %v3418_v2, %v2958_v49 }
 0x608   : > { %v2740_v20 = vadd.f32 %v2739_v42, %v2737_v35 }
 0x609   : > { %v3012_v57 = vmul.bf16 %v6574_v6, %v3008_v9 }
 0x60a   : > { %v2741_v28 = vadd.f32 %v2740_v20, %v2738_v24 }
 0x60b   : > { %v3015_v55 = vunpack.c.l.bf16 %v3012_v57  ;;  %v3016_v26 = vunpack.c.h.bf16 %v3012_v57 }
 0x60c   : > { %2742 = vadd.xlane.f32.xlu0 %v2741_v28 }
 0x60d   : > { %v3018_v54 = vadd.f32 %v3017_v51, %v3015_v55 }
 0x60f   : > { %v3019_v11 = vadd.f32 %v3018_v54, %v3016_v26 }
 0x611   : > { %3020 = vadd.xlane.f32.xlu0 %v3019_v11 }
 0x634   : > { %v2415_v29 = vpop.xlane.xlu0 %2414 }
 0x635   : > { %v2416_v47 = vrot.slane %v2415_v29, 4 }
 0x637   : > { %v2417_v36 = vadd.f32 %v2416_v47, %v2415_v29 }
 0x639   : > { %v2418_v15 = vrot.slane %v2417_v36, 2  ;;  %v2431_v1 = vpop.xlane.xlu1 %2430 }
 0x63a   : > { %v2432_v49 = vrot.slane %v2431_v1, 4 }
 0x63b   : > { %v2419_v46 = vadd.f32 %v2418_v15, %v2417_v36 }
 0x63c   : > { %v2433_v32 = vadd.f32 %v2432_v49, %v2431_v1 }
 0x63d   : > { %v2420_v18 = vrot.slane %v2419_v46, 1 }
 0x63e   : > { %v2434_v52 = vrot.slane %v2433_v32, 2 }
 0x63f   : > { %v2421_v30 = vadd.f32 %v2420_v18, %v2419_v46 }
 0x640   : > { %v2435_v6 = vadd.f32 %v2434_v52, %v2433_v32 }
 0x641   : > { %3427 = vpush %v2421_v30 }
 0x642   : > { %v2436_v39 = vrot.slane %v2435_v6, 1 }
 0x644   : > { %v2437_v58 = vadd.f32 %v2436_v39, %v2435_v6 }
 0x646   : > { %3429 = vpush %v2437_v58 }
 0x672   : > { %s3428_s27 = spop %3427 }
 0x677   : > { %s3430_s23 = spop %3429 }
 0x695   : > { %v2743_v34 = vpop.xlane.xlu0 %2742 }
 0x696   : > { %v2744_v56 = vrot.slane %v2743_v34, 4 }
 0x698   : > { %v2745_v10 = vadd.f32 %v2744_v56, %v2743_v34 }
 0x69a   : > { %v2746_v60 = vrot.slane %v2745_v10, 2  ;;  %v3021_v3 = vpop.xlane.xlu0 %3020 }
 0x69b   : > { %v3022_v53 = vrot.slane %v3021_v3, 4 }
 0x69c   : > { %v2747_v48 = vadd.f32 %v2746_v60, %v2745_v10 }
 0x69d   : > { %v3023_v7 = vadd.f32 %v3022_v53, %v3021_v3 }
 0x69e   : > { %v2748_v22 = vrot.slane %v2747_v48, 1 }
 0x69f   : > { %v3024_v13 = vrot.slane %v3023_v7, 2 }
 0x6a0   : > { %v2749_v17 = vadd.f32 %v2748_v22, %v2747_v48 }
 0x6a1   : > { %v3025_v50 = vadd.f32 %v3024_v13, %v3023_v7 }
 0x6a2   : > { %3431 = vpush %v2749_v17 }
 0x6a3   : > { %v3026_v63 = vrot.slane %v3025_v50, 1 }
 0x6a5   : > { %v3027_v44 = vadd.f32 %v3026_v63, %v3025_v50 }
 0x6a7   : > { %3433 = vpush %v3027_v44 }
 0x6d3   : > { %s3432_s25 = spop %3431 }
 0x6d4   : > { %s3029_s7 = ssub.f32 %s3428_s27, %s3432_s25  ;;  %v3042_v5 = vstv %s3432_s25 }
 0x6d6   : > { %v3040_v43 = vstv %s3029_s7 }
 0x6d8   : > { %s3434_s8 = spop %3433 }
 0x6d9   : > { %s3030_s30 = ssub.f32 %s3430_s23, %s3434_s8 }
 0x6db   : > { %v3038_v41 = vstv %s3030_s30 }
 0x6dc   : > { %v3039_v40 = vsel %vm3037_vm5, %v3038_v41, 0.0 }
 0x6dd   : > { %v3041_v61 = vsel %vm3036_vm15, %v3040_v43, %v3039_v40 }
 0x6de   : > { %v3043_v8 = vsel %vm3035_vm6, %v3042_v5, %v3041_v61 }
 0x6df   : > { %v3045_v14 = vsel %vm3044_vm13, %v3043_v8, 0.0 }
 0x6e0   : > { %3046 = vst [vmem:[%s3848_s6] sm:$0xff] %v3045_v14 }
 0x6e1   : > { %3587 = shalt.err (!%p3584_p3)
}
 0x6e2   : > { %s3588_s6 = scalar_lea.hbm %s6846_s5, 128  ;;  %s3592_s26 = scalar_lea.hbm %s6886_s2, 256 }
 0x6e3   : > { %p3589_p5 = scmp.ne.s32.totalorder %s6846_s5, %s3588_s6  ;;  %p3593_p13 = scmp.lt.s32.totalorder %s6846_s5, %s6886_s2 }
 0x6e4   : > { %p3594_p1 = scmp.lt.s32.totalorder %s3592_s26, %s3588_s6 }
 0x6e5   : > { %p3590_p8 = pnand %p3589_p5, %p7614_p10 }
 0x6e6   : > { %p3595_p12 = por %p3594_p1, %p3593_p13 }
 0x6e7   : > { %p3591_p6 = pneg %p3590_p8 }
 0x6e9   : > { %p3596_p7 = pnand %p3595_p12, %p3591_p6 }
 0x6eb   : > { %3599 = shalt.err (!%p3596_p7)
}
 0x6ec   : > { %3439 = dma.vmem_to_hbm [thread:$0]  (%p7614_p10), %s3062_s19, 128, %s6846_s5, %s3048_s14  }
 0x6ed PF: > { %s3073_s25 = sand.u32 1, %s3634_s9   ;;  %p7615_p0 = scmp.ne.s32.totalorder %s6983_s22, 0 }
 0x6ee   : > { %p7616_p2 = scmp.ge.s32.totalorder %s3646_s12, 2  ;;  %s3074_s7 = scalar_lea.sflag [#allocation6], %s3073_s25 }
 0x6f0   : > { %p3449_p4 = pnand %p7616_p2, %p7615_p0 }
 0x6f2   : > { %p3450_p9 = pneg %p3449_p4 }
 0x6f4   : > { %3629 = dma.done.wait (%p3450_p9), %s3074_s7, 128  }
 0x6f5   : > { %3631 = vsyncadd (%p3450_p9), %s3074_s7, 4294967168  ;;  %p18_p11 = scmp.ge.s32.totalorder %s3703_s15, 4   ;;  %s7617_s9 = smov %s3638_s10 }
 0x6f6   : > { %s7618_s10 = smov %s3642_s11  ;;  %s7619_s11 = smov %s3715_s18 }
 0x6f7   : > { %s7620_s12 = smov %s3703_s15  ;;  %20 = sbr.rel (!%p18_p11) target bundleno = 7 (0x7), region = 104 }
 0x6fc   :  { %3079 = vsyncpa [#allocation5], 1 }
 0x6fd   :  { %3081 = vsyncpa [#allocation5 + $0x1], 1 }
 0x6fe   :  { %3082 = vsyncpa [#allocation8], 1 }
 0x6ff   :  { %3084 = vsyncpa [#allocation8 + $0x1], 1 }
 0x700   :  { %3085 = vsyncpa [#allocation6], 1 }
 0x701   :  { %3087 = vsyncpa [#allocation6 + $0x1], 1 }

</bundles_post_ra>
